<compile_context>
chip_gen: v7x
topology: tpu7x:2x2x1
jax: 0.10.0
libtpu: 0.0.40
codegen_flags: <defaults>
</compile_context>

<pallas_src>
import jax
import jax.numpy as jnp
from jax.experimental import pallas as pl

EPS = 1e-5


def conv1x1_bn_kernel(x_ref, w_ref, gb_ref, o_ref):
    """1x1 conv (MXU matmul) + training-mode BatchNorm, fused.

    x_ref : (Cin, P) or (N, Cin, P)  f32
    w_ref : (Cout, Cin)              f32
    gb_ref: (Cout, 2)                f32   [:,0]=gamma, [:,1]=beta
    o_ref : (Cout, P) or (N, Cout, P) f32
    """
    batched = len(x_ref.shape) == 3

    # bf16 MXU operands (cast fused into the kernel), f32 accumulation.
    xb = x_ref[...].astype(jnp.bfloat16)
    wb = w_ref[...].astype(jnp.bfloat16)

    if not batched:
        # (Cout, Cin) @ (Cin, P) -> (Cout, P)
        y = jnp.dot(wb, xb, preferred_element_type=jnp.float32)
        count = y.shape[-1]
    else:
        n, cin, p = x_ref.shape
        cout = w_ref.shape[0]
        # Batched matmul: (N, Cout, Cin) x (N, Cin, P) -> (N, Cout, P)
        wb3 = jnp.broadcast_to(wb[None, :, :], (n, cout, cin))
        y = jax.lax.dot_general(
            wb3, xb,
            dimension_numbers=(((2,), (1,)), ((0,), (0,))),
            preferred_element_type=jnp.float32)
        count = n * p

    inv = 1.0 / count

    # BatchNorm2d training forward: per-channel batch stats over (N, H, W).
    # Two-pass centered variance (no E[y^2]-E[y]^2 cancellation).
    s1 = jnp.sum(y, axis=-1, keepdims=True)          # (.., Cout, 1)
    if batched:
        s1 = jnp.sum(s1, axis=0)                      # (Cout, 1)
    mean = s1 * inv                                   # (Cout, 1)

    d = y - mean
    s2 = jnp.sum(d * d, axis=-1, keepdims=True)
    if batched:
        s2 = jnp.sum(s2, axis=0)
    var = s2 * inv                                    # biased variance, (Cout, 1)

    # Fold BN affine into one per-channel scale/shift -> 2 VPU ops per element.
    gb = gb_ref[...]                                  # (Cout, 2)
    gamma = gb[:, 0:1]                                # (Cout, 1)
    beta = gb[:, 1:2]                                 # (Cout, 1)
    scale = gamma * jax.lax.rsqrt(var + EPS)
    shift = beta - mean * scale
    o_ref[...] = (y * scale + shift).astype(o_ref.dtype)


@jax.jit
def conv1x1_bn(x_nchw, w_oihw, gamma, beta):
    """x_nchw: (N, Cin, H, W) f32, w_oihw: (Cout, Cin, 1, 1) f32, gamma/beta: (Cout,)."""
    N, Cin, H, W = x_nchw.shape
    Cout = w_oihw.shape[0]
    P = H * W

    w2d = w_oihw.reshape(Cout, Cin)                          # free reshape
    gb = jnp.stack([gamma.astype(jnp.float32),
                    beta.astype(jnp.float32)], axis=-1)      # (Cout, 2), ~4.6 KB

    if N == 1:
        # NCHW with N==1 is channels-major already: zero-transpose 2-D path.
        x_in = x_nchw.reshape(Cin, P)
        out_shape = jax.ShapeDtypeStruct((Cout, P), jnp.float32)
        in_specs = [
            pl.BlockSpec((Cin, P), lambda: (0, 0)),
            pl.BlockSpec((Cout, Cin), lambda: (0, 0)),
            pl.BlockSpec((Cout, 2), lambda: (0, 0)),
        ]
        out_specs = pl.BlockSpec((Cout, P), lambda: (0, 0))
    else:
        # Batched path: no wrapper transpose -- kernel does a batched matmul
        # on the free (N, Cin, H*W) view.
        x_in = x_nchw.reshape(N, Cin, P)
        out_shape = jax.ShapeDtypeStruct((N, Cout, P), jnp.float32)
        in_specs = [
            pl.BlockSpec((N, Cin, P), lambda: (0, 0, 0)),
            pl.BlockSpec((Cout, Cin), lambda: (0, 0)),
            pl.BlockSpec((Cout, 2), lambda: (0, 0)),
        ]
        out_specs = pl.BlockSpec((N, Cout, P), lambda: (0, 0, 0))

    cost = pl.CostEstimate(
        flops=2 * N * Cout * Cin * P,
        transcendentals=Cout,
        bytes_accessed=(x_in.size * x_in.dtype.itemsize
                        + Cout * Cin * 4 + Cout * 2 * 4
                        + N * Cout * P * 4),
    )

    out = pl.pallas_call(
        conv1x1_bn_kernel,
        out_shape=out_shape,
        in_specs=in_specs,
        out_specs=out_specs,
        cost_estimate=cost,
    )(x_in, w2d, gb)

    # (.., Cout, P) reshapes back to NCHW for free -- no output transpose.
    return out.reshape(N, Cout, H, W)


def reference(x_nchw, w_oihw, gamma, beta):
    """Pure-JAX reference with the same bf16 quantization of the MXU operands
    as the kernel; all other math in f32 (PyTorch training-mode BN forward)."""
    N, Cin, H, W = x_nchw.shape
    Cout = w_oihw.shape[0]
    xq = x_nchw.astype(jnp.bfloat16).astype(jnp.float32)
    wq = w_oihw.astype(jnp.bfloat16).astype(jnp.float32)
    x2d = jnp.transpose(xq, (0, 2, 3, 1)).reshape(-1, Cin)
    y = jnp.dot(x2d, wq.reshape(Cout, Cin).T, precision=jax.lax.Precision.HIGHEST)
    mean = jnp.mean(y, axis=0, keepdims=True)
    var = jnp.mean((y - mean) ** 2, axis=0, keepdims=True)   # biased
    out = (y - mean) * jax.lax.rsqrt(var + EPS) * gamma[None, :] + beta[None, :]
    return out.reshape(N, H, W, Cout).transpose(0, 3, 1, 2)


if __name__ == "__main__":
    key = jax.random.PRNGKey(0)
    kx, kw, kg, kb = jax.random.split(key, 4)

    # Shapes implied by the module: input (1, 96, 14, 14), conv weight (576, 96, 1, 1).
    x = jax.random.normal(kx, (1, 96, 14, 14), dtype=jnp.float32)
    w = jax.random.normal(kw, (576, 96, 1, 1), dtype=jnp.float32) * 0.05
    gamma = 1.0 + 0.1 * jax.random.normal(kg, (576,), dtype=jnp.float32)
    beta = 0.1 * jax.random.normal(kb, (576,), dtype=jnp.float32)

    out = jax.block_until_ready(conv1x1_bn(x, w, gamma, beta))

    ref = reference(x, w, gamma, beta)
    assert out.shape == (1, 576, 14, 14), out.shape
    assert jnp.allclose(out, ref, atol=1e-3, rtol=1e-3), "mismatch vs reference"

    # TODO(synk): BatchNorm running_mean/running_var buffer updates (training
    # side effect) are not modeled; they do not affect the returned tensor.

    print("KERNEL_OK")
</pallas_src>

<mosaic_0001>
module attributes {stable_mosaic.version = 11 : i64} {
  func.func @conv1x1_bn_kernel(%arg0: memref<96x196xf32, #tpu.memory_space<vmem>>, %arg1: memref<576x96xf32, #tpu.memory_space<vmem>>, %arg2: memref<576x2xf32, #tpu.memory_space<vmem>>, %arg3: memref<576x196xf32, #tpu.memory_space<vmem>>) attributes {dimension_semantics = [], scalar_prefetch = 0 : i64, scratch_operands = 0 : i64, tpu.core_type = #tpu.core_type<tc>} {
    %c0 = arith.constant 0 : index
    %c0_0 = arith.constant 0 : index
    %0 = vector.load %arg0[%c0, %c0_0] : memref<96x196xf32, #tpu.memory_space<vmem>>, vector<96x196xf32>
    %1 = arith.truncf %0 : vector<96x196xf32> to vector<96x196xbf16>
    %c0_1 = arith.constant 0 : index
    %c0_2 = arith.constant 0 : index
    %2 = vector.load %arg1[%c0_1, %c0_2] : memref<576x96xf32, #tpu.memory_space<vmem>>, vector<576x96xf32>
    %3 = arith.truncf %2 : vector<576x96xf32> to vector<576x96xbf16>
    %cst = arith.constant dense<0.000000e+00> : vector<576x196xf32>
    %4 = tpu.matmul %3, %1, %cst {dimension_numbers = #tpu.dot_dimension_numbers<[1], [0], [0], [1], [0, 0, 1, 1], [], []>} : vector<576x96xbf16>, vector<96x196xbf16>, vector<576x196xf32> -> vector<576x196xf32>
    %cst_3 = arith.constant dense<0.000000e+00> : vector<576xf32>
    %5 = vector.multi_reduction <add>, %4, %cst_3 [1] : vector<576x196xf32> to vector<576xf32>
    %6 = vector.shape_cast %5 : vector<576xf32> to vector<576x1xf32>
    %cst_4 = arith.constant 0.00510204071 : f32
    %7 = vector.broadcast %cst_4 : f32 to vector<576x1xf32>
    %8 = arith.mulf %6, %7 : vector<576x1xf32>
    %9 = vector.broadcast %8 : vector<576x1xf32> to vector<576x196xf32>
    %10 = arith.subf %4, %9 : vector<576x196xf32>
    %11 = arith.mulf %10, %10 : vector<576x196xf32>
    %cst_5 = arith.constant dense<0.000000e+00> : vector<576xf32>
    %12 = vector.multi_reduction <add>, %11, %cst_5 [1] : vector<576x196xf32> to vector<576xf32>
    %13 = vector.shape_cast %12 : vector<576xf32> to vector<576x1xf32>
    %cst_6 = arith.constant 0.00510204071 : f32
    %14 = vector.broadcast %cst_6 : f32 to vector<576x1xf32>
    %15 = arith.mulf %13, %14 : vector<576x1xf32>
    %c0_7 = arith.constant 0 : index
    %c0_8 = arith.constant 0 : index
    %16 = vector.load %arg2[%c0_7, %c0_8] : memref<576x2xf32, #tpu.memory_space<vmem>>, vector<576x2xf32>
    %17 = vector.extract_strided_slice %16 {offsets = [0, 0], sizes = [576, 1], strides = [1, 1]} : vector<576x2xf32> to vector<576x1xf32>
    %18 = vector.extract_strided_slice %16 {offsets = [0, 1], sizes = [576, 1], strides = [1, 1]} : vector<576x2xf32> to vector<576x1xf32>
    %cst_9 = arith.constant 9.99999974E-6 : f32
    %19 = vector.broadcast %cst_9 : f32 to vector<576x1xf32>
    %20 = arith.addf %15, %19 : vector<576x1xf32>
    %21 = math.rsqrt %20 : vector<576x1xf32>
    %22 = arith.mulf %17, %21 : vector<576x1xf32>
    %23 = arith.mulf %8, %22 : vector<576x1xf32>
    %24 = arith.subf %18, %23 : vector<576x1xf32>
    %25 = vector.broadcast %22 : vector<576x1xf32> to vector<576x196xf32>
    %26 = arith.mulf %4, %25 : vector<576x196xf32>
    %27 = vector.broadcast %24 : vector<576x1xf32> to vector<576x196xf32>
    %28 = arith.addf %26, %27 : vector<576x196xf32>
    %c0_10 = arith.constant 0 : index
    %c0_11 = arith.constant 0 : index
    %29 = vector.load %arg3[%c0_10, %c0_11] : memref<576x196xf32, #tpu.memory_space<vmem>>, vector<576x196xf32>
    tpu.vector_store %arg3[%c0_10, %c0_11], %28 {strides = array<i32>} : memref<576x196xf32, #tpu.memory_space<vmem>>, vector<576x196xf32>,
    return
  }
}

</mosaic_0001>

<bundles_post_ra>
// kernel: conv1x1_bn.1
= control target key start
LH: loop header
LB: loop body
LE: loop exit
PB: predicated region body
PF: predicated region fallthrough
CT: control target
= control target key end

     0   :  { %v7137_v3 = vmov 0   ;;  %vm159_vm0 = vcmask 785408   ;;  %vm661_vm1 = vcmask 556032   ;;  %s3796_s14 = smov 1   ;;  %s7133_s0 = inlined_call_operand.vmem [shape: f32[96,196], index: 0, kind: input, shape index: {}]   ;;  %s7134_s1 = inlined_call_operand.vmem [shape: f32[576,96], index: 1, kind: input, shape index: {}]   ;;  %s7135_s2 = inlined_call_operand.vmem [shape: f32[576,2], index: 2, kind: input, shape index: {}]   ;;  %s7136_s3 = inlined_call_operand.vmem [shape: f32[576,196], index: 3, kind: output, shape index: {}]  }
   0x1   :  { %v16_v0 = vld [vmem:[%s7133_s0 + $0x8] sm:$0xff]  ;;  %v18_v1 = vld [vmem:[%s7133_s0 + $0x18] sm:$0xff]  ;;  %v15_v2 = vld [vmem:[%s7133_s0] sm:$0xff]  ;;  %300 = vmatprep.mubr.bf16.mxu0 %v7137_v3  ;;  %480 = vmatprep.mubr.bf16.mxu1 %v7137_v3 }
   0x2   :  { %v40_v4 = vpack.c.bf16 %v18_v1, %v16_v0  ;;  %v17_v5 = vld [vmem:[%s7133_s0 + $0x10] sm:$0xff]  ;;  %v20_v6 = vld [vmem:[%s7133_s0 + $0x28] sm:$0xff]  ;;  %v22_v7 = vld [vmem:[%s7133_s0 + $0x38] sm:$0xff]  ;;  %3597 = vset.pattern.permute.xlu0 %v7137_v3  ;;  %3598 = vset.pattern.permute.xlu1 %v7137_v3 }
   0x3   :  { %v39_v8 = vpack.c.bf16 %v17_v5, %v15_v2  ;;  %v42_v9 = vpack.c.bf16 %v22_v7, %v20_v6  ;;  %v19_v10 = vld [vmem:[%s7133_s0 + $0x20] sm:$0xff]  ;;  %v21_v11 = vld [vmem:[%s7133_s0 + $0x30] sm:$0xff]  ;;  %v24_v12 = vld [vmem:[%s7133_s0 + $0x48] sm:$0xff] }
   0x4   :  { %268 = vmatprep.subr.bf16.mxu0 %v40_v4  ;;  %3582 = vmatprep.subr.bf16.mxu1 %v40_v4  ;;  %v26_v13 = vld [vmem:[%s7133_s0 + $0x58] sm:$0xff]  ;;  %v41_v14 = vpack.c.bf16 %v21_v11, %v19_v10  ;;  %v23_v16 = vld [vmem:[%s7133_s0 + $0x40] sm:$0xff]  ;;  %v25_v17 = vld [vmem:[%s7133_s0 + $0x50] sm:$0xff] }
   0x5   :  { %269 = vmatpush1.bf16.msra.mxu0 %v39_v8  ;;  %3588 = vmatpush1.bf16.msra.mxu1 %v39_v8  ;;  %v44_v15 = vpack.c.bf16 %v26_v13, %v24_v12  ;;  %v28_v18 = vld [vmem:[%s7133_s0 + $0x68] sm:$0xff]  ;;  %v30_v19 = vld [vmem:[%s7133_s0 + $0x78] sm:$0xff]  ;;  %v43_v20 = vpack.c.bf16 %v25_v17, %v23_v16  ;;  %v27_v22 = vld [vmem:[%s7133_s0 + $0x60] sm:$0xff] }
   0x6   :  { %270 = vmatprep.subr.bf16.mxu0 %v42_v9  ;;  %3583 = vmatprep.subr.bf16.mxu1 %v42_v9  ;;  %v46_v21 = vpack.c.bf16 %v30_v19, %v28_v18  ;;  %v29_v23 = vld [vmem:[%s7133_s0 + $0x70] sm:$0xff]  ;;  %v32_v24 = vld [vmem:[%s7133_s0 + $0x88] sm:$0xff]  ;;  %v34_v25 = vld [vmem:[%s7133_s0 + $0x98] sm:$0xff] }
   0x7   :  { %v45_v26 = vpack.c.bf16 %v29_v23, %v27_v22  ;;  %v48_v27 = vpack.c.bf16 %v34_v25, %v32_v24  ;;  %v31_v28 = vld [vmem:[%s7133_s0 + $0x80] sm:$0xff]  ;;  %v33_v29 = vld [vmem:[%s7133_s0 + $0x90] sm:$0xff]  ;;  %v36_v30 = vld [vmem:[%s7133_s0 + $0xa8] sm:$0xff] }
   0x8   :  { %v38_v31 = vld [vmem:[%s7133_s0 + $0xb8] sm:$0xff]  ;;  %v47_v32 = vpack.c.bf16 %v33_v29, %v31_v28  ;;  %v35_v34 = vld [vmem:[%s7133_s0 + $0xa0] sm:$0xff]  ;;  %v37_v35 = vld [vmem:[%s7133_s0 + $0xb0] sm:$0xff] }
   0x9   :  { %271 = vmatpush1.bf16.msra.mxu0 %v41_v14  ;;  %3589 = vmatpush1.bf16.msra.mxu1 %v41_v14  ;;  %v50_v33 = vpack.c.bf16 %v38_v31, %v36_v30  ;;  %v51_v36 = vld [vmem:[%s7134_s1] sm:$0xff]  ;;  %v49_v37 = vpack.c.bf16 %v37_v35, %v35_v34  ;;  %v52_v38 = vld [vmem:[%s7134_s1 + $0x8] sm:$0xff]  ;;  %v53_v43 = vld [vmem:[%s7134_s1 + $0x10] sm:$0xff] }
   0xa   :  { %272 = vmatprep.subr.bf16.mxu0 %v44_v15  ;;  %3584 = vmatprep.subr.bf16.mxu1 %v44_v15  ;;  %v87_v39 = vld [vmem:[%s7134_s1 + $0x120] sm:$0xff]  ;;  %v88_v40 = vld [vmem:[%s7134_s1 + $0x128] sm:$0xff]  ;;  %v123_v41 = vpack.c.bf16 %v52_v38, %v51_v36  ;;  %v54_v44 = vld [vmem:[%s7134_s1 + $0x18] sm:$0xff] }
   0xb   :  { %v141_v42 = vpack.c.bf16 %v88_v40, %v87_v39  ;;  %v89_v45 = vld [vmem:[%s7134_s1 + $0x130] sm:$0xff]  ;;  %v90_v46 = vld [vmem:[%s7134_s1 + $0x138] sm:$0xff]  ;;  %v124_v47 = vpack.c.bf16 %v54_v44, %v53_v43  ;;  %v55_v49 = vld [vmem:[%s7134_s1 + $0x20] sm:$0xff] }
   0xc   :  { %v142_v48 = vpack.c.bf16 %v90_v46, %v89_v45  ;;  %v56_v50 = vld [vmem:[%s7134_s1 + $0x28] sm:$0xff]  ;;  %v91_v51 = vld [vmem:[%s7134_s1 + $0x140] sm:$0xff]  ;;  %v57_v55 = vld [vmem:[%s7134_s1 + $0x30] sm:$0xff] }
   0xd   :  { %273 = vmatpush1.bf16.msra.mxu0 %v43_v20  ;;  %3590 = vmatpush1.bf16.msra.mxu1 %v43_v20  ;;  %v92_v52 = vld [vmem:[%s7134_s1 + $0x148] sm:$0xff]  ;;  %v125_v53 = vpack.c.bf16 %v56_v50, %v55_v49  ;;  %v58_v56 = vld [vmem:[%s7134_s1 + $0x38] sm:$0xff]  ;;  %v93_v57 = vld [vmem:[%s7134_s1 + $0x150] sm:$0xff] }
   0xe   :  { %274 = vmatprep.subr.bf16.mxu0 %v46_v21  ;;  %3585 = vmatprep.subr.bf16.mxu1 %v46_v21  ;;  %v143_v54 = vpack.c.bf16 %v92_v52, %v91_v51  ;;  %v94_v58 = vld [vmem:[%s7134_s1 + $0x158] sm:$0xff]  ;;  %v126_v59 = vpack.c.bf16 %v58_v56, %v57_v55  ;;  %v59_v61 = vld [vmem:[%s7134_s1 + $0x40] sm:$0xff]  ;;  %v60_v62 = vld [vmem:[%s7134_s1 + $0x48] sm:$0xff] }
   0xf   :  { %v144_v60 = vpack.c.bf16 %v94_v58, %v93_v57  ;;  %v95_v63 = vld [vmem:[%s7134_s1 + $0x160] sm:$0xff]  ;;  %v96_v0 = vld [vmem:[%s7134_s1 + $0x168] sm:$0xff]  ;;  %v127_v1 = vpack.c.bf16 %v60_v62, %v59_v61  ;;  %v61_v4 = vld [vmem:[%s7134_s1 + $0x50] sm:$0xff] }
  0x10   :  { %v145_v2 = vpack.c.bf16 %v96_v0, %v95_v63  ;;  %v62_v5 = vld [vmem:[%s7134_s1 + $0x58] sm:$0xff]  ;;  %v97_v6 = vld [vmem:[%s7134_s1 + $0x170] sm:$0xff]  ;;  %v63_v10 = vld [vmem:[%s7134_s1 + $0x60] sm:$0xff] }
  0x11   :  { %275 = vmatpush1.bf16.msra.mxu0 %v45_v26  ;;  %3591 = vmatpush1.bf16.msra.mxu1 %v45_v26  ;;  %v98_v7 = vld [vmem:[%s7134_s1 + $0x178] sm:$0xff]  ;;  %v128_v8 = vpack.c.bf16 %v62_v5, %v61_v4  ;;  %v64_v11 = vld [vmem:[%s7134_s1 + $0x68] sm:$0xff]  ;;  %v99_v12 = vld [vmem:[%s7134_s1 + $0x180] sm:$0xff] }
  0x12   :  { %276 = vmatprep.subr.bf16.mxu0 %v48_v27  ;;  %3586 = vmatprep.subr.bf16.mxu1 %v48_v27  ;;  %v146_v9 = vpack.c.bf16 %v98_v7, %v97_v6  ;;  %v100_v13 = vld [vmem:[%s7134_s1 + $0x188] sm:$0xff]  ;;  %v129_v14 = vpack.c.bf16 %v64_v11, %v63_v10  ;;  %v65_v16 = vld [vmem:[%s7134_s1 + $0x70] sm:$0xff]  ;;  %v66_v17 = vld [vmem:[%s7134_s1 + $0x78] sm:$0xff] }
  0x13   :  { %v147_v15 = vpack.c.bf16 %v100_v13, %v99_v12  ;;  %v101_v18 = vld [vmem:[%s7134_s1 + $0x190] sm:$0xff]  ;;  %v102_v19 = vld [vmem:[%s7134_s1 + $0x198] sm:$0xff]  ;;  %v130_v20 = vpack.c.bf16 %v66_v17, %v65_v16  ;;  %v67_v22 = vld [vmem:[%s7134_s1 + $0x80] sm:$0xff] }
  0x14   :  { %v148_v21 = vpack.c.bf16 %v102_v19, %v101_v18  ;;  %v68_v23 = vld [vmem:[%s7134_s1 + $0x88] sm:$0xff]  ;;  %v103_v24 = vld [vmem:[%s7134_s1 + $0x1a0] sm:$0xff]  ;;  %v69_v28 = vld [vmem:[%s7134_s1 + $0x90] sm:$0xff] }
  0x15   :  { %277 = vmatpush1.bf16.msra.mxu0 %v47_v32  ;;  %3592 = vmatpush1.bf16.msra.mxu1 %v47_v32  ;;  %v104_v25 = vld [vmem:[%s7134_s1 + $0x1a8] sm:$0xff]  ;;  %v131_v26 = vpack.c.bf16 %v68_v23, %v67_v22  ;;  %v70_v29 = vld [vmem:[%s7134_s1 + $0x98] sm:$0xff]  ;;  %v105_v30 = vld [vmem:[%s7134_s1 + $0x1b0] sm:$0xff] }
  0x16   :  { %278 = vmatprep.subr.bf16.mxu0 %v50_v33  ;;  %3587 = vmatprep.subr.bf16.mxu1 %v50_v33  ;;  %v149_v27 = vpack.c.bf16 %v104_v25, %v103_v24  ;;  %v106_v31 = vld [vmem:[%s7134_s1 + $0x1b8] sm:$0xff]  ;;  %v132_v32 = vpack.c.bf16 %v70_v29, %v69_v28  ;;  %v71_v34 = vld [vmem:[%s7134_s1 + $0xa0] sm:$0xff]  ;;  %v72_v35 = vld [vmem:[%s7134_s1 + $0xa8] sm:$0xff] }
  0x17   :  { %v150_v33 = vpack.c.bf16 %v106_v31, %v105_v30  ;;  %v107_v36 = vld [vmem:[%s7134_s1 + $0x1c0] sm:$0xff]  ;;  %v133_v38 = vpack.c.bf16 %v72_v35, %v71_v34  ;;  %v73_v40 = vld [vmem:[%s7134_s1 + $0xb0] sm:$0xff]  ;;  %v110_v43 = vld [vmem:[%s7134_s1 + $0x1d8] sm:$0xff] }
  0x18   :  { %v75_v46 = vld [vmem:[%s7134_s1 + $0xc0] sm:$0xff]  ;;  %v112_v49 = vld [vmem:[%s7134_s1 + $0x1e8] sm:$0xff]  ;;  %v77_v52 = vld [vmem:[%s7134_s1 + $0xd0] sm:$0xff] }
  0x19   :  { %279 = vmatpush1.bf16.msra.mxu0 %v49_v37  ;;  %3593 = vmatpush1.bf16.msra.mxu1 %v49_v37  ;;  %v108_v37 = vld [vmem:[%s7134_s1 + $0x1c8] sm:$0xff]  ;;  %v114_v55 = vld [vmem:[%s7134_s1 + $0x1f8] sm:$0xff]  ;;  %v79_v58 = vld [vmem:[%s7134_s1 + $0xe0] sm:$0xff] }
  0x1a   :  { %v151_v39 = vpack.c.bf16 %v108_v37, %v107_v36  ;;  %v116_v61 = vld [vmem:[%s7134_s1 + $0x208] sm:$0xff]  ;;  %v81_v0 = vld [vmem:[%s7134_s1 + $0xf0] sm:$0xff]  ;;  %v118_v4 = vld [vmem:[%s7134_s1 + $0x218] sm:$0xff] }
  0x1b   :  { %v83_v7 = vld [vmem:[%s7134_s1 + $0x100] sm:$0xff]  ;;  %v120_v10 = vld [vmem:[%s7134_s1 + $0x228] sm:$0xff]  ;;  %v85_v13 = vld [vmem:[%s7134_s1 + $0x110] sm:$0xff] }
  0x1c   :  { %3546 = vmatmul.mubr.msk.bf16.vlgmr.msra.gmra.mrb[0].mxu0 %vm159_vm0, %v123_v41  ;;  %3564 = vmatmul.mubr.msk.bf16.vlgmr.msra.gmra.mrb[0].mxu1 %vm159_vm0, %v141_v42  ;;  %v74_v41 = vld [vmem:[%s7134_s1 + $0xb8] sm:$0xff]  ;;  %v109_v42 = vld [vmem:[%s7134_s1 + $0x1d0] sm:$0xff] }
  0x1d   :  { %310 = vmatprep.mubr.bf16.mxu0 %v7137_v3  ;;  %490 = vmatprep.mubr.bf16.mxu1 %v7137_v3  ;;  %v134_v44 = vpack.c.bf16 %v74_v41, %v73_v40  ;;  %v152_v45 = vpack.c.bf16 %v110_v43, %v109_v42  ;;  %v122_v16 = vld [vmem:[%s7134_s1 + $0x238] sm:$0xff] }
  0x24   :  { %3547 = vmatmul.mubr.msk.bf16.gmra.mrb[4].mxu0 %vm159_vm0, %v124_v47  ;;  %3565 = vmatmul.mubr.msk.bf16.gmra.mrb[4].mxu1 %vm159_vm0, %v142_v48  ;;  %v76_v47 = vld [vmem:[%s7134_s1 + $0xc8] sm:$0xff]  ;;  %v111_v48 = vld [vmem:[%s7134_s1 + $0x1e0] sm:$0xff] }
  0x25   :  { %320 = vmatprep.mubr.bf16.mxu0 %v7137_v3  ;;  %500 = vmatprep.mubr.bf16.mxu1 %v7137_v3  ;;  %v135_v50 = vpack.c.bf16 %v76_v47, %v75_v46  ;;  %v153_v51 = vpack.c.bf16 %v112_v49, %v111_v48 }
  0x2c   :  { %3548 = vmatmul.mubr.msk.bf16.gmra.mrb[8].mxu0 %vm159_vm0, %v125_v53  ;;  %3566 = vmatmul.mubr.msk.bf16.gmra.mrb[8].mxu1 %vm159_vm0, %v143_v54  ;;  %v78_v53 = vld [vmem:[%s7134_s1 + $0xd8] sm:$0xff]  ;;  %v113_v54 = vld [vmem:[%s7134_s1 + $0x1f0] sm:$0xff] }
  0x2d   :  { %330 = vmatprep.mubr.bf16.mxu0 %v7137_v3  ;;  %510 = vmatprep.mubr.bf16.mxu1 %v7137_v3  ;;  %v136_v56 = vpack.c.bf16 %v78_v53, %v77_v52  ;;  %v154_v57 = vpack.c.bf16 %v114_v55, %v113_v54 }
  0x34   :  { %3549 = vmatmul.mubr.msk.bf16.gmra.mrb[12].mxu0 %vm159_vm0, %v126_v59  ;;  %3567 = vmatmul.mubr.msk.bf16.gmra.mrb[12].mxu1 %vm159_vm0, %v144_v60  ;;  %v80_v59 = vld [vmem:[%s7134_s1 + $0xe8] sm:$0xff]  ;;  %v115_v60 = vld [vmem:[%s7134_s1 + $0x200] sm:$0xff] }
  0x35   :  { %340 = vmatprep.mubr.bf16.mxu0 %v7137_v3  ;;  %520 = vmatprep.mubr.bf16.mxu1 %v7137_v3  ;;  %v137_v62 = vpack.c.bf16 %v80_v59, %v79_v58  ;;  %v155_v63 = vpack.c.bf16 %v116_v61, %v115_v60 }
  0x3c   :  { %3550 = vmatmul.mubr.msk.bf16.gmra.mrb[16].mxu0 %vm159_vm0, %v127_v1  ;;  %3568 = vmatmul.mubr.msk.bf16.gmra.mrb[16].mxu1 %vm159_vm0, %v145_v2  ;;  %v82_v1 = vld [vmem:[%s7134_s1 + $0xf8] sm:$0xff]  ;;  %v117_v2 = vld [vmem:[%s7134_s1 + $0x210] sm:$0xff] }
  0x3d   :  { %350 = vmatprep.mubr.bf16.mxu0 %v7137_v3  ;;  %530 = vmatprep.mubr.bf16.mxu1 %v7137_v3  ;;  %v138_v5 = vpack.c.bf16 %v82_v1, %v81_v0  ;;  %v156_v6 = vpack.c.bf16 %v118_v4, %v117_v2 }
  0x44   :  { %3551 = vmatmul.mubr.msk.bf16.gmra.mrb[20].mxu0 %vm159_vm0, %v128_v8  ;;  %3569 = vmatmul.mubr.msk.bf16.gmra.mrb[20].mxu1 %vm159_vm0, %v146_v9  ;;  %v84_v8 = vld [vmem:[%s7134_s1 + $0x108] sm:$0xff]  ;;  %v119_v9 = vld [vmem:[%s7134_s1 + $0x220] sm:$0xff] }
  0x45   :  { %360 = vmatprep.mubr.bf16.mxu0 %v7137_v3  ;;  %540 = vmatprep.mubr.bf16.mxu1 %v7137_v3  ;;  %v139_v11 = vpack.c.bf16 %v84_v8, %v83_v7  ;;  %v157_v12 = vpack.c.bf16 %v120_v10, %v119_v9 }
  0x4c   :  { %3552 = vmatmul.mubr.msk.bf16.gmra.mrb[24].mxu0 %vm159_vm0, %v129_v14  ;;  %3570 = vmatmul.mubr.msk.bf16.gmra.mrb[24].mxu1 %vm159_vm0, %v147_v15  ;;  %v86_v14 = vld [vmem:[%s7134_s1 + $0x118] sm:$0xff]  ;;  %v121_v15 = vld [vmem:[%s7134_s1 + $0x230] sm:$0xff] }
  0x4d   :  { %370 = vmatprep.mubr.bf16.mxu0 %v7137_v3  ;;  %550 = vmatprep.mubr.bf16.mxu1 %v7137_v3  ;;  %v140_v17 = vpack.c.bf16 %v86_v14, %v85_v13  ;;  %v158_v18 = vpack.c.bf16 %v122_v16, %v121_v15 }
  0x54   :  { %3553 = vmatmul.mubr.msk.bf16.gmra.mrb[28].mxu0 %vm159_vm0, %v130_v20  ;;  %3571 = vmatmul.mubr.msk.bf16.gmra.mrb[28].mxu1 %vm159_vm0, %v148_v21 }
  0x55   :  { %380 = vmatprep.mubr.bf16.mxu0 %v7137_v3  ;;  %560 = vmatprep.mubr.bf16.mxu1 %v7137_v3 }
  0x5c   :  { %3554 = vmatmul.mubr.msk.bf16.gmra.mrb[32].mxu0 %vm159_vm0, %v131_v26  ;;  %3572 = vmatmul.mubr.msk.bf16.gmra.mrb[32].mxu1 %vm159_vm0, %v149_v27 }
  0x5d   :  { %390 = vmatprep.mubr.bf16.mxu0 %v7137_v3  ;;  %570 = vmatprep.mubr.bf16.mxu1 %v7137_v3 }
  0x64   :  { %3555 = vmatmul.mubr.msk.bf16.gmra.mrb[36].mxu0 %vm159_vm0, %v132_v32  ;;  %3573 = vmatmul.mubr.msk.bf16.gmra.mrb[36].mxu1 %vm159_vm0, %v150_v33 }
  0x65   :  { %400 = vmatprep.mubr.bf16.mxu0 %v7137_v3  ;;  %580 = vmatprep.mubr.bf16.mxu1 %v7137_v3 }
  0x6c   :  { %3556 = vmatmul.mubr.msk.bf16.gmra.mrb[40].mxu0 %vm159_vm0, %v133_v38  ;;  %3574 = vmatmul.mubr.msk.bf16.gmra.mrb[40].mxu1 %vm159_vm0, %v151_v39 }
  0x6d   :  { %410 = vmatprep.mubr.bf16.mxu0 %v7137_v3  ;;  %590 = vmatprep.mubr.bf16.mxu1 %v7137_v3 }
  0x74   :  { %3557 = vmatmul.mubr.msk.bf16.gmra.mrb[44].mxu0 %vm159_vm0, %v134_v44  ;;  %3575 = vmatmul.mubr.msk.bf16.gmra.mrb[44].mxu1 %vm159_vm0, %v152_v45 }
  0x75   :  { %420 = vmatprep.mubr.bf16.mxu0 %v7137_v3  ;;  %600 = vmatprep.mubr.bf16.mxu1 %v7137_v3 }
  0x7c   :  { %3558 = vmatmul.mubr.msk.bf16.gmra.mrb[48].mxu0 %vm159_vm0, %v135_v50  ;;  %3576 = vmatmul.mubr.msk.bf16.gmra.mrb[48].mxu1 %vm159_vm0, %v153_v51 }
  0x7d   :  { %430 = vmatprep.mubr.bf16.mxu0 %v7137_v3  ;;  %610 = vmatprep.mubr.bf16.mxu1 %v7137_v3 }
  0x84   :  { %3559 = vmatmul.mubr.msk.bf16.gmra.mrb[52].mxu0 %vm159_vm0, %v136_v56  ;;  %3577 = vmatmul.mubr.msk.bf16.gmra.mrb[52].mxu1 %vm159_vm0, %v154_v57 }
  0x85   :  { %440 = vmatprep.mubr.bf16.mxu0 %v7137_v3  ;;  %620 = vmatprep.mubr.bf16.mxu1 %v7137_v3 }
  0x8c   :  { %3560 = vmatmul.mubr.msk.bf16.gmra.mrb[56].mxu0 %vm159_vm0, %v137_v62  ;;  %3578 = vmatmul.mubr.msk.bf16.gmra.mrb[56].mxu1 %vm159_vm0, %v155_v63 }
  0x8d   :  { %450 = vmatprep.mubr.bf16.mxu0 %v7137_v3  ;;  %630 = vmatprep.mubr.bf16.mxu1 %v7137_v3 }
  0x94   :  { %3561 = vmatmul.mubr.msk.bf16.gmra.mrb[60].mxu0 %vm159_vm0, %v138_v5  ;;  %3579 = vmatmul.mubr.msk.bf16.gmra.mrb[60].mxu1 %vm159_vm0, %v156_v6 }
  0x95   :  { %460 = vmatprep.mubr.bf16.mxu0 %v7137_v3  ;;  %640 = vmatprep.mubr.bf16.mxu1 %v7137_v3 }
  0x9c   :  { %3562 = vmatmul.mubr.msk.bf16.gmra.mrb[64].mxu0 %vm159_vm0, %v139_v11  ;;  %3580 = vmatmul.mubr.msk.bf16.gmra.mrb[64].mxu1 %vm159_vm0, %v157_v12 }
  0x9d   :  { %470 = vmatprep.mubr.bf16.mxu0 %v7137_v3  ;;  %650 = vmatprep.mubr.bf16.mxu1 %v7137_v3 }
  0xa4   :  { %3563 = vmatmul.mubr.msk.bf16.gmra.mrb[68].mxu0 %vm159_vm0, %v140_v17  ;;  %3581 = vmatmul.mubr.msk.bf16.gmra.mrb[68].mxu1 %vm159_vm0, %v158_v18 }
  0xef   :  { %v4180_v19 = vpop.f32.mrb[0].mxu0  ;;  %v4182_v20 = vpop.f32.mrb[0].mxu1 }
  0xf0   :  { %7474 = vst [vmem:[#allocation2_spill] sm:$0xff] %v4180_v19  ;;  %7475 = vst [vmem:[#allocation3_spill] sm:$0xff] %v4182_v20  ;;  %v4184_v21 = vpop.f32.mrb[1].mxu0  ;;  %v4186_v22 = vpop.f32.mrb[1].mxu1 }
  0xf1   :  { %7476 = vst [vmem:[#allocation4_spill] sm:$0xff] %v4184_v21  ;;  %7477 = vst [vmem:[#allocation5_spill] sm:$0xff] %v4186_v22  ;;  %v4188_v23 = vpop.f32.mrb[2].mxu0  ;;  %v4190_v24 = vpop.f32.mrb[2].mxu1  ;;  %v662_v25 = vsel %vm661_vm1, %v4184_v21, 0.0  ;;  %v806_v26 = vsel %vm661_vm1, %v4186_v22, 0.0 }
  0xf2   :  { %7478 = vst [vmem:[#allocation6_spill] sm:$0xff] %v4188_v23  ;;  %7479 = vst [vmem:[#allocation7_spill] sm:$0xff] %v4190_v24  ;;  %v4196_v27 = vpop.f32.mrb[3].mxu0  ;;  %v4198_v28 = vpop.f32.mrb[3].mxu1  ;;  %v663_v29 = vadd.f32 %v662_v25, %v4180_v19  ;;  %v807_v30 = vadd.f32 %v806_v26, %v4182_v20 }
  0xf3   :  { %7480 = vst [vmem:[#allocation8_spill] sm:$0xff] %v4196_v27  ;;  %7481 = vst [vmem:[#allocation9_spill] sm:$0xff] %v4198_v28  ;;  %v810_v31 = vsel %vm661_vm1, %v4198_v28, 0.0  ;;  %v666_v32 = vsel %vm661_vm1, %v4196_v27, 0.0 }
  0xf4   :  { %664 = vadd.xlane.f32.xlu0 %v663_v29  ;;  %v811_v33 = vadd.f32 %v810_v31, %v4190_v24  ;;  %v667_v34 = vadd.f32 %v666_v32, %v4188_v23 }
  0xf6   :  { %812 = vadd.xlane.f32.xlu1 %v811_v33 }
  0xf7   :  { %v4208_v35 = vpop.f32.mrb[4].mxu0  ;;  %v4210_v36 = vpop.f32.mrb[4].mxu1 }
  0xf8   :  { %7482 = vst [vmem:[#allocation10_spill] sm:$0xff] %v4208_v35  ;;  %7483 = vst [vmem:[#allocation11_spill] sm:$0xff] %v4210_v36  ;;  %808 = vadd.xlane.f32.xlu0 %v807_v30  ;;  %v4212_v37 = vpop.f32.mrb[5].mxu0  ;;  %v4214_v38 = vpop.f32.mrb[5].mxu1 }
  0xf9   :  { %7484 = vst [vmem:[#allocation12_spill] sm:$0xff] %v4212_v37  ;;  %7485 = vst [vmem:[#allocation13_spill] sm:$0xff] %v4214_v38  ;;  %v4216_v39 = vpop.f32.mrb[6].mxu0  ;;  %v670_v40 = vsel %vm661_vm1, %v4212_v37, 0.0  ;;  %v4220_v41 = vpop.f32.mrb[6].mxu1  ;;  %v814_v42 = vsel %vm661_vm1, %v4214_v38, 0.0 }
  0xfa   :  { %7486 = vst [vmem:[#allocation14_spill] sm:$0xff] %v4216_v39  ;;  %7487 = vst [vmem:[#allocation15_spill] sm:$0xff] %v4220_v41  ;;  %v4224_v43 = vpop.f32.mrb[7].mxu0  ;;  %v671_v44 = vadd.f32 %v670_v40, %v4208_v35  ;;  %v4227_v45 = vpop.f32.mrb[7].mxu1  ;;  %v815_v46 = vadd.f32 %v814_v42, %v4210_v36 }
  0xfb   :  { %7488 = vst [vmem:[#allocation16_spill] sm:$0xff] %v4224_v43  ;;  %7489 = vst [vmem:[#allocation17_spill] sm:$0xff] %v4227_v45  ;;  %v674_v47 = vsel %vm661_vm1, %v4224_v43, 0.0  ;;  %v818_v48 = vsel %vm661_vm1, %v4227_v45, 0.0 }
  0xfc   :  { %668 = vadd.xlane.f32.xlu0 %v667_v34  ;;  %672 = vadd.xlane.f32.xlu1 %v671_v44  ;;  %v675_v49 = vadd.f32 %v674_v47, %v4216_v39  ;;  %v819_v50 = vadd.f32 %v818_v48, %v4220_v41 }
  0xff   :  { %v4236_v51 = vpop.f32.mrb[8].mxu0  ;;  %v4238_v52 = vpop.f32.mrb[8].mxu1 }
 0x100   :  { %7490 = vst [vmem:[#allocation18_spill] sm:$0xff] %v4236_v51  ;;  %7491 = vst [vmem:[#allocation19_spill] sm:$0xff] %v4238_v52  ;;  %816 = vadd.xlane.f32.xlu0 %v815_v46  ;;  %676 = vadd.xlane.f32.xlu1 %v675_v49  ;;  %v4240_v53 = vpop.f32.mrb[9].mxu0  ;;  %v4242_v54 = vpop.f32.mrb[9].mxu1 }
 0x101   :  { %7492 = vst [vmem:[#allocation20_spill] sm:$0xff] %v4240_v53  ;;  %7493 = vst [vmem:[#allocation21_spill] sm:$0xff] %v4242_v54  ;;  %v4244_v55 = vpop.f32.mrb[10].mxu0  ;;  %v678_v56 = vsel %vm661_vm1, %v4240_v53, 0.0  ;;  %v4248_v57 = vpop.f32.mrb[10].mxu1  ;;  %v822_v58 = vsel %vm661_vm1, %v4242_v54, 0.0 }
 0x102   :  { %7494 = vst [vmem:[#allocation22_spill] sm:$0xff] %v4244_v55  ;;  %7495 = vst [vmem:[#allocation23_spill] sm:$0xff] %v4248_v57  ;;  %v679_v59 = vadd.f32 %v678_v56, %v4236_v51  ;;  %v4253_v60 = vpop.f32.mrb[11].mxu0  ;;  %v4255_v61 = vpop.f32.mrb[11].mxu1  ;;  %v823_v62 = vadd.f32 %v822_v58, %v4238_v52 }
 0x103   :  { %7496 = vst [vmem:[#allocation24_spill] sm:$0xff] %v4253_v60  ;;  %7497 = vst [vmem:[#allocation25_spill] sm:$0xff] %v4255_v61  ;;  %v682_v63 = vsel %vm661_vm1, %v4253_v60, 0.0  ;;  %v826_v0 = vsel %vm661_vm1, %v4255_v61, 0.0 }
 0x104   :  { %820 = vadd.xlane.f32.xlu1 %v819_v50  ;;  %680 = vadd.xlane.f32.xlu0 %v679_v59  ;;  %v683_v1 = vadd.f32 %v682_v63, %v4244_v55  ;;  %v827_v2 = vadd.f32 %v826_v0, %v4248_v57 }
 0x107   :  { %v4264_v4 = vpop.f32.mrb[12].mxu0  ;;  %v4266_v5 = vpop.f32.mrb[12].mxu1 }
 0x108   :  { %7498 = vst [vmem:[#allocation26_spill] sm:$0xff] %v4264_v4  ;;  %7499 = vst [vmem:[#allocation27_spill] sm:$0xff] %v4266_v5  ;;  %824 = vadd.xlane.f32.xlu0 %v823_v62  ;;  %684 = vadd.xlane.f32.xlu1 %v683_v1  ;;  %v4268_v6 = vpop.f32.mrb[13].mxu0  ;;  %v4270_v7 = vpop.f32.mrb[13].mxu1 }
 0x109   :  { %7500 = vst [vmem:[#allocation28_spill] sm:$0xff] %v4268_v6  ;;  %7501 = vst [vmem:[#allocation29_spill] sm:$0xff] %v4270_v7  ;;  %v4272_v8 = vpop.f32.mrb[14].mxu0  ;;  %v686_v9 = vsel %vm661_vm1, %v4268_v6, 0.0  ;;  %v4276_v10 = vpop.f32.mrb[14].mxu1  ;;  %v830_v11 = vsel %vm661_vm1, %v4270_v7, 0.0 }
 0x10a   :  { %7502 = vst [vmem:[#allocation30_spill] sm:$0xff] %v4272_v8  ;;  %7503 = vst [vmem:[#allocation31_spill] sm:$0xff] %v4276_v10  ;;  %v687_v12 = vadd.f32 %v686_v9, %v4264_v4  ;;  %v4281_v13 = vpop.f32.mrb[15].mxu0  ;;  %v4283_v14 = vpop.f32.mrb[15].mxu1  ;;  %v831_v15 = vadd.f32 %v830_v11, %v4266_v5 }
 0x10b   :  { %7504 = vst [vmem:[#allocation32_spill] sm:$0xff] %v4281_v13  ;;  %7505 = vst [vmem:[#allocation33_spill] sm:$0xff] %v4283_v14  ;;  %v690_v16 = vsel %vm661_vm1, %v4281_v13, 0.0  ;;  %v834_v17 = vsel %vm661_vm1, %v4283_v14, 0.0 }
 0x10c   :  { %828 = vadd.xlane.f32.xlu1 %v827_v2  ;;  %688 = vadd.xlane.f32.xlu0 %v687_v12  ;;  %v691_v18 = vadd.f32 %v690_v16, %v4272_v8  ;;  %v835_v25 = vadd.f32 %v834_v17, %v4276_v10 }
 0x10f   :  { %v4292_v26 = vpop.f32.mrb[16].mxu0  ;;  %v4294_v29 = vpop.f32.mrb[16].mxu1 }
 0x110   :  { %7506 = vst [vmem:[#allocation34_spill] sm:$0xff] %v4292_v26  ;;  %7507 = vst [vmem:[#allocation35_spill] sm:$0xff] %v4294_v29  ;;  %832 = vadd.xlane.f32.xlu0 %v831_v15  ;;  %692 = vadd.xlane.f32.xlu1 %v691_v18  ;;  %v4296_v30 = vpop.f32.mrb[17].mxu0  ;;  %v4298_v31 = vpop.f32.mrb[17].mxu1 }
 0x111   :  { %7508 = vst [vmem:[#allocation36_spill] sm:$0xff] %v4296_v30  ;;  %7509 = vst [vmem:[#allocation37_spill] sm:$0xff] %v4298_v31  ;;  %v4300_v32 = vpop.f32.mrb[18].mxu0  ;;  %v694_v33 = vsel %vm661_vm1, %v4296_v30, 0.0  ;;  %v4304_v34 = vpop.f32.mrb[18].mxu1  ;;  %v838_v40 = vsel %vm661_vm1, %v4298_v31, 0.0 }
 0x112   :  { %7510 = vst [vmem:[#allocation38_spill] sm:$0xff] %v4300_v32  ;;  %7511 = vst [vmem:[#allocation39_spill] sm:$0xff] %v4304_v34  ;;  %v695_v42 = vadd.f32 %v694_v33, %v4292_v26  ;;  %v4309_v44 = vpop.f32.mrb[19].mxu0  ;;  %v4311_v46 = vpop.f32.mrb[19].mxu1  ;;  %v839_v47 = vadd.f32 %v838_v40, %v4294_v29 }
 0x113   :  { %7512 = vst [vmem:[#allocation40_spill] sm:$0xff] %v4309_v44  ;;  %7513 = vst [vmem:[#allocation41_spill] sm:$0xff] %v4311_v46  ;;  %v698_v48 = vsel %vm661_vm1, %v4309_v44, 0.0  ;;  %v842_v49 = vsel %vm661_vm1, %v4311_v46, 0.0 }
 0x114   :  { %836 = vadd.xlane.f32.xlu1 %v835_v25  ;;  %696 = vadd.xlane.f32.xlu0 %v695_v42  ;;  %v699_v50 = vadd.f32 %v698_v48, %v4300_v32  ;;  %v843_v56 = vadd.f32 %v842_v49, %v4304_v34 }
 0x117   :  { %v4320_v58 = vpop.f32.mrb[20].mxu0  ;;  %v4322_v59 = vpop.f32.mrb[20].mxu1 }
 0x118   :  { %7514 = vst [vmem:[#allocation42_spill] sm:$0xff] %v4320_v58  ;;  %7515 = vst [vmem:[#allocation43_spill] sm:$0xff] %v4322_v59  ;;  %840 = vadd.xlane.f32.xlu0 %v839_v47  ;;  %700 = vadd.xlane.f32.xlu1 %v699_v50  ;;  %v4324_v62 = vpop.f32.mrb[21].mxu0  ;;  %v4326_v63 = vpop.f32.mrb[21].mxu1 }
 0x119   :  { %7516 = vst [vmem:[#allocation44_spill] sm:$0xff] %v4324_v62  ;;  %7517 = vst [vmem:[#allocation45_spill] sm:$0xff] %v4326_v63  ;;  %v4328_v0 = vpop.f32.mrb[22].mxu0  ;;  %v702_v1 = vsel %vm661_vm1, %v4324_v62, 0.0  ;;  %v4332_v2 = vpop.f32.mrb[22].mxu1  ;;  %v846_v9 = vsel %vm661_vm1, %v4326_v63, 0.0 }
 0x11a   :  { %7518 = vst [vmem:[#allocation46_spill] sm:$0xff] %v4328_v0  ;;  %7519 = vst [vmem:[#allocation47_spill] sm:$0xff] %v4332_v2  ;;  %v703_v11 = vadd.f32 %v702_v1, %v4320_v58  ;;  %v4337_v12 = vpop.f32.mrb[23].mxu0  ;;  %v4339_v15 = vpop.f32.mrb[23].mxu1  ;;  %v847_v16 = vadd.f32 %v846_v9, %v4322_v59 }
 0x11b   :  { %7520 = vst [vmem:[#allocation48_spill] sm:$0xff] %v4337_v12  ;;  %7521 = vst [vmem:[#allocation49_spill] sm:$0xff] %v4339_v15  ;;  %v706_v17 = vsel %vm661_vm1, %v4337_v12, 0.0  ;;  %v850_v18 = vsel %vm661_vm1, %v4339_v15, 0.0 }
 0x11c   :  { %844 = vadd.xlane.f32.xlu1 %v843_v56  ;;  %704 = vadd.xlane.f32.xlu0 %v703_v11  ;;  %v707_v25 = vadd.f32 %v706_v17, %v4328_v0  ;;  %v851_v33 = vadd.f32 %v850_v18, %v4332_v2 }
 0x11f   :  { %v4348_v40 = vpop.f32.mrb[24].mxu0  ;;  %v4350_v42 = vpop.f32.mrb[24].mxu1 }
 0x120   :  { %7522 = vst [vmem:[#allocation50_spill] sm:$0xff] %v4348_v40  ;;  %7523 = vst [vmem:[#allocation51_spill] sm:$0xff] %v4350_v42  ;;  %848 = vadd.xlane.f32.xlu0 %v847_v16  ;;  %708 = vadd.xlane.f32.xlu1 %v707_v25  ;;  %v4352_v47 = vpop.f32.mrb[25].mxu0  ;;  %v4354_v48 = vpop.f32.mrb[25].mxu1 }
 0x121   :  { %7524 = vst [vmem:[#allocation52_spill] sm:$0xff] %v4352_v47  ;;  %7525 = vst [vmem:[#allocation53_spill] sm:$0xff] %v4354_v48  ;;  %v4356_v49 = vpop.f32.mrb[26].mxu0  ;;  %v710_v50 = vsel %vm661_vm1, %v4352_v47, 0.0  ;;  %v4360_v56 = vpop.f32.mrb[26].mxu1  ;;  %v854_v1 = vsel %vm661_vm1, %v4354_v48, 0.0 }
 0x122   :  { %7526 = vst [vmem:[#allocation54_spill] sm:$0xff] %v4356_v49  ;;  %7527 = vst [vmem:[#allocation55_spill] sm:$0xff] %v4360_v56  ;;  %v711_v9 = vadd.f32 %v710_v50, %v4348_v40  ;;  %v4365_v11 = vpop.f32.mrb[27].mxu0  ;;  %v4367_v16 = vpop.f32.mrb[27].mxu1  ;;  %v855_v17 = vadd.f32 %v854_v1, %v4350_v42 }
 0x123   :  { %7528 = vst [vmem:[#allocation56_spill] sm:$0xff] %v4365_v11  ;;  %7529 = vst [vmem:[#allocation57_spill] sm:$0xff] %v4367_v16  ;;  %v714_v18 = vsel %vm661_vm1, %v4365_v11, 0.0  ;;  %v858_v25 = vsel %vm661_vm1, %v4367_v16, 0.0 }
 0x124   :  { %852 = vadd.xlane.f32.xlu1 %v851_v33  ;;  %712 = vadd.xlane.f32.xlu0 %v711_v9  ;;  %v715_v3 = vadd.f32 %v714_v18, %v4356_v49  ;;  %v859_v48 = vadd.f32 %v858_v25, %v4360_v56 }
 0x127   :  { %v4376_v15 = vpop.f32.mrb[28].mxu0  ;;  %v4378_v50 = vpop.f32.mrb[28].mxu1 }
 0x128   :  { %7530 = vst [vmem:[#allocation58_spill] sm:$0xff] %v4376_v15  ;;  %7531 = vst [vmem:[#allocation59_spill] sm:$0xff] %v4378_v50  ;;  %856 = vadd.xlane.f32.xlu0 %v855_v17  ;;  %716 = vadd.xlane.f32.xlu1 %v715_v3  ;;  %v4380_v2 = vpop.f32.mrb[29].mxu0  ;;  %v4382_v1 = vpop.f32.mrb[29].mxu1 }
 0x129   :  { %7532 = vst [vmem:[#allocation60_spill] sm:$0xff] %v4380_v2  ;;  %7533 = vst [vmem:[#allocation61_spill] sm:$0xff] %v4382_v1  ;;  %v4384_v11 = vpop.f32.mrb[30].mxu0  ;;  %v718_v33 = vsel %vm661_vm1, %v4380_v2, 0.0  ;;  %v4388_v9 = vpop.f32.mrb[30].mxu1  ;;  %v862_v18 = vsel %vm661_vm1, %v4382_v1, 0.0 }
 0x12a   :  { %7534 = vst [vmem:[#allocation62_spill] sm:$0xff] %v4384_v11  ;;  %7535 = vst [vmem:[#allocation63_spill] sm:$0xff] %v4388_v9  ;;  %v719_v25 = vadd.f32 %v718_v33, %v4376_v15  ;;  %v4393_v16 = vpop.f32.mrb[31].mxu0  ;;  %v4395_v17 = vpop.f32.mrb[31].mxu1  ;;  %v863_v3 = vadd.f32 %v862_v18, %v4378_v50 }
 0x12b   :  { %7536 = vst [vmem:[#allocation64_spill] sm:$0xff] %v4393_v16  ;;  %7537 = vst [vmem:[#allocation65_spill] sm:$0xff] %v4395_v17  ;;  %v722_v56 = vsel %vm661_vm1, %v4393_v16, 0.0  ;;  %v866_v49 = vsel %vm661_vm1, %v4395_v17, 0.0 }
 0x12c   :  { %860 = vadd.xlane.f32.xlu1 %v859_v48  ;;  %720 = vadd.xlane.f32.xlu0 %v719_v25  ;;  %v723_v2 = vadd.f32 %v722_v56, %v4384_v11  ;;  %v867_v1 = vadd.f32 %v866_v49, %v4388_v9 }
 0x12f   :  { %v4404_v42 = vpop.f32.mrb[32].mxu0  ;;  %v4406_v33 = vpop.f32.mrb[32].mxu1 }
 0x130   :  { %7538 = vst [vmem:[#allocation66_spill] sm:$0xff] %v4404_v42  ;;  %7539 = vst [vmem:[#allocation67_spill] sm:$0xff] %v4406_v33  ;;  %864 = vadd.xlane.f32.xlu0 %v863_v3  ;;  %724 = vadd.xlane.f32.xlu1 %v723_v2  ;;  %v4408_v15 = vpop.f32.mrb[33].mxu0  ;;  %v4410_v18 = vpop.f32.mrb[33].mxu1 }
 0x131   :  { %7540 = vst [vmem:[#allocation68_spill] sm:$0xff] %v4408_v15  ;;  %7541 = vst [vmem:[#allocation69_spill] sm:$0xff] %v4410_v18  ;;  %v4412_v16 = vpop.f32.mrb[34].mxu0  ;;  %v726_v48 = vsel %vm661_vm1, %v4408_v15, 0.0  ;;  %v4416_v25 = vpop.f32.mrb[34].mxu1  ;;  %v870_v49 = vsel %vm661_vm1, %v4410_v18, 0.0 }
 0x132   :  { %7542 = vst [vmem:[#allocation70_spill] sm:$0xff] %v4412_v16  ;;  %7543 = vst [vmem:[#allocation71_spill] sm:$0xff] %v4416_v25  ;;  %v727_v56 = vadd.f32 %v726_v48, %v4404_v42  ;;  %v4421_v17 = vpop.f32.mrb[35].mxu0  ;;  %v4423_v3 = vpop.f32.mrb[35].mxu1  ;;  %v871_v2 = vadd.f32 %v870_v49, %v4406_v33 }
 0x133   :  { %7544 = vst [vmem:[#allocation72_spill] sm:$0xff] %v4421_v17  ;;  %7545 = vst [vmem:[#allocation73_spill] sm:$0xff] %v4423_v3  ;;  %v730_v9 = vsel %vm661_vm1, %v4421_v17, 0.0  ;;  %v874_v11 = vsel %vm661_vm1, %v4423_v3, 0.0 }
 0x134   :  { %868 = vadd.xlane.f32.xlu1 %v867_v1  ;;  %728 = vadd.xlane.f32.xlu0 %v727_v56  ;;  %v731_v15 = vadd.f32 %v730_v9, %v4412_v16  ;;  %v875_v18 = vadd.f32 %v874_v11, %v4416_v25 }
 0x137   :  { %v4432_v50 = vpop.f32.mrb[36].mxu0  ;;  %v4434_v48 = vpop.f32.mrb[36].mxu1 }
 0x138   :  { %7546 = vst [vmem:[#allocation74_spill] sm:$0xff] %v4432_v50  ;;  %7547 = vst [vmem:[#allocation75_spill] sm:$0xff] %v4434_v48  ;;  %872 = vadd.xlane.f32.xlu0 %v871_v2  ;;  %732 = vadd.xlane.f32.xlu1 %v731_v15  ;;  %v4436_v42 = vpop.f32.mrb[37].mxu0  ;;  %v4438_v49 = vpop.f32.mrb[37].mxu1 }
 0x139   :  { %7548 = vst [vmem:[#allocation76_spill] sm:$0xff] %v4436_v42  ;;  %7549 = vst [vmem:[#allocation77_spill] sm:$0xff] %v4438_v49  ;;  %v4440_v17 = vpop.f32.mrb[38].mxu0  ;;  %v734_v1 = vsel %vm661_vm1, %v4436_v42, 0.0  ;;  %v4444_v56 = vpop.f32.mrb[38].mxu1  ;;  %v878_v11 = vsel %vm661_vm1, %v4438_v49, 0.0 }
 0x13a   :  { %7550 = vst [vmem:[#allocation78_spill] sm:$0xff] %v4440_v17  ;;  %7551 = vst [vmem:[#allocation79_spill] sm:$0xff] %v4444_v56  ;;  %v735_v9 = vadd.f32 %v734_v1, %v4432_v50  ;;  %v4449_v3 = vpop.f32.mrb[39].mxu0  ;;  %v4451_v2 = vpop.f32.mrb[39].mxu1  ;;  %v879_v15 = vadd.f32 %v878_v11, %v4434_v48 }
 0x13b   :  { %7552 = vst [vmem:[#allocation80_spill] sm:$0xff] %v4449_v3  ;;  %7553 = vst [vmem:[#allocation81_spill] sm:$0xff] %v4451_v2  ;;  %v738_v25 = vsel %vm661_vm1, %v4449_v3, 0.0  ;;  %v882_v16 = vsel %vm661_vm1, %v4451_v2, 0.0 }
 0x13c   :  { %876 = vadd.xlane.f32.xlu1 %v875_v18  ;;  %736 = vadd.xlane.f32.xlu0 %v735_v9  ;;  %v739_v42 = vadd.f32 %v738_v25, %v4440_v17  ;;  %v883_v49 = vadd.f32 %v882_v16, %v4444_v56 }
 0x13f   :  { %v4460_v33 = vpop.f32.mrb[40].mxu0  ;;  %v4462_v1 = vpop.f32.mrb[40].mxu1 }
 0x140   :  { %7554 = vst [vmem:[#allocation82_spill] sm:$0xff] %v4460_v33  ;;  %7555 = vst [vmem:[#allocation83_spill] sm:$0xff] %v4462_v1  ;;  %880 = vadd.xlane.f32.xlu0 %v879_v15  ;;  %740 = vadd.xlane.f32.xlu1 %v739_v42  ;;  %v4464_v50 = vpop.f32.mrb[41].mxu0  ;;  %v4466_v11 = vpop.f32.mrb[41].mxu1 }
 0x141   :  { %7556 = vst [vmem:[#allocation84_spill] sm:$0xff] %v4464_v50  ;;  %7557 = vst [vmem:[#allocation85_spill] sm:$0xff] %v4466_v11  ;;  %v4468_v3 = vpop.f32.mrb[42].mxu0  ;;  %v742_v18 = vsel %vm661_vm1, %v4464_v50, 0.0  ;;  %v4472_v9 = vpop.f32.mrb[42].mxu1  ;;  %v886_v16 = vsel %vm661_vm1, %v4466_v11, 0.0 }
 0x142   :  { %7558 = vst [vmem:[#allocation86_spill] sm:$0xff] %v4468_v3  ;;  %7559 = vst [vmem:[#allocation87_spill] sm:$0xff] %v4472_v9  ;;  %v743_v25 = vadd.f32 %v742_v18, %v4460_v33  ;;  %v4477_v2 = vpop.f32.mrb[43].mxu0  ;;  %v4479_v15 = vpop.f32.mrb[43].mxu1  ;;  %v887_v42 = vadd.f32 %v886_v16, %v4462_v1 }
 0x143   :  { %7560 = vst [vmem:[#allocation88_spill] sm:$0xff] %v4477_v2  ;;  %7561 = vst [vmem:[#allocation89_spill] sm:$0xff] %v4479_v15  ;;  %v746_v56 = vsel %vm661_vm1, %v4477_v2, 0.0  ;;  %v890_v17 = vsel %vm661_vm1, %v4479_v15, 0.0 }
 0x144   :  { %884 = vadd.xlane.f32.xlu1 %v883_v49  ;;  %744 = vadd.xlane.f32.xlu0 %v743_v25  ;;  %v747_v50 = vadd.f32 %v746_v56, %v4468_v3  ;;  %v891_v11 = vadd.f32 %v890_v17, %v4472_v9 }
 0x147   :  { %v4488_v48 = vpop.f32.mrb[44].mxu0  ;;  %v4490_v18 = vpop.f32.mrb[44].mxu1 }
 0x148   :  { %7562 = vst [vmem:[#allocation90_spill] sm:$0xff] %v4488_v48  ;;  %7563 = vst [vmem:[#allocation91_spill] sm:$0xff] %v4490_v18  ;;  %888 = vadd.xlane.f32.xlu0 %v887_v42  ;;  %748 = vadd.xlane.f32.xlu1 %v747_v50  ;;  %v4492_v33 = vpop.f32.mrb[45].mxu0  ;;  %v4494_v16 = vpop.f32.mrb[45].mxu1 }
 0x149   :  { %7564 = vst [vmem:[#allocation92_spill] sm:$0xff] %v4492_v33  ;;  %7565 = vst [vmem:[#allocation93_spill] sm:$0xff] %v4494_v16  ;;  %v4496_v2 = vpop.f32.mrb[46].mxu0  ;;  %v750_v49 = vsel %vm661_vm1, %v4492_v33, 0.0  ;;  %v4500_v25 = vpop.f32.mrb[46].mxu1  ;;  %v894_v17 = vsel %vm661_vm1, %v4494_v16, 0.0 }
 0x14a   :  { %7566 = vst [vmem:[#allocation94_spill] sm:$0xff] %v4496_v2  ;;  %7567 = vst [vmem:[#allocation95_spill] sm:$0xff] %v4500_v25  ;;  %v751_v56 = vadd.f32 %v750_v49, %v4488_v48  ;;  %v4505_v15 = vpop.f32.mrb[47].mxu0  ;;  %v4507_v42 = vpop.f32.mrb[47].mxu1  ;;  %v895_v50 = vadd.f32 %v894_v17, %v4490_v18 }
 0x14b   :  { %7568 = vst [vmem:[#allocation96_spill] sm:$0xff] %v4505_v15  ;;  %7569 = vst [vmem:[#allocation97_spill] sm:$0xff] %v4507_v42  ;;  %v754_v9 = vsel %vm661_vm1, %v4505_v15, 0.0  ;;  %v898_v3 = vsel %vm661_vm1, %v4507_v42, 0.0 }
 0x14c   :  { %892 = vadd.xlane.f32.xlu1 %v891_v11  ;;  %752 = vadd.xlane.f32.xlu0 %v751_v56  ;;  %v755_v33 = vadd.f32 %v754_v9, %v4496_v2  ;;  %v899_v16 = vadd.f32 %v898_v3, %v4500_v25 }
 0x14f   :  { %v4516_v1 = vpop.f32.mrb[48].mxu0  ;;  %v4518_v49 = vpop.f32.mrb[48].mxu1 }
 0x150   :  { %7570 = vst [vmem:[#allocation98_spill] sm:$0xff] %v4516_v1  ;;  %7571 = vst [vmem:[#allocation99_spill] sm:$0xff] %v4518_v49  ;;  %896 = vadd.xlane.f32.xlu0 %v895_v50  ;;  %756 = vadd.xlane.f32.xlu1 %v755_v33  ;;  %v4520_v48 = vpop.f32.mrb[49].mxu0  ;;  %v4522_v17 = vpop.f32.mrb[49].mxu1 }
 0x151   :  { %7572 = vst [vmem:[#allocation100_spill] sm:$0xff] %v4520_v48  ;;  %7573 = vst [vmem:[#allocation101_spill] sm:$0xff] %v4522_v17  ;;  %v4524_v15 = vpop.f32.mrb[50].mxu0  ;;  %v758_v11 = vsel %vm661_vm1, %v4520_v48, 0.0  ;;  %v4528_v56 = vpop.f32.mrb[50].mxu1  ;;  %v902_v3 = vsel %vm661_vm1, %v4522_v17, 0.0 }
 0x152   :  { %7574 = vst [vmem:[#allocation102_spill] sm:$0xff] %v4524_v15  ;;  %7575 = vst [vmem:[#allocation103_spill] sm:$0xff] %v4528_v56  ;;  %v759_v9 = vadd.f32 %v758_v11, %v4516_v1  ;;  %v4533_v42 = vpop.f32.mrb[51].mxu0  ;;  %v4535_v50 = vpop.f32.mrb[51].mxu1  ;;  %v903_v33 = vadd.f32 %v902_v3, %v4518_v49 }
 0x153   :  { %7576 = vst [vmem:[#allocation104_spill] sm:$0xff] %v4533_v42  ;;  %7577 = vst [vmem:[#allocation105_spill] sm:$0xff] %v4535_v50  ;;  %v762_v25 = vsel %vm661_vm1, %v4533_v42, 0.0  ;;  %v906_v2 = vsel %vm661_vm1, %v4535_v50, 0.0 }
 0x154   :  { %900 = vadd.xlane.f32.xlu1 %v899_v16  ;;  %760 = vadd.xlane.f32.xlu0 %v759_v9  ;;  %v763_v48 = vadd.f32 %v762_v25, %v4524_v15  ;;  %v907_v17 = vadd.f32 %v906_v2, %v4528_v56 }
 0x157   :  { %v4544_v18 = vpop.f32.mrb[52].mxu0  ;;  %v4546_v11 = vpop.f32.mrb[52].mxu1 }
 0x158   :  { %7578 = vst [vmem:[#allocation106_spill] sm:$0xff] %v4544_v18  ;;  %7579 = vst [vmem:[#allocation107_spill] sm:$0xff] %v4546_v11  ;;  %904 = vadd.xlane.f32.xlu0 %v903_v33  ;;  %764 = vadd.xlane.f32.xlu1 %v763_v48  ;;  %v4548_v1 = vpop.f32.mrb[53].mxu0  ;;  %v4550_v3 = vpop.f32.mrb[53].mxu1 }
 0x159   :  { %7580 = vst [vmem:[#allocation108_spill] sm:$0xff] %v4548_v1  ;;  %7581 = vst [vmem:[#allocation109_spill] sm:$0xff] %v4550_v3  ;;  %v4552_v42 = vpop.f32.mrb[54].mxu0  ;;  %v766_v16 = vsel %vm661_vm1, %v4548_v1, 0.0  ;;  %v4556_v9 = vpop.f32.mrb[54].mxu1  ;;  %v910_v2 = vsel %vm661_vm1, %v4550_v3, 0.0 }
 0x15a   :  { %7582 = vst [vmem:[#allocation110_spill] sm:$0xff] %v4552_v42  ;;  %7583 = vst [vmem:[#allocation111_spill] sm:$0xff] %v4556_v9  ;;  %v767_v25 = vadd.f32 %v766_v16, %v4544_v18  ;;  %v4561_v50 = vpop.f32.mrb[55].mxu0  ;;  %v4563_v33 = vpop.f32.mrb[55].mxu1  ;;  %v911_v48 = vadd.f32 %v910_v2, %v4546_v11 }
 0x15b   :  { %7584 = vst [vmem:[#allocation112_spill] sm:$0xff] %v4561_v50  ;;  %7585 = vst [vmem:[#allocation113_spill] sm:$0xff] %v4563_v33  ;;  %v770_v56 = vsel %vm661_vm1, %v4561_v50, 0.0  ;;  %v914_v15 = vsel %vm661_vm1, %v4563_v33, 0.0 }
 0x15c   :  { %908 = vadd.xlane.f32.xlu1 %v907_v17  ;;  %768 = vadd.xlane.f32.xlu0 %v767_v25  ;;  %v771_v1 = vadd.f32 %v770_v56, %v4552_v42  ;;  %v915_v3 = vadd.f32 %v914_v15, %v4556_v9 }
 0x15f   :  { %v4572_v49 = vpop.f32.mrb[56].mxu0  ;;  %v4574_v16 = vpop.f32.mrb[56].mxu1 }
 0x160   :  { %7586 = vst [vmem:[#allocation114_spill] sm:$0xff] %v4572_v49  ;;  %7587 = vst [vmem:[#allocation115_spill] sm:$0xff] %v4574_v16  ;;  %912 = vadd.xlane.f32.xlu0 %v911_v48  ;;  %772 = vadd.xlane.f32.xlu1 %v771_v1  ;;  %v4576_v18 = vpop.f32.mrb[57].mxu0  ;;  %v4578_v2 = vpop.f32.mrb[57].mxu1 }
 0x161   :  { %7588 = vst [vmem:[#allocation116_spill] sm:$0xff] %v4576_v18  ;;  %7589 = vst [vmem:[#allocation117_spill] sm:$0xff] %v4578_v2  ;;  %v4580_v50 = vpop.f32.mrb[58].mxu0  ;;  %v774_v17 = vsel %vm661_vm1, %v4576_v18, 0.0  ;;  %v4584_v25 = vpop.f32.mrb[58].mxu1  ;;  %v918_v15 = vsel %vm661_vm1, %v4578_v2, 0.0 }
 0x162   :  { %7590 = vst [vmem:[#allocation118_spill] sm:$0xff] %v4580_v50  ;;  %7591 = vst [vmem:[#allocation119_spill] sm:$0xff] %v4584_v25  ;;  %v775_v56 = vadd.f32 %v774_v17, %v4572_v49  ;;  %v4589_v33 = vpop.f32.mrb[59].mxu0  ;;  %v4591_v48 = vpop.f32.mrb[59].mxu1  ;;  %v919_v1 = vadd.f32 %v918_v15, %v4574_v16 }
 0x163   :  { %7592 = vst [vmem:[#allocation120_spill] sm:$0xff] %v4589_v33  ;;  %7593 = vst [vmem:[#allocation121_spill] sm:$0xff] %v4591_v48  ;;  %v778_v9 = vsel %vm661_vm1, %v4589_v33, 0.0  ;;  %v922_v42 = vsel %vm661_vm1, %v4591_v48, 0.0 }
 0x164   :  { %916 = vadd.xlane.f32.xlu1 %v915_v3  ;;  %776 = vadd.xlane.f32.xlu0 %v775_v56  ;;  %v779_v18 = vadd.f32 %v778_v9, %v4580_v50  ;;  %v923_v2 = vadd.f32 %v922_v42, %v4584_v25 }
 0x167   :  { %v4600_v11 = vpop.f32.mrb[60].mxu0  ;;  %v4602_v17 = vpop.f32.mrb[60].mxu1 }
 0x168   :  { %7594 = vst [vmem:[#allocation122_spill] sm:$0xff] %v4600_v11  ;;  %7595 = vst [vmem:[#allocation123_spill] sm:$0xff] %v4602_v17  ;;  %920 = vadd.xlane.f32.xlu0 %v919_v1  ;;  %780 = vadd.xlane.f32.xlu1 %v779_v18  ;;  %v4604_v49 = vpop.f32.mrb[61].mxu0  ;;  %v4606_v15 = vpop.f32.mrb[61].mxu1 }
 0x169   :  { %7596 = vst [vmem:[#allocation124_spill] sm:$0xff] %v4604_v49  ;;  %7597 = vst [vmem:[#allocation125_spill] sm:$0xff] %v4606_v15  ;;  %v4608_v33 = vpop.f32.mrb[62].mxu0  ;;  %v782_v3 = vsel %vm661_vm1, %v4604_v49, 0.0  ;;  %v4612_v56 = vpop.f32.mrb[62].mxu1  ;;  %v926_v42 = vsel %vm661_vm1, %v4606_v15, 0.0 }
 0x16a   :  { %7598 = vst [vmem:[#allocation126_spill] sm:$0xff] %v4608_v33  ;;  %7599 = vst [vmem:[#allocation127_spill] sm:$0xff] %v4612_v56  ;;  %v783_v9 = vadd.f32 %v782_v3, %v4600_v11  ;;  %v4617_v48 = vpop.f32.mrb[63].mxu0  ;;  %v4619_v1 = vpop.f32.mrb[63].mxu1  ;;  %v927_v18 = vadd.f32 %v926_v42, %v4602_v17 }
 0x16b   :  { %7600 = vst [vmem:[#allocation128_spill] sm:$0xff] %v4617_v48  ;;  %7601 = vst [vmem:[#allocation129_spill] sm:$0xff] %v4619_v1  ;;  %v786_v25 = vsel %vm661_vm1, %v4617_v48, 0.0  ;;  %v930_v50 = vsel %vm661_vm1, %v4619_v1, 0.0 }
 0x16c   :  { %924 = vadd.xlane.f32.xlu1 %v923_v2  ;;  %784 = vadd.xlane.f32.xlu0 %v783_v9  ;;  %v787_v49 = vadd.f32 %v786_v25, %v4608_v33  ;;  %v931_v15 = vadd.f32 %v930_v50, %v4612_v56 }
 0x16f   :  { %v4628_v16 = vpop.f32.mrb[64].mxu0  ;;  %v4630_v3 = vpop.f32.mrb[64].mxu1 }
 0x170   :  { %7602 = vst [vmem:[#allocation130_spill] sm:$0xff] %v4628_v16  ;;  %7603 = vst [vmem:[#allocation131_spill] sm:$0xff] %v4630_v3  ;;  %928 = vadd.xlane.f32.xlu0 %v927_v18  ;;  %788 = vadd.xlane.f32.xlu1 %v787_v49  ;;  %v4632_v11 = vpop.f32.mrb[65].mxu0  ;;  %v4634_v42 = vpop.f32.mrb[65].mxu1 }
 0x171   :  { %7604 = vst [vmem:[#allocation132_spill] sm:$0xff] %v4632_v11  ;;  %7605 = vst [vmem:[#allocation133_spill] sm:$0xff] %v4634_v42  ;;  %v4636_v48 = vpop.f32.mrb[66].mxu0  ;;  %v790_v2 = vsel %vm661_vm1, %v4632_v11, 0.0  ;;  %v4640_v9 = vpop.f32.mrb[66].mxu1  ;;  %v934_v50 = vsel %vm661_vm1, %v4634_v42, 0.0 }
 0x172   :  { %7606 = vst [vmem:[#allocation134_spill] sm:$0xff] %v4636_v48  ;;  %7607 = vst [vmem:[#allocation135_spill] sm:$0xff] %v4640_v9  ;;  %v791_v25 = vadd.f32 %v790_v2, %v4628_v16  ;;  %v4645_v1 = vpop.f32.mrb[67].mxu0  ;;  %v4647_v18 = vpop.f32.mrb[67].mxu1  ;;  %v935_v49 = vadd.f32 %v934_v50, %v4630_v3 }
 0x173   :  { %7608 = vst [vmem:[#allocation136_spill] sm:$0xff] %v4645_v1  ;;  %7609 = vst [vmem:[#allocation137_spill] sm:$0xff] %v4647_v18  ;;  %v794_v56 = vsel %vm661_vm1, %v4645_v1, 0.0  ;;  %v938_v33 = vsel %vm661_vm1, %v4647_v18, 0.0 }
 0x174   :  { %932 = vadd.xlane.f32.xlu1 %v931_v15  ;;  %792 = vadd.xlane.f32.xlu0 %v791_v25  ;;  %v795_v11 = vadd.f32 %v794_v56, %v4636_v48  ;;  %v939_v42 = vadd.f32 %v938_v33, %v4640_v9 }
 0x177   :  { %v4656_v17 = vpop.f32.mrb[68].mxu0  ;;  %v4658_v2 = vpop.f32.mrb[68].mxu1 }
 0x178   :  { %7610 = vst [vmem:[#allocation138_spill] sm:$0xff] %v4656_v17  ;;  %7611 = vst [vmem:[#allocation139_spill] sm:$0xff] %v4658_v2  ;;  %936 = vadd.xlane.f32.xlu0 %v935_v49  ;;  %796 = vadd.xlane.f32.xlu1 %v795_v11  ;;  %v4660_v16 = vpop.f32.mrb[69].mxu0  ;;  %v4662_v50 = vpop.f32.mrb[69].mxu1 }
 0x179   :  { %7612 = vst [vmem:[#allocation140_spill] sm:$0xff] %v4660_v16  ;;  %7613 = vst [vmem:[#allocation141_spill] sm:$0xff] %v4662_v50  ;;  %v4664_v1 = vpop.f32.mrb[70].mxu0  ;;  %v798_v15 = vsel %vm661_vm1, %v4660_v16, 0.0  ;;  %v4668_v25 = vpop.f32.mrb[70].mxu1  ;;  %v942_v33 = vsel %vm661_vm1, %v4662_v50, 0.0 }
 0x17a   :  { %7614 = vst [vmem:[#allocation142_spill] sm:$0xff] %v4664_v1  ;;  %7615 = vst [vmem:[#allocation143_spill] sm:$0xff] %v4668_v25  ;;  %v799_v56 = vadd.f32 %v798_v15, %v4656_v17  ;;  %v4673_v18 = vpop.f32.mrb[71].mxu0  ;;  %v4675_v49 = vpop.f32.mrb[71].mxu1  ;;  %v943_v11 = vadd.f32 %v942_v33, %v4658_v2 }
 0x17b   :  { %7616 = vst [vmem:[#allocation144_spill] sm:$0xff] %v4673_v18  ;;  %7617 = vst [vmem:[#allocation145_spill] sm:$0xff] %v4675_v49  ;;  %v802_v9 = vsel %vm661_vm1, %v4673_v18, 0.0  ;;  %v946_v48 = vsel %vm661_vm1, %v4675_v49, 0.0 }
 0x17c   :  { %940 = vadd.xlane.f32.xlu1 %v939_v42  ;;  %800 = vadd.xlane.f32.xlu0 %v799_v56  ;;  %v803_v16 = vadd.f32 %v802_v9, %v4664_v1  ;;  %v947_v50 = vadd.f32 %v946_v48, %v4668_v25 }
 0x180   :  { %944 = vadd.xlane.f32.xlu0 %v943_v11  ;;  %804 = vadd.xlane.f32.xlu1 %v803_v16 }
 0x181   :  { %v665_v15 = vpop.xlane.xlu0 %664 }
 0x182   :  { %v4684_v17 = vmul.f32 0.0051020407, %v665_v15 }
 0x183   :  { %v813_v3 = vpop.xlane.xlu1 %812 }
 0x184   :  { %7618 = vst [vmem:[#allocation146_spill] sm:$0xff] %v4684_v17  ;;  %v4686_v47 = vmul.f32 0.0051020407, %v813_v3  ;;  %948 = vadd.xlane.f32.xlu1 %v947_v50  ;;  %v1022_v33 = vsub.f32 %v4180_v19, %v4684_v17  ;;  %v1023_v42 = vsub.f32 %v4184_v21, %v4684_v17 }
 0x185   :  { %v809_v56 = vpop.xlane.xlu0 %808 }
 0x186   :  { %v4692_v49 = vmul.f32 0.0051020407, %v809_v56  ;;  %v1166_v9 = vmul.f32 %v1022_v33, %v1022_v33  ;;  %v1167_v48 = vmul.f32 %v1023_v42, %v1023_v42  ;;  %v1096_v16 = vsub.f32 %v4190_v24, %v4686_v47 }
 0x187   :  { %v1097_v11 = vsub.f32 %v4198_v28, %v4686_v47 }
 0x188   :  { %v1310_v3 = vsel %vm661_vm1, %v1167_v48, 0.0  ;;  %v1094_v50 = vsub.f32 %v4182_v20, %v4692_v49  ;;  %v1095_v15 = vsub.f32 %v4186_v22, %v4692_v49  ;;  %v1240_v17 = vmul.f32 %v1096_v16, %v1096_v16 }
 0x189   :  { %v669_v21 = vpop.xlane.xlu0 %668  ;;  %v673_v19 = vpop.xlane.xlu1 %672  ;;  %v1311_v56 = vadd.f32 %v1310_v3, %v1166_v9  ;;  %v1241_v33 = vmul.f32 %v1097_v11, %v1097_v11 }
 0x18a   :  { %v4703_v42 = vmul.f32 0.0051020407, %v669_v21  ;;  %v4705_v25 = vmul.f32 0.0051020407, %v673_v19  ;;  %v1238_v24 = vmul.f32 %v1094_v50, %v1094_v50  ;;  %v1239_v18 = vmul.f32 %v1095_v15, %v1095_v15 }
 0x18b   :  { %1312 = vadd.xlane.f32.xlu0 %v1311_v56  ;;  %v1458_v48 = vsel %vm661_vm1, %v1241_v33, 0.0 }
 0x18c   :  { %v1454_v28 = vsel %vm661_vm1, %v1239_v18, 0.0  ;;  %v1026_v20 = vsub.f32 %v4208_v35, %v4705_v25  ;;  %v1027_v22 = vsub.f32 %v4212_v37, %v4705_v25  ;;  %v1024_v9 = vsub.f32 %v4188_v23, %v4703_v42 }
 0x18d   :  { %v817_v21 = vpop.xlane.xlu0 %816  ;;  %v677_v16 = vpop.xlane.xlu1 %676  ;;  %v1455_v19 = vadd.f32 %v1454_v28, %v1238_v24  ;;  %v1025_v11 = vsub.f32 %v4196_v27, %v4703_v42  ;;  %v1459_v3 = vadd.f32 %v1458_v48, %v1240_v17 }
 0x18e   :  { %v4717_v50 = vmul.f32 0.0051020407, %v817_v21  ;;  %v4719_v15 = vmul.f32 0.0051020407, %v677_v16  ;;  %v1170_v18 = vmul.f32 %v1026_v20, %v1026_v20  ;;  %v1171_v56 = vmul.f32 %v1027_v22, %v1027_v22 }
 0x18f   :  { %1456 = vadd.xlane.f32.xlu0 %v1455_v19  ;;  %v1168_v33 = vmul.f32 %v1024_v9, %v1024_v9  ;;  %v1169_v35 = vmul.f32 %v1025_v11, %v1025_v11 }
 0x190   :  { %v1318_v37 = vsel %vm661_vm1, %v1171_v56, 0.0  ;;  %v1098_v23 = vsub.f32 %v4210_v36, %v4717_v50  ;;  %v1099_v24 = vsub.f32 %v4214_v38, %v4717_v50  ;;  %v1028_v28 = vsub.f32 %v4216_v39, %v4719_v15 }
 0x191   :  { %v821_v17 = vpop.xlane.xlu1 %820  ;;  %v681_v48 = vpop.xlane.xlu0 %680  ;;  %v1319_v21 = vadd.f32 %v1318_v37, %v1170_v18  ;;  %v1314_v20 = vsel %vm661_vm1, %v1169_v35, 0.0  ;;  %v1029_v22 = vsub.f32 %v4224_v43, %v4719_v15 }
 0x192   :  { %v4731_v9 = vmul.f32 0.0051020407, %v821_v17  ;;  %v4733_v16 = vmul.f32 0.0051020407, %v681_v48  ;;  %v1315_v19 = vadd.f32 %v1314_v20, %v1168_v33  ;;  %v1242_v11 = vmul.f32 %v1098_v23, %v1098_v23 }
 0x193   :  { %1320 = vadd.xlane.f32.xlu0 %v1319_v21  ;;  %v1243_v56 = vmul.f32 %v1099_v24, %v1099_v24  ;;  %v1172_v38 = vmul.f32 %v1028_v28, %v1028_v28  ;;  %v1173_v36 = vmul.f32 %v1029_v22, %v1029_v22 }
 0x194   :  { %1316 = vadd.xlane.f32.xlu1 %v1315_v19  ;;  %v1030_v39 = vsub.f32 %v4236_v51, %v4733_v16  ;;  %v1031_v35 = vsub.f32 %v4240_v53, %v4733_v16  ;;  %v1100_v37 = vsub.f32 %v4220_v41, %v4731_v9  ;;  %v1101_v18 = vsub.f32 %v4227_v45, %v4731_v9 }
 0x195   :  { %v825_v17 = vpop.xlane.xlu0 %824  ;;  %v685_v33 = vpop.xlane.xlu1 %684  ;;  %v1462_v23 = vsel %vm661_vm1, %v1243_v56, 0.0  ;;  %v1322_v24 = vsel %vm661_vm1, %v1173_v36, 0.0 }
 0x196   :  { %v4745_v28 = vmul.f32 0.0051020407, %v825_v17  ;;  %v4747_v48 = vmul.f32 0.0051020407, %v685_v33  ;;  %v1463_v21 = vadd.f32 %v1462_v23, %v1242_v11  ;;  %v1174_v20 = vmul.f32 %v1030_v39, %v1030_v39 }
 0x197   :  { %v1175_v22 = vmul.f32 %v1031_v35, %v1031_v35  ;;  %v1323_v19 = vadd.f32 %v1322_v24, %v1172_v38  ;;  %v1244_v43 = vmul.f32 %v1100_v37, %v1100_v37  ;;  %v1245_v53 = vmul.f32 %v1101_v18, %v1101_v18 }
 0x198   :  { %1464 = vadd.xlane.f32.xlu0 %v1463_v21  ;;  %1460 = vadd.xlane.f32.xlu1 %v1459_v3  ;;  %v1102_v45 = vsub.f32 %v4238_v52, %v4745_v28  ;;  %v1103_v56 = vsub.f32 %v4242_v54, %v4745_v28  ;;  %v1032_v36 = vsub.f32 %v4244_v55, %v4747_v48 }
 0x199   :  { %v829_v17 = vpop.xlane.xlu1 %828  ;;  %v689_v33 = vpop.xlane.xlu0 %688  ;;  %v1326_v11 = vsel %vm661_vm1, %v1175_v22, 0.0  ;;  %v1466_v39 = vsel %vm661_vm1, %v1245_v53, 0.0  ;;  %v1033_v38 = vsub.f32 %v4253_v60, %v4747_v48 }
 0x19a   :  { %v4759_v35 = vmul.f32 0.0051020407, %v829_v17  ;;  %v4761_v3 = vmul.f32 0.0051020407, %v689_v33  ;;  %v1327_v37 = vadd.f32 %v1326_v11, %v1174_v20  ;;  %v1246_v18 = vmul.f32 %v1102_v45, %v1102_v45 }
 0x19b   :  { %v1247_v23 = vmul.f32 %v1103_v56, %v1103_v56  ;;  %v1467_v24 = vadd.f32 %v1466_v39, %v1244_v43  ;;  %v1176_v21 = vmul.f32 %v1032_v36, %v1032_v36  ;;  %v1177_v41 = vmul.f32 %v1033_v38, %v1033_v38 }
 0x19c   :  { %1328 = vadd.xlane.f32.xlu0 %v1327_v37  ;;  %1324 = vadd.xlane.f32.xlu1 %v1323_v19  ;;  %v1034_v22 = vsub.f32 %v4264_v4, %v4761_v3  ;;  %v1035_v53 = vsub.f32 %v4268_v6, %v4761_v3  ;;  %v1104_v17 = vsub.f32 %v4248_v57, %v4759_v35 }
 0x19d   :  { %v833_v60 = vpop.xlane.xlu0 %832  ;;  %v693_v33 = vpop.xlane.xlu1 %692  ;;  %v1470_v20 = vsel %vm661_vm1, %v1247_v23, 0.0  ;;  %v1330_v45 = vsel %vm661_vm1, %v1177_v41, 0.0  ;;  %v1105_v43 = vsub.f32 %v4255_v61, %v4759_v35 }
 0x19e   :  { %v4773_v56 = vmul.f32 0.0051020407, %v833_v60  ;;  %v4775_v19 = vmul.f32 0.0051020407, %v693_v33  ;;  %v1471_v36 = vadd.f32 %v1470_v20, %v1246_v18  ;;  %v1178_v11 = vmul.f32 %v1034_v22, %v1034_v22 }
 0x19f   :  { %v1179_v39 = vmul.f32 %v1035_v53, %v1035_v53  ;;  %v1331_v38 = vadd.f32 %v1330_v45, %v1176_v21  ;;  %v1248_v37 = vmul.f32 %v1104_v17, %v1104_v17  ;;  %v1249_v55 = vmul.f32 %v1105_v43, %v1105_v43 }
 0x1a0   :  { %1472 = vadd.xlane.f32.xlu0 %v1471_v36  ;;  %1468 = vadd.xlane.f32.xlu1 %v1467_v24  ;;  %v1106_v23 = vsub.f32 %v4266_v5, %v4773_v56  ;;  %v1107_v41 = vsub.f32 %v4270_v7, %v4773_v56  ;;  %v1036_v60 = vsub.f32 %v4272_v8, %v4775_v19 }
 0x1a1   :  { %v837_v61 = vpop.xlane.xlu1 %836  ;;  %v697_v33 = vpop.xlane.xlu0 %696  ;;  %v1334_v18 = vsel %vm661_vm1, %v1179_v39, 0.0  ;;  %v1474_v22 = vsel %vm661_vm1, %v1249_v55, 0.0  ;;  %v1037_v21 = vsub.f32 %v4281_v13, %v4775_v19 }
 0x1a2   :  { %v4787_v53 = vmul.f32 0.0051020407, %v837_v61  ;;  %v4789_v24 = vmul.f32 0.0051020407, %v697_v33  ;;  %v1335_v17 = vadd.f32 %v1334_v18, %v1178_v11  ;;  %v1250_v20 = vmul.f32 %v1106_v23, %v1106_v23 }
 0x1a3   :  { %v1251_v45 = vmul.f32 %v1107_v41, %v1107_v41  ;;  %v1475_v43 = vadd.f32 %v1474_v22, %v1248_v37  ;;  %v1180_v36 = vmul.f32 %v1036_v60, %v1036_v60  ;;  %v1181_v57 = vmul.f32 %v1037_v21, %v1037_v21 }
 0x1a4   :  { %1336 = vadd.xlane.f32.xlu0 %v1335_v17  ;;  %1332 = vadd.xlane.f32.xlu1 %v1331_v38  ;;  %v1038_v39 = vsub.f32 %v4292_v26, %v4789_v24  ;;  %v1039_v55 = vsub.f32 %v4296_v30, %v4789_v24  ;;  %v1108_v61 = vsub.f32 %v4276_v10, %v4787_v53 }
 0x1a5   :  { %v841_v13 = vpop.xlane.xlu0 %840  ;;  %v701_v33 = vpop.xlane.xlu1 %700  ;;  %v1478_v11 = vsel %vm661_vm1, %v1251_v45, 0.0  ;;  %v1338_v23 = vsel %vm661_vm1, %v1181_v57, 0.0  ;;  %v1109_v37 = vsub.f32 %v4283_v14, %v4787_v53 }
 0x1a6   :  { %v4801_v41 = vmul.f32 0.0051020407, %v841_v13  ;;  %v4803_v38 = vmul.f32 0.0051020407, %v701_v33  ;;  %v1479_v60 = vadd.f32 %v1478_v11, %v1250_v20  ;;  %v1182_v18 = vmul.f32 %v1038_v39, %v1038_v39 }
 0x1a7   :  { %v1183_v22 = vmul.f32 %v1039_v55, %v1039_v55  ;;  %v1339_v21 = vadd.f32 %v1338_v23, %v1180_v36  ;;  %v1252_v17 = vmul.f32 %v1108_v61, %v1108_v61  ;;  %v1253_v8 = vmul.f32 %v1109_v37, %v1109_v37 }
 0x1a8   :  { %1480 = vadd.xlane.f32.xlu0 %v1479_v60  ;;  %1476 = vadd.xlane.f32.xlu1 %v1475_v43  ;;  %v1110_v45 = vsub.f32 %v4294_v29, %v4801_v41  ;;  %v1111_v57 = vsub.f32 %v4298_v31, %v4801_v41  ;;  %v1040_v13 = vsub.f32 %v4300_v32, %v4803_v38 }
 0x1a9   :  { %v845_v14 = vpop.xlane.xlu1 %844  ;;  %v705_v33 = vpop.xlane.xlu0 %704  ;;  %v1342_v20 = vsel %vm661_vm1, %v1183_v22, 0.0  ;;  %v1482_v39 = vsel %vm661_vm1, %v1253_v8, 0.0  ;;  %v1041_v36 = vsub.f32 %v4309_v44, %v4803_v38 }
 0x1aa   :  { %v4815_v55 = vmul.f32 0.0051020407, %v845_v14  ;;  %v4817_v43 = vmul.f32 0.0051020407, %v705_v33  ;;  %v1343_v61 = vadd.f32 %v1342_v20, %v1182_v18  ;;  %v1254_v11 = vmul.f32 %v1110_v45, %v1110_v45 }
 0x1ab   :  { %v1255_v23 = vmul.f32 %v1111_v57, %v1111_v57  ;;  %v1483_v37 = vadd.f32 %v1482_v39, %v1252_v17  ;;  %v1184_v60 = vmul.f32 %v1040_v13, %v1040_v13  ;;  %v1185_v10 = vmul.f32 %v1041_v36, %v1041_v36 }
 0x1ac   :  { %1344 = vadd.xlane.f32.xlu0 %v1343_v61  ;;  %1340 = vadd.xlane.f32.xlu1 %v1339_v21  ;;  %v1042_v22 = vsub.f32 %v4320_v58, %v4817_v43  ;;  %v1043_v8 = vsub.f32 %v4324_v62, %v4817_v43  ;;  %v1112_v14 = vsub.f32 %v4304_v34, %v4815_v55 }
 0x1ad   :  { %v849_v44 = vpop.xlane.xlu0 %848  ;;  %v709_v33 = vpop.xlane.xlu1 %708  ;;  %v1486_v18 = vsel %vm661_vm1, %v1255_v23, 0.0  ;;  %v1346_v45 = vsel %vm661_vm1, %v1185_v10, 0.0  ;;  %v1113_v17 = vsub.f32 %v4311_v46, %v4815_v55 }
 0x1ae   :  { %v4829_v57 = vmul.f32 0.0051020407, %v849_v44  ;;  %v4831_v21 = vmul.f32 0.0051020407, %v709_v33  ;;  %v1487_v13 = vadd.f32 %v1486_v18, %v1254_v11  ;;  %v1186_v20 = vmul.f32 %v1042_v22, %v1042_v22 }
 0x1af   :  { %v1187_v39 = vmul.f32 %v1043_v8, %v1043_v8  ;;  %v1347_v36 = vadd.f32 %v1346_v45, %v1184_v60  ;;  %v1256_v61 = vmul.f32 %v1112_v14, %v1112_v14  ;;  %v1257_v32 = vmul.f32 %v1113_v17, %v1113_v17 }
 0x1b0   :  { %1488 = vadd.xlane.f32.xlu0 %v1487_v13  ;;  %1484 = vadd.xlane.f32.xlu1 %v1483_v37  ;;  %v1114_v23 = vsub.f32 %v4322_v59, %v4829_v57  ;;  %v1115_v10 = vsub.f32 %v4326_v63, %v4829_v57  ;;  %v1044_v44 = vsub.f32 %v4328_v0, %v4831_v21 }
 0x1b1   :  { %v853_v46 = vpop.xlane.xlu1 %852  ;;  %v713_v33 = vpop.xlane.xlu0 %712  ;;  %v1350_v11 = vsel %vm661_vm1, %v1187_v39, 0.0  ;;  %v1490_v22 = vsel %vm661_vm1, %v1257_v32, 0.0  ;;  %v1045_v60 = vsub.f32 %v4337_v12, %v4831_v21  ;;  %v7619_v32 = vld [vmem:[#allocation52_spill] sm:$0xff]  ;;  %v7620_v12 = vld [vmem:[#allocation47_spill] sm:$0xff] }
 0x1b2   :  { %v4843_v8 = vmul.f32 0.0051020407, %v853_v46  ;;  %v4845_v37 = vmul.f32 0.0051020407, %v713_v33  ;;  %v1351_v14 = vadd.f32 %v1350_v11, %v1186_v20  ;;  %v1258_v18 = vmul.f32 %v1114_v23, %v1114_v23 }
 0x1b3   :  { %v1259_v45 = vmul.f32 %v1115_v10, %v1115_v10  ;;  %v1491_v17 = vadd.f32 %v1490_v22, %v1256_v61  ;;  %v1188_v13 = vmul.f32 %v1044_v44, %v1044_v44  ;;  %v1189_v34 = vmul.f32 %v1045_v60, %v1045_v60  ;;  %v7621_v61 = vld [vmem:[#allocation49_spill] sm:$0xff] }
 0x1b4   :  { %1352 = vadd.xlane.f32.xlu0 %v1351_v14  ;;  %1348 = vadd.xlane.f32.xlu1 %v1347_v36  ;;  %v1046_v39 = vsub.f32 %v4348_v40, %v4845_v37  ;;  %v1047_v0 = vsub.f32 %v7619_v32, %v4845_v37  ;;  %v1116_v46 = vsub.f32 %v7620_v12, %v4843_v8  ;;  %v7622_v12 = vld [vmem:[#allocation51_spill] sm:$0xff] }
 0x1b5   :  { %v857_v63 = vpop.xlane.xlu0 %856  ;;  %v717_v33 = vpop.xlane.xlu1 %716  ;;  %v1494_v20 = vsel %vm661_vm1, %v1259_v45, 0.0  ;;  %v1354_v23 = vsel %vm661_vm1, %v1189_v34, 0.0  ;;  %v1117_v10 = vsub.f32 %v7621_v61, %v4843_v8  ;;  %v7623_v45 = vld [vmem:[#allocation53_spill] sm:$0xff]  ;;  %v7624_v34 = vld [vmem:[#allocation54_spill] sm:$0xff] }
 0x1b6   :  { %v4857_v44 = vmul.f32 0.0051020407, %v857_v63  ;;  %v4859_v36 = vmul.f32 0.0051020407, %v717_v33  ;;  %v1495_v11 = vadd.f32 %v1494_v20, %v1258_v18  ;;  %v1190_v22 = vmul.f32 %v1046_v39, %v1046_v39 }
 0x1b7   :  { %v1191_v60 = vmul.f32 %v1047_v0, %v1047_v0  ;;  %v1355_v14 = vadd.f32 %v1354_v23, %v1188_v13  ;;  %v1260_v32 = vmul.f32 %v1116_v46, %v1116_v46  ;;  %v1261_v40 = vmul.f32 %v1117_v10, %v1117_v10  ;;  %v7625_v13 = vld [vmem:[#allocation56_spill] sm:$0xff] }
 0x1b8   :  { %v1118_v59 = vsub.f32 %v7622_v12, %v4857_v44  ;;  %v1119_v62 = vsub.f32 %v7623_v45, %v4857_v44  ;;  %1496 = vadd.xlane.f32.xlu0 %v1495_v11  ;;  %1492 = vadd.xlane.f32.xlu1 %v1491_v17  ;;  %v1048_v63 = vsub.f32 %v7624_v34, %v4859_v36  ;;  %v7626_v34 = vld [vmem:[#allocation55_spill] sm:$0xff] }
 0x1b9   :  { %v861_v61 = vpop.xlane.xlu1 %860  ;;  %v721_v33 = vpop.xlane.xlu0 %720  ;;  %v1358_v18 = vsel %vm661_vm1, %v1191_v60, 0.0  ;;  %v1498_v0 = vsel %vm661_vm1, %v1261_v40, 0.0  ;;  %v1049_v39 = vsub.f32 %v7625_v13, %v4859_v36  ;;  %v7627_v60 = vld [vmem:[#allocation57_spill] sm:$0xff]  ;;  %v7628_v40 = vld [vmem:[#allocation58_spill] sm:$0xff] }
 0x1ba   :  { %v1263_v46 = vmul.f32 %v1119_v62, %v1119_v62  ;;  %v4871_v20 = vmul.f32 0.0051020407, %v861_v61  ;;  %v4873_v23 = vmul.f32 0.0051020407, %v721_v33  ;;  %v1359_v10 = vadd.f32 %v1358_v18, %v1190_v22  ;;  %v7629_v62 = vld [vmem:[#allocation60_spill] sm:$0xff] }
 0x1bb   :  { %v1262_v11 = vmul.f32 %v1118_v59, %v1118_v59  ;;  %v1499_v17 = vadd.f32 %v1498_v0, %v1260_v32  ;;  %v1192_v45 = vmul.f32 %v1048_v63, %v1048_v63  ;;  %v1193_v12 = vmul.f32 %v1049_v39, %v1049_v39 }
 0x1bc   :  { %v1120_v58 = vsub.f32 %v7626_v34, %v4871_v20  ;;  %v1121_v31 = vsub.f32 %v7627_v60, %v4871_v20  ;;  %v1050_v29 = vsub.f32 %v7628_v40, %v4873_v23  ;;  %v1051_v61 = vsub.f32 %v7629_v62, %v4873_v23  ;;  %1360 = vadd.xlane.f32.xlu0 %v1359_v10  ;;  %v7630_v62 = vld [vmem:[#allocation59_spill] sm:$0xff] }
 0x1bd   :  { %1356 = vadd.xlane.f32.xlu1 %v1355_v14  ;;  %v865_v33 = vpop.xlane.xlu0 %864  ;;  %v725_v22 = vpop.xlane.xlu1 %724  ;;  %v1502_v59 = vsel %vm661_vm1, %v1263_v46, 0.0  ;;  %v1362_v32 = vsel %vm661_vm1, %v1193_v12, 0.0  ;;  %v7631_v14 = vld [vmem:[#allocation61_spill] sm:$0xff]  ;;  %v7632_v46 = vld [vmem:[#allocation62_spill] sm:$0xff] }
 0x1be   :  { %v1265_v63 = vmul.f32 %v1121_v31, %v1121_v31  ;;  %v1195_v18 = vmul.f32 %v1051_v61, %v1051_v61  ;;  %v4885_v0 = vmul.f32 0.0051020407, %v865_v33  ;;  %v4887_v39 = vmul.f32 0.0051020407, %v725_v22  ;;  %v7633_v31 = vld [vmem:[#allocation64_spill] sm:$0xff] }
 0x1bf   :  { %v1503_v60 = vadd.f32 %v1502_v59, %v1262_v11  ;;  %v1194_v34 = vmul.f32 %v1050_v29, %v1050_v29  ;;  %v1363_v13 = vadd.f32 %v1362_v32, %v1192_v45  ;;  %v1264_v40 = vmul.f32 %v1120_v58, %v1120_v58 }
 0x1c0   :  { %v1122_v10 = vsub.f32 %v7630_v62, %v4885_v0  ;;  %v1123_v30 = vsub.f32 %v7631_v14, %v4885_v0  ;;  %v1052_v26 = vsub.f32 %v7632_v46, %v4887_v39  ;;  %v1053_v12 = vsub.f32 %v7633_v31, %v4887_v39  ;;  %v7634_v31 = vld [vmem:[#allocation63_spill] sm:$0xff] }
 0x1c1   :  { %1504 = vadd.xlane.f32.xlu0 %v1503_v60  ;;  %1500 = vadd.xlane.f32.xlu1 %v1499_v17  ;;  %v869_v61 = vpop.xlane.xlu1 %868  ;;  %v729_v33 = vpop.xlane.xlu0 %728  ;;  %v1366_v29 = vsel %vm661_vm1, %v1195_v18, 0.0  ;;  %v1506_v58 = vsel %vm661_vm1, %v1265_v63, 0.0  ;;  %v7635_v17 = vld [vmem:[#allocation65_spill] sm:$0xff]  ;;  %v7636_v18 = vld [vmem:[#allocation66_spill] sm:$0xff] }
 0x1c2   :  { %v1267_v45 = vmul.f32 %v1123_v30, %v1123_v30  ;;  %v1197_v11 = vmul.f32 %v1053_v12, %v1053_v12  ;;  %v4899_v22 = vmul.f32 0.0051020407, %v869_v61  ;;  %v4901_v59 = vmul.f32 0.0051020407, %v729_v33  ;;  %v7637_v30 = vld [vmem:[#allocation68_spill] sm:$0xff] }
 0x1c3   :  { %v1367_v32 = vadd.f32 %v1366_v29, %v1194_v34  ;;  %v1266_v14 = vmul.f32 %v1122_v10, %v1122_v10  ;;  %v1507_v46 = vadd.f32 %v1506_v58, %v1264_v40  ;;  %v1196_v62 = vmul.f32 %v1052_v26, %v1052_v26 }
 0x1c4   :  { %v1124_v60 = vsub.f32 %v7634_v31, %v4899_v22  ;;  %v1125_v7 = vsub.f32 %v7635_v17, %v4899_v22  ;;  %v1054_v5 = vsub.f32 %v7636_v18, %v4901_v59  ;;  %v1055_v63 = vsub.f32 %v7637_v30, %v4901_v59  ;;  %v7638_v30 = vld [vmem:[#allocation67_spill] sm:$0xff] }
 0x1c5   :  { %1368 = vadd.xlane.f32.xlu0 %v1367_v32  ;;  %1364 = vadd.xlane.f32.xlu1 %v1363_v13  ;;  %v873_v12 = vpop.xlane.xlu0 %872  ;;  %v733_v61 = vpop.xlane.xlu1 %732  ;;  %v1510_v34 = vsel %vm661_vm1, %v1267_v45, 0.0  ;;  %v1370_v26 = vsel %vm661_vm1, %v1197_v11, 0.0  ;;  %v7639_v13 = vld [vmem:[#allocation69_spill] sm:$0xff]  ;;  %v7640_v45 = vld [vmem:[#allocation70_spill] sm:$0xff] }
 0x1c6   :  { %v1269_v40 = vmul.f32 %v1125_v7, %v1125_v7  ;;  %v1199_v10 = vmul.f32 %v1055_v63, %v1055_v63  ;;  %v4913_v33 = vmul.f32 0.0051020407, %v873_v12  ;;  %v4915_v29 = vmul.f32 0.0051020407, %v733_v61  ;;  %v7641_v7 = vld [vmem:[#allocation72_spill] sm:$0xff] }
 0x1c7   :  { %v1511_v58 = vadd.f32 %v1510_v34, %v1266_v14  ;;  %v1198_v17 = vmul.f32 %v1054_v5, %v1054_v5  ;;  %v1371_v31 = vadd.f32 %v1370_v26, %v1196_v62  ;;  %v1268_v18 = vmul.f32 %v1124_v60, %v1124_v60 }
 0x1c8   :  { %v1126_v32 = vsub.f32 %v7638_v30, %v4913_v33  ;;  %v1127_v6 = vsub.f32 %v7639_v13, %v4913_v33  ;;  %v1056_v4 = vsub.f32 %v7640_v45, %v4915_v29  ;;  %v1057_v11 = vsub.f32 %v7641_v7, %v4915_v29  ;;  %v7643_v7 = vld [vmem:[#allocation71_spill] sm:$0xff] }
 0x1c9   :  { %1512 = vadd.xlane.f32.xlu0 %v1511_v58  ;;  %1508 = vadd.xlane.f32.xlu1 %v1507_v46  ;;  %v877_v63 = vpop.xlane.xlu1 %876  ;;  %v737_v12 = vpop.xlane.xlu0 %736  ;;  %v1374_v5 = vsel %vm661_vm1, %v1199_v10, 0.0  ;;  %v1514_v62 = vsel %vm661_vm1, %v1269_v40, 0.0  ;;  %v7644_v46 = vld [vmem:[#allocation73_spill] sm:$0xff]  ;;  %v7645_v10 = vld [vmem:[#allocation74_spill] sm:$0xff] }
 0x1ca   :  { %v1271_v14 = vmul.f32 %v1127_v6, %v1127_v6  ;;  %v1201_v60 = vmul.f32 %v1057_v11, %v1057_v11  ;;  %v4927_v61 = vmul.f32 0.0051020407, %v877_v63  ;;  %v4929_v34 = vmul.f32 0.0051020407, %v737_v12  ;;  %v7646_v6 = vld [vmem:[#allocation76_spill] sm:$0xff] }
 0x1cb   :  { %v1375_v26 = vadd.f32 %v1374_v5, %v1198_v17  ;;  %v1270_v13 = vmul.f32 %v1126_v32, %v1126_v32  ;;  %v1515_v45 = vadd.f32 %v1514_v62, %v1268_v18  ;;  %v1200_v30 = vmul.f32 %v1056_v4, %v1056_v4 }
 0x1cc   :  { %7642 = vst [vmem:[#allocation147_spill] sm:$0xff] %v4927_v61  ;;  %v1128_v58 = vsub.f32 %v7643_v7, %v4927_v61  ;;  %v1129_v54 = vsub.f32 %v7644_v46, %v4927_v61  ;;  %v1058_v52 = vsub.f32 %v7645_v10, %v4929_v34  ;;  %v1059_v40 = vsub.f32 %v7646_v6, %v4929_v34  ;;  %v7648_v6 = vld [vmem:[#allocation75_spill] sm:$0xff] }
 0x1cd   :  { %1376 = vadd.xlane.f32.xlu0 %v1375_v26  ;;  %1372 = vadd.xlane.f32.xlu1 %v1371_v31  ;;  %v881_v11 = vpop.xlane.xlu0 %880  ;;  %v741_v63 = vpop.xlane.xlu1 %740  ;;  %v1518_v17 = vsel %vm661_vm1, %v1271_v14, 0.0  ;;  %v1378_v4 = vsel %vm661_vm1, %v1201_v60, 0.0  ;;  %v7649_v31 = vld [vmem:[#allocation77_spill] sm:$0xff]  ;;  %v7650_v14 = vld [vmem:[#allocation78_spill] sm:$0xff] }
 0x1ce   :  { %v1273_v18 = vmul.f32 %v1129_v54, %v1129_v54  ;;  %v1203_v32 = vmul.f32 %v1059_v40, %v1059_v40  ;;  %v4941_v12 = vmul.f32 0.0051020407, %v881_v11  ;;  %v4943_v5 = vmul.f32 0.0051020407, %v741_v63  ;;  %v7651_v54 = vld [vmem:[#allocation80_spill] sm:$0xff] }
 0x1cf   :  { %v1519_v62 = vadd.f32 %v1518_v17, %v1270_v13  ;;  %v1202_v46 = vmul.f32 %v1058_v52, %v1058_v52  ;;  %v1379_v7 = vadd.f32 %v1378_v4, %v1200_v30  ;;  %v1272_v10 = vmul.f32 %v1128_v58, %v1128_v58 }
 0x1d0   :  { %7647 = vst [vmem:[#allocation148_spill] sm:$0xff] %v4943_v5  ;;  %v1130_v26 = vsub.f32 %v7648_v6, %v4941_v12  ;;  %v1131_v51 = vsub.f32 %v7649_v31, %v4941_v12  ;;  %v1060_v27 = vsub.f32 %v7650_v14, %v4943_v5  ;;  %v1061_v60 = vsub.f32 %v7651_v54, %v4943_v5  ;;  %v7654_v54 = vld [vmem:[#allocation79_spill] sm:$0xff] }
 0x1d1   :  { %1520 = vadd.xlane.f32.xlu0 %v1519_v62  ;;  %1516 = vadd.xlane.f32.xlu1 %v1515_v45  ;;  %v885_v40 = vpop.xlane.xlu1 %884  ;;  %v745_v11 = vpop.xlane.xlu0 %744  ;;  %v1382_v52 = vsel %vm661_vm1, %v1203_v32, 0.0  ;;  %v1522_v30 = vsel %vm661_vm1, %v1273_v18, 0.0  ;;  %v7655_v45 = vld [vmem:[#allocation81_spill] sm:$0xff]  ;;  %v7656_v32 = vld [vmem:[#allocation82_spill] sm:$0xff] }
 0x1d2   :  { %v1275_v13 = vmul.f32 %v1131_v51, %v1131_v51  ;;  %v1205_v58 = vmul.f32 %v1061_v60, %v1061_v60  ;;  %v4955_v63 = vmul.f32 0.0051020407, %v885_v40  ;;  %v4957_v17 = vmul.f32 0.0051020407, %v745_v11  ;;  %v7657_v51 = vld [vmem:[#allocation84_spill] sm:$0xff] }
 0x1d3   :  { %v1383_v4 = vadd.f32 %v1382_v52, %v1202_v46  ;;  %v1274_v31 = vmul.f32 %v1130_v26, %v1130_v26  ;;  %v1523_v14 = vadd.f32 %v1522_v30, %v1272_v10  ;;  %v1204_v6 = vmul.f32 %v1060_v27, %v1060_v27 }
 0x1d4   :  { %7652 = vst [vmem:[#allocation149_spill] sm:$0xff] %v4955_v63  ;;  %7653 = vst [vmem:[#allocation150_spill] sm:$0xff] %v4957_v17  ;;  %v1132_v62 = vsub.f32 %v7654_v54, %v4955_v63  ;;  %v1133_v5 = vsub.f32 %v7655_v45, %v4955_v63  ;;  %v1062_v61 = vsub.f32 %v7656_v32, %v4957_v17  ;;  %v1526_v46 = vsel %vm661_vm1, %v1275_v13, 0.0  ;;  %v7662_v13 = vld [vmem:[#allocation86_spill] sm:$0xff] }
 0x1d5   :  { %v1063_v18 = vsub.f32 %v7657_v51, %v4957_v17  ;;  %1384 = vadd.xlane.f32.xlu0 %v1383_v4  ;;  %1380 = vadd.xlane.f32.xlu1 %v1379_v7  ;;  %v889_v60 = vpop.xlane.xlu0 %888  ;;  %v749_v40 = vpop.xlane.xlu1 %748  ;;  %v1386_v27 = vsel %vm661_vm1, %v1205_v58, 0.0  ;;  %v1527_v30 = vadd.f32 %v1526_v46, %v1274_v31  ;;  %v7660_v51 = vld [vmem:[#allocation83_spill] sm:$0xff]  ;;  %v7661_v7 = vld [vmem:[#allocation85_spill] sm:$0xff] }
 0x1d6   :  { %v1277_v10 = vmul.f32 %v1133_v5, %v1133_v5  ;;  %v4969_v11 = vmul.f32 0.0051020407, %v889_v60  ;;  %v4971_v52 = vmul.f32 0.0051020407, %v749_v40  ;;  %v1206_v45 = vmul.f32 %v1062_v61, %v1062_v61  ;;  %v7663_v5 = vld [vmem:[#allocation88_spill] sm:$0xff] }
 0x1d7   :  { %v1207_v26 = vmul.f32 %v1063_v18, %v1063_v18  ;;  %v1387_v54 = vadd.f32 %v1386_v27, %v1204_v6  ;;  %v1276_v32 = vmul.f32 %v1132_v62, %v1132_v62 }
 0x1d8   :  { %7658 = vst [vmem:[#allocation151_spill] sm:$0xff] %v4969_v11  ;;  %7659 = vst [vmem:[#allocation152_spill] sm:$0xff] %v4971_v52  ;;  %v1134_v4 = vsub.f32 %v7660_v51, %v4969_v11  ;;  %v1135_v63 = vsub.f32 %v7661_v7, %v4969_v11  ;;  %v1064_v17 = vsub.f32 %v7662_v13, %v4971_v52  ;;  %v1530_v6 = vsel %vm661_vm1, %v1277_v10, 0.0 }
 0x1d9   :  { %v1065_v58 = vsub.f32 %v7663_v5, %v4971_v52  ;;  %1528 = vadd.xlane.f32.xlu0 %v1527_v30  ;;  %1524 = vadd.xlane.f32.xlu1 %v1523_v14  ;;  %v893_v18 = vpop.xlane.xlu1 %892  ;;  %v753_v60 = vpop.xlane.xlu0 %752  ;;  %v1390_v61 = vsel %vm661_vm1, %v1207_v26, 0.0  ;;  %v1531_v13 = vadd.f32 %v1530_v6, %v1276_v32  ;;  %v7666_v5 = vld [vmem:[#allocation87_spill] sm:$0xff]  ;;  %v7667_v14 = vld [vmem:[#allocation89_spill] sm:$0xff]  ;;  %v7668_v26 = vld [vmem:[#allocation90_spill] sm:$0xff] }
 0x1da   :  { %v1279_v31 = vmul.f32 %v1135_v63, %v1135_v63  ;;  %v4983_v40 = vmul.f32 0.0051020407, %v893_v18  ;;  %v4985_v46 = vmul.f32 0.0051020407, %v753_v60  ;;  %v1391_v27 = vadd.f32 %v1390_v61, %v1206_v45  ;;  %v7669_v63 = vld [vmem:[#allocation92_spill] sm:$0xff] }
 0x1db   :  { %v1209_v62 = vmul.f32 %v1065_v58, %v1065_v58  ;;  %v1278_v7 = vmul.f32 %v1134_v4, %v1134_v4  ;;  %v1208_v51 = vmul.f32 %v1064_v17, %v1064_v17 }
 0x1dc   :  { %7664 = vst [vmem:[#allocation153_spill] sm:$0xff] %v4983_v40  ;;  %7665 = vst [vmem:[#allocation154_spill] sm:$0xff] %v4985_v46  ;;  %v1136_v30 = vsub.f32 %v7666_v5, %v4983_v40  ;;  %v1137_v52 = vsub.f32 %v7667_v14, %v4983_v40  ;;  %v1066_v11 = vsub.f32 %v7668_v26, %v4985_v46  ;;  %v1534_v45 = vsel %vm661_vm1, %v1279_v31, 0.0  ;;  %v7674_v31 = vld [vmem:[#allocation94_spill] sm:$0xff] }
 0x1dd   :  { %v1067_v10 = vsub.f32 %v7669_v63, %v4985_v46  ;;  %1392 = vadd.xlane.f32.xlu0 %v1391_v27  ;;  %1388 = vadd.xlane.f32.xlu1 %v1387_v54  ;;  %v897_v58 = vpop.xlane.xlu0 %896  ;;  %v757_v18 = vpop.xlane.xlu1 %756  ;;  %v1394_v17 = vsel %vm661_vm1, %v1209_v62, 0.0  ;;  %v1535_v6 = vadd.f32 %v1534_v45, %v1278_v7  ;;  %v7672_v63 = vld [vmem:[#allocation91_spill] sm:$0xff]  ;;  %v7673_v54 = vld [vmem:[#allocation93_spill] sm:$0xff] }
 0x1de   :  { %v1281_v32 = vmul.f32 %v1137_v52, %v1137_v52  ;;  %v4997_v60 = vmul.f32 0.0051020407, %v897_v58  ;;  %v4999_v61 = vmul.f32 0.0051020407, %v757_v18  ;;  %v1210_v14 = vmul.f32 %v1066_v11, %v1066_v11  ;;  %v7675_v52 = vld [vmem:[#allocation96_spill] sm:$0xff] }
 0x1df   :  { %v1211_v4 = vmul.f32 %v1067_v10, %v1067_v10  ;;  %v1395_v5 = vadd.f32 %v1394_v17, %v1208_v51  ;;  %v1280_v26 = vmul.f32 %v1136_v30, %v1136_v30 }
 0x1e0   :  { %7670 = vst [vmem:[#allocation155_spill] sm:$0xff] %v4997_v60  ;;  %7671 = vst [vmem:[#allocation156_spill] sm:$0xff] %v4999_v61  ;;  %v1138_v27 = vsub.f32 %v7672_v63, %v4997_v60  ;;  %v1139_v40 = vsub.f32 %v7673_v54, %v4997_v60  ;;  %v1068_v46 = vsub.f32 %v7674_v31, %v4999_v61  ;;  %v1538_v51 = vsel %vm661_vm1, %v1281_v32, 0.0 }
 0x1e1   :  { %v1069_v62 = vsub.f32 %v7675_v52, %v4999_v61  ;;  %1536 = vadd.xlane.f32.xlu0 %v1535_v6  ;;  %1532 = vadd.xlane.f32.xlu1 %v1531_v13  ;;  %v901_v10 = vpop.xlane.xlu1 %900  ;;  %v761_v58 = vpop.xlane.xlu0 %760  ;;  %v1398_v11 = vsel %vm661_vm1, %v1211_v4, 0.0  ;;  %v1539_v31 = vadd.f32 %v1538_v51, %v1280_v26  ;;  %v7678_v52 = vld [vmem:[#allocation95_spill] sm:$0xff]  ;;  %v7679_v13 = vld [vmem:[#allocation97_spill] sm:$0xff]  ;;  %v7680_v4 = vld [vmem:[#allocation98_spill] sm:$0xff] }
 0x1e2   :  { %v1283_v7 = vmul.f32 %v1139_v40, %v1139_v40  ;;  %v5011_v18 = vmul.f32 0.0051020407, %v901_v10  ;;  %v5013_v45 = vmul.f32 0.0051020407, %v761_v58  ;;  %v1399_v17 = vadd.f32 %v1398_v11, %v1210_v14  ;;  %v7681_v40 = vld [vmem:[#allocation100_spill] sm:$0xff] }
 0x1e3   :  { %v1213_v30 = vmul.f32 %v1069_v62, %v1069_v62  ;;  %v1282_v54 = vmul.f32 %v1138_v27, %v1138_v27  ;;  %v1212_v63 = vmul.f32 %v1068_v46, %v1068_v46 }
 0x1e4   :  { %7676 = vst [vmem:[#allocation157_spill] sm:$0xff] %v5011_v18  ;;  %7677 = vst [vmem:[#allocation158_spill] sm:$0xff] %v5013_v45  ;;  %v1140_v6 = vsub.f32 %v7678_v52, %v5011_v18  ;;  %v1141_v61 = vsub.f32 %v7679_v13, %v5011_v18  ;;  %v1070_v60 = vsub.f32 %v7680_v4, %v5013_v45  ;;  %v1542_v14 = vsel %vm661_vm1, %v1283_v7, 0.0  ;;  %v7686_v7 = vld [vmem:[#allocation102_spill] sm:$0xff] }
 0x1e5   :  { %v1071_v32 = vsub.f32 %v7681_v40, %v5013_v45  ;;  %1400 = vadd.xlane.f32.xlu0 %v1399_v17  ;;  %1396 = vadd.xlane.f32.xlu1 %v1395_v5  ;;  %v905_v62 = vpop.xlane.xlu0 %904  ;;  %v765_v10 = vpop.xlane.xlu1 %764  ;;  %v1402_v46 = vsel %vm661_vm1, %v1213_v30, 0.0  ;;  %v1543_v51 = vadd.f32 %v1542_v14, %v1282_v54  ;;  %v7684_v40 = vld [vmem:[#allocation99_spill] sm:$0xff]  ;;  %v7685_v5 = vld [vmem:[#allocation101_spill] sm:$0xff] }
 0x1e6   :  { %v1285_v26 = vmul.f32 %v1141_v61, %v1141_v61  ;;  %v5025_v58 = vmul.f32 0.0051020407, %v905_v62  ;;  %v5027_v11 = vmul.f32 0.0051020407, %v765_v10  ;;  %v1214_v13 = vmul.f32 %v1070_v60, %v1070_v60  ;;  %v7687_v61 = vld [vmem:[#allocation104_spill] sm:$0xff] }
 0x1e7   :  { %v1215_v27 = vmul.f32 %v1071_v32, %v1071_v32  ;;  %v1403_v52 = vadd.f32 %v1402_v46, %v1212_v63  ;;  %v1284_v4 = vmul.f32 %v1140_v6, %v1140_v6 }
 0x1e8   :  { %7682 = vst [vmem:[#allocation159_spill] sm:$0xff] %v5025_v58  ;;  %7683 = vst [vmem:[#allocation160_spill] sm:$0xff] %v5027_v11  ;;  %v1142_v17 = vsub.f32 %v7684_v40, %v5025_v58  ;;  %v1143_v18 = vsub.f32 %v7685_v5, %v5025_v58  ;;  %v1072_v45 = vsub.f32 %v7686_v7, %v5027_v11  ;;  %v1546_v63 = vsel %vm661_vm1, %v1285_v26, 0.0 }
 0x1e9   :  { %v1073_v30 = vsub.f32 %v7687_v61, %v5027_v11  ;;  %1544 = vadd.xlane.f32.xlu0 %v1543_v51  ;;  %1540 = vadd.xlane.f32.xlu1 %v1539_v31  ;;  %v909_v32 = vpop.xlane.xlu1 %908  ;;  %v769_v62 = vpop.xlane.xlu0 %768  ;;  %v1406_v60 = vsel %vm661_vm1, %v1215_v27, 0.0  ;;  %v1547_v7 = vadd.f32 %v1546_v63, %v1284_v4  ;;  %v7690_v61 = vld [vmem:[#allocation103_spill] sm:$0xff]  ;;  %v7691_v31 = vld [vmem:[#allocation105_spill] sm:$0xff]  ;;  %v7692_v27 = vld [vmem:[#allocation106_spill] sm:$0xff] }
 0x1ea   :  { %v1287_v54 = vmul.f32 %v1143_v18, %v1143_v18  ;;  %v5039_v10 = vmul.f32 0.0051020407, %v909_v32  ;;  %v5041_v14 = vmul.f32 0.0051020407, %v769_v62  ;;  %v1407_v46 = vadd.f32 %v1406_v60, %v1214_v13  ;;  %v7693_v18 = vld [vmem:[#allocation108_spill] sm:$0xff] }
 0x1eb   :  { %v1217_v6 = vmul.f32 %v1073_v30, %v1073_v30  ;;  %v1286_v5 = vmul.f32 %v1142_v17, %v1142_v17  ;;  %v1216_v40 = vmul.f32 %v1072_v45, %v1072_v45 }
 0x1ec   :  { %7688 = vst [vmem:[#allocation161_spill] sm:$0xff] %v5039_v10  ;;  %7689 = vst [vmem:[#allocation162_spill] sm:$0xff] %v5041_v14  ;;  %v1144_v51 = vsub.f32 %v7690_v61, %v5039_v10  ;;  %v1145_v11 = vsub.f32 %v7691_v31, %v5039_v10  ;;  %v1074_v58 = vsub.f32 %v7692_v27, %v5041_v14  ;;  %v1550_v13 = vsel %vm661_vm1, %v1287_v54, 0.0  ;;  %v7698_v54 = vld [vmem:[#allocation110_spill] sm:$0xff] }
 0x1ed   :  { %v1075_v26 = vsub.f32 %v7693_v18, %v5041_v14  ;;  %1408 = vadd.xlane.f32.xlu0 %v1407_v46  ;;  %1404 = vadd.xlane.f32.xlu1 %v1403_v52  ;;  %v913_v30 = vpop.xlane.xlu0 %912  ;;  %v773_v32 = vpop.xlane.xlu1 %772  ;;  %v1410_v45 = vsel %vm661_vm1, %v1217_v6, 0.0  ;;  %v1551_v63 = vadd.f32 %v1550_v13, %v1286_v5  ;;  %v7696_v18 = vld [vmem:[#allocation107_spill] sm:$0xff]  ;;  %v7697_v52 = vld [vmem:[#allocation109_spill] sm:$0xff] }
 0x1ee   :  { %v1289_v4 = vmul.f32 %v1145_v11, %v1145_v11  ;;  %v5053_v62 = vmul.f32 0.0051020407, %v913_v30  ;;  %v5055_v60 = vmul.f32 0.0051020407, %v773_v32  ;;  %v1218_v31 = vmul.f32 %v1074_v58, %v1074_v58  ;;  %v7699_v11 = vld [vmem:[#allocation112_spill] sm:$0xff] }
 0x1ef   :  { %v1219_v17 = vmul.f32 %v1075_v26, %v1075_v26  ;;  %v1411_v61 = vadd.f32 %v1410_v45, %v1216_v40  ;;  %v1288_v27 = vmul.f32 %v1144_v51, %v1144_v51 }
 0x1f0   :  { %7694 = vst [vmem:[#allocation163_spill] sm:$0xff] %v5053_v62  ;;  %7695 = vst [vmem:[#allocation164_spill] sm:$0xff] %v5055_v60  ;;  %v1146_v46 = vsub.f32 %v7696_v18, %v5053_v62  ;;  %v1147_v10 = vsub.f32 %v7697_v52, %v5053_v62  ;;  %v1076_v14 = vsub.f32 %v7698_v54, %v5055_v60  ;;  %v1554_v40 = vsel %vm661_vm1, %v1289_v4, 0.0 }
 0x1f1   :  { %v1077_v6 = vsub.f32 %v7699_v11, %v5055_v60  ;;  %1552 = vadd.xlane.f32.xlu0 %v1551_v63  ;;  %1548 = vadd.xlane.f32.xlu1 %v1547_v7  ;;  %v917_v26 = vpop.xlane.xlu1 %916  ;;  %v777_v30 = vpop.xlane.xlu0 %776  ;;  %v1414_v58 = vsel %vm661_vm1, %v1219_v17, 0.0  ;;  %v1555_v54 = vadd.f32 %v1554_v40, %v1288_v27  ;;  %v7702_v11 = vld [vmem:[#allocation111_spill] sm:$0xff]  ;;  %v7703_v7 = vld [vmem:[#allocation113_spill] sm:$0xff]  ;;  %v7704_v17 = vld [vmem:[#allocation114_spill] sm:$0xff] }
 0x1f2   :  { %v1291_v5 = vmul.f32 %v1147_v10, %v1147_v10  ;;  %v5067_v32 = vmul.f32 0.0051020407, %v917_v26  ;;  %v5069_v13 = vmul.f32 0.0051020407, %v777_v30  ;;  %v1415_v45 = vadd.f32 %v1414_v58, %v1218_v31  ;;  %v7705_v10 = vld [vmem:[#allocation116_spill] sm:$0xff] }
 0x1f3   :  { %v1221_v51 = vmul.f32 %v1077_v6, %v1077_v6  ;;  %v1290_v52 = vmul.f32 %v1146_v46, %v1146_v46  ;;  %v1220_v18 = vmul.f32 %v1076_v14, %v1076_v14 }
 0x1f4   :  { %7700 = vst [vmem:[#allocation165_spill] sm:$0xff] %v5067_v32  ;;  %7701 = vst [vmem:[#allocation166_spill] sm:$0xff] %v5069_v13  ;;  %v1148_v63 = vsub.f32 %v7702_v11, %v5067_v32  ;;  %v1149_v60 = vsub.f32 %v7703_v7, %v5067_v32  ;;  %v1078_v62 = vsub.f32 %v7704_v17, %v5069_v13  ;;  %v1558_v31 = vsel %vm661_vm1, %v1291_v5, 0.0  ;;  %v7710_v5 = vld [vmem:[#allocation118_spill] sm:$0xff] }
 0x1f5   :  { %v1079_v4 = vsub.f32 %v7705_v10, %v5069_v13  ;;  %1416 = vadd.xlane.f32.xlu0 %v1415_v45  ;;  %1412 = vadd.xlane.f32.xlu1 %v1411_v61  ;;  %v921_v6 = vpop.xlane.xlu0 %920  ;;  %v781_v26 = vpop.xlane.xlu1 %780  ;;  %v1418_v14 = vsel %vm661_vm1, %v1221_v51, 0.0  ;;  %v1559_v40 = vadd.f32 %v1558_v31, %v1290_v52  ;;  %v7708_v10 = vld [vmem:[#allocation115_spill] sm:$0xff]  ;;  %v7709_v61 = vld [vmem:[#allocation117_spill] sm:$0xff] }
 0x1f6   :  { %v1293_v27 = vmul.f32 %v1149_v60, %v1149_v60  ;;  %v5081_v30 = vmul.f32 0.0051020407, %v921_v6  ;;  %v5083_v58 = vmul.f32 0.0051020407, %v781_v26  ;;  %v1222_v7 = vmul.f32 %v1078_v62, %v1078_v62  ;;  %v7711_v60 = vld [vmem:[#allocation120_spill] sm:$0xff] }
 0x1f7   :  { %v1223_v46 = vmul.f32 %v1079_v4, %v1079_v4  ;;  %v1419_v11 = vadd.f32 %v1418_v14, %v1220_v18  ;;  %v1292_v17 = vmul.f32 %v1148_v63, %v1148_v63 }
 0x1f8   :  { %7706 = vst [vmem:[#allocation167_spill] sm:$0xff] %v5081_v30  ;;  %7707 = vst [vmem:[#allocation168_spill] sm:$0xff] %v5083_v58  ;;  %v1150_v45 = vsub.f32 %v7708_v10, %v5081_v30  ;;  %v1151_v32 = vsub.f32 %v7709_v61, %v5081_v30  ;;  %v1080_v13 = vsub.f32 %v7710_v5, %v5083_v58  ;;  %v1562_v18 = vsel %vm661_vm1, %v1293_v27, 0.0 }
 0x1f9   :  { %v1081_v51 = vsub.f32 %v7711_v60, %v5083_v58  ;;  %1560 = vadd.xlane.f32.xlu0 %v1559_v40  ;;  %1556 = vadd.xlane.f32.xlu1 %v1555_v54  ;;  %v925_v4 = vpop.xlane.xlu1 %924  ;;  %v785_v6 = vpop.xlane.xlu0 %784  ;;  %v1422_v62 = vsel %vm661_vm1, %v1223_v46, 0.0  ;;  %v1563_v10 = vadd.f32 %v1562_v18, %v1292_v17  ;;  %v7714_v60 = vld [vmem:[#allocation119_spill] sm:$0xff]  ;;  %v7715_v54 = vld [vmem:[#allocation121_spill] sm:$0xff]  ;;  %v7716_v46 = vld [vmem:[#allocation122_spill] sm:$0xff] }
 0x1fa   :  { %v1295_v52 = vmul.f32 %v1151_v32, %v1151_v32  ;;  %v5095_v26 = vmul.f32 0.0051020407, %v925_v4  ;;  %v5097_v31 = vmul.f32 0.0051020407, %v785_v6  ;;  %v1423_v14 = vadd.f32 %v1422_v62, %v1222_v7  ;;  %v7717_v32 = vld [vmem:[#allocation124_spill] sm:$0xff] }
 0x1fb   :  { %v1225_v63 = vmul.f32 %v1081_v51, %v1081_v51  ;;  %v1294_v61 = vmul.f32 %v1150_v45, %v1150_v45  ;;  %v1224_v5 = vmul.f32 %v1080_v13, %v1080_v13 }
 0x1fc   :  { %7712 = vst [vmem:[#allocation169_spill] sm:$0xff] %v5095_v26  ;;  %7713 = vst [vmem:[#allocation170_spill] sm:$0xff] %v5097_v31  ;;  %v1152_v40 = vsub.f32 %v7714_v60, %v5095_v26  ;;  %v1153_v58 = vsub.f32 %v7715_v54, %v5095_v26  ;;  %v1082_v30 = vsub.f32 %v7716_v46, %v5097_v31  ;;  %v1566_v7 = vsel %vm661_vm1, %v1295_v52, 0.0  ;;  %v7722_v52 = vld [vmem:[#allocation126_spill] sm:$0xff] }
 0x1fd   :  { %v1083_v27 = vsub.f32 %v7717_v32, %v5097_v31  ;;  %1424 = vadd.xlane.f32.xlu0 %v1423_v14  ;;  %1420 = vadd.xlane.f32.xlu1 %v1419_v11  ;;  %v929_v51 = vpop.xlane.xlu0 %928  ;;  %v789_v4 = vpop.xlane.xlu1 %788  ;;  %v1426_v13 = vsel %vm661_vm1, %v1225_v63, 0.0  ;;  %v1567_v18 = vadd.f32 %v1566_v7, %v1294_v61  ;;  %v7720_v32 = vld [vmem:[#allocation123_spill] sm:$0xff]  ;;  %v7721_v11 = vld [vmem:[#allocation125_spill] sm:$0xff] }
 0x1fe   :  { %v1297_v17 = vmul.f32 %v1153_v58, %v1153_v58  ;;  %v5109_v6 = vmul.f32 0.0051020407, %v929_v51  ;;  %v5111_v62 = vmul.f32 0.0051020407, %v789_v4  ;;  %v1226_v54 = vmul.f32 %v1082_v30, %v1082_v30  ;;  %v7723_v58 = vld [vmem:[#allocation128_spill] sm:$0xff] }
 0x1ff   :  { %v1227_v45 = vmul.f32 %v1083_v27, %v1083_v27  ;;  %v1427_v46 = vadd.f32 %v1426_v13, %v1224_v5  ;;  %v1296_v60 = vmul.f32 %v1152_v40, %v1152_v40 }
 0x200   :  { %7718 = vst [vmem:[#allocation171_spill] sm:$0xff] %v5109_v6  ;;  %7719 = vst [vmem:[#allocation172_spill] sm:$0xff] %v5111_v62  ;;  %v1154_v14 = vsub.f32 %v7720_v32, %v5109_v6  ;;  %v1155_v31 = vsub.f32 %v7721_v11, %v5109_v6  ;;  %v1084_v26 = vsub.f32 %v7722_v52, %v5111_v62  ;;  %v1570_v61 = vsel %vm661_vm1, %v1297_v17, 0.0 }
 0x201   :  { %v1085_v63 = vsub.f32 %v7723_v58, %v5111_v62  ;;  %1568 = vadd.xlane.f32.xlu0 %v1567_v18  ;;  %1564 = vadd.xlane.f32.xlu1 %v1563_v10  ;;  %v933_v27 = vpop.xlane.xlu1 %932  ;;  %v793_v51 = vpop.xlane.xlu0 %792  ;;  %v1430_v30 = vsel %vm661_vm1, %v1227_v45, 0.0  ;;  %v1571_v32 = vadd.f32 %v1570_v61, %v1296_v60  ;;  %v7726_v58 = vld [vmem:[#allocation127_spill] sm:$0xff]  ;;  %v7727_v10 = vld [vmem:[#allocation129_spill] sm:$0xff]  ;;  %v7728_v45 = vld [vmem:[#allocation130_spill] sm:$0xff] }
 0x202   :  { %v1299_v5 = vmul.f32 %v1155_v31, %v1155_v31  ;;  %v5123_v4 = vmul.f32 0.0051020407, %v933_v27  ;;  %v5125_v7 = vmul.f32 0.0051020407, %v793_v51  ;;  %v1431_v13 = vadd.f32 %v1430_v30, %v1226_v54  ;;  %v7729_v31 = vld [vmem:[#allocation132_spill] sm:$0xff] }
 0x203   :  { %v1229_v40 = vmul.f32 %v1085_v63, %v1085_v63  ;;  %v1298_v11 = vmul.f32 %v1154_v14, %v1154_v14  ;;  %v1228_v52 = vmul.f32 %v1084_v26, %v1084_v26 }
 0x204   :  { %7724 = vst [vmem:[#allocation173_spill] sm:$0xff] %v5123_v4  ;;  %7725 = vst [vmem:[#allocation174_spill] sm:$0xff] %v5125_v7  ;;  %v1156_v18 = vsub.f32 %v7726_v58, %v5123_v4  ;;  %v1157_v62 = vsub.f32 %v7727_v10, %v5123_v4  ;;  %v1086_v6 = vsub.f32 %v7728_v45, %v5125_v7  ;;  %v1574_v54 = vsel %vm661_vm1, %v1299_v5, 0.0  ;;  %v7734_v5 = vld [vmem:[#allocation134_spill] sm:$0xff] }
 0x205   :  { %v1087_v17 = vsub.f32 %v7729_v31, %v5125_v7  ;;  %1432 = vadd.xlane.f32.xlu0 %v1431_v13  ;;  %1428 = vadd.xlane.f32.xlu1 %v1427_v46  ;;  %v937_v63 = vpop.xlane.xlu0 %936  ;;  %v797_v27 = vpop.xlane.xlu1 %796  ;;  %v1434_v60 = vsel %vm661_vm1, %v1229_v40, 0.0  ;;  %v1575_v61 = vadd.f32 %v1574_v54, %v1298_v11  ;;  %v7732_v31 = vld [vmem:[#allocation131_spill] sm:$0xff]  ;;  %v7733_v46 = vld [vmem:[#allocation133_spill] sm:$0xff] }
 0x206   :  { %v1301_v26 = vmul.f32 %v1157_v62, %v1157_v62  ;;  %v5137_v51 = vmul.f32 0.0051020407, %v937_v63  ;;  %v5139_v30 = vmul.f32 0.0051020407, %v797_v27  ;;  %v1230_v10 = vmul.f32 %v1086_v6, %v1086_v6  ;;  %v7735_v62 = vld [vmem:[#allocation136_spill] sm:$0xff] }
 0x207   :  { %v1231_v14 = vmul.f32 %v1087_v17, %v1087_v17  ;;  %v1435_v45 = vadd.f32 %v1434_v60, %v1228_v52  ;;  %v1300_v58 = vmul.f32 %v1156_v18, %v1156_v18 }
 0x208   :  { %7730 = vst [vmem:[#allocation175_spill] sm:$0xff] %v5137_v51  ;;  %7731 = vst [vmem:[#allocation176_spill] sm:$0xff] %v5139_v30  ;;  %v1158_v13 = vsub.f32 %v7732_v31, %v5137_v51  ;;  %v1159_v4 = vsub.f32 %v7733_v46, %v5137_v51  ;;  %v1088_v7 = vsub.f32 %v7734_v5, %v5139_v30  ;;  %v1578_v11 = vsel %vm661_vm1, %v1301_v26, 0.0 }
 0x209   :  { %v1089_v40 = vsub.f32 %v7735_v62, %v5139_v30  ;;  %1576 = vadd.xlane.f32.xlu0 %v1575_v61  ;;  %1572 = vadd.xlane.f32.xlu1 %v1571_v32  ;;  %v941_v17 = vpop.xlane.xlu1 %940  ;;  %v801_v63 = vpop.xlane.xlu0 %800  ;;  %v1438_v6 = vsel %vm661_vm1, %v1231_v14, 0.0  ;;  %v1579_v31 = vadd.f32 %v1578_v11, %v1300_v58  ;;  %v7736_v62 = vld [vmem:[#allocation135_spill] sm:$0xff]  ;;  %v7737_v32 = vld [vmem:[#allocation137_spill] sm:$0xff]  ;;  %v7738_v14 = vld [vmem:[#allocation138_spill] sm:$0xff] }
 0x20a   :  { %v1303_v52 = vmul.f32 %v1159_v4, %v1159_v4  ;;  %v5151_v27 = vmul.f32 0.0051020407, %v941_v17  ;;  %v5153_v54 = vmul.f32 0.0051020407, %v801_v63  ;;  %v1439_v60 = vadd.f32 %v1438_v6, %v1230_v10  ;;  %v7739_v4 = vld [vmem:[#allocation140_spill] sm:$0xff] }
 0x20b   :  { %v1233_v18 = vmul.f32 %v1089_v40, %v1089_v40  ;;  %v1302_v46 = vmul.f32 %v1158_v13, %v1158_v13  ;;  %v1232_v5 = vmul.f32 %v1088_v7, %v1088_v7 }
 0x20c   :  { %v1160_v61 = vsub.f32 %v7736_v62, %v5151_v27  ;;  %v1161_v30 = vsub.f32 %v7737_v32, %v5151_v27  ;;  %v1090_v51 = vsub.f32 %v7738_v14, %v5153_v54  ;;  %v1091_v26 = vsub.f32 %v7739_v4, %v5153_v54 }
 0x20d   :  { %1440 = vadd.xlane.f32.xlu0 %v1439_v60  ;;  %1436 = vadd.xlane.f32.xlu1 %v1435_v45  ;;  %v945_v40 = vpop.xlane.xlu0 %944  ;;  %v805_v17 = vpop.xlane.xlu1 %804  ;;  %v1582_v10 = vsel %vm661_vm1, %v1303_v52, 0.0  ;;  %v1442_v58 = vsel %vm661_vm1, %v1233_v18, 0.0  ;;  %v7740_v45 = vld [vmem:[#allocation141_spill] sm:$0xff] }
 0x20e   :  { %v1305_v7 = vmul.f32 %v1161_v30, %v1161_v30  ;;  %v1235_v13 = vmul.f32 %v1091_v26, %v1091_v26  ;;  %v5165_v63 = vmul.f32 0.0051020407, %v945_v40  ;;  %v5167_v6 = vmul.f32 0.0051020407, %v805_v17  ;;  %v7741_v30 = vld [vmem:[#allocation144_spill] sm:$0xff] }
 0x20f   :  { %v1583_v11 = vadd.f32 %v1582_v10, %v1302_v46  ;;  %v1234_v32 = vmul.f32 %v1090_v51, %v1090_v51  ;;  %v1443_v14 = vadd.f32 %v1442_v58, %v1232_v5  ;;  %v1304_v62 = vmul.f32 %v1160_v61, %v1160_v61 }
 0x210   :  { %v1162_v60 = vsub.f32 %v4658_v2, %v5165_v63  ;;  %v1163_v4 = vsub.f32 %v7740_v45, %v5165_v63  ;;  %v1092_v52 = vsub.f32 %v4664_v1, %v5167_v6  ;;  %v1093_v18 = vsub.f32 %v7741_v30, %v5167_v6  ;;  %v7742_v2 = vld [vmem:[#allocation143_spill] sm:$0xff]  ;;  %v7743_v30 = vld [vmem:[#allocation145_spill] sm:$0xff] }
 0x211   :  { %1584 = vadd.xlane.f32.xlu0 %v1583_v11  ;;  %1580 = vadd.xlane.f32.xlu1 %v1579_v31  ;;  %v949_v26 = vpop.xlane.xlu1 %948  ;;  %v1446_v46 = vsel %vm661_vm1, %v1235_v13, 0.0  ;;  %v1586_v51 = vsel %vm661_vm1, %v1305_v7, 0.0 }
 0x212   :  { %v1307_v5 = vmul.f32 %v1163_v4, %v1163_v4  ;;  %v1237_v61 = vmul.f32 %v1093_v18, %v1093_v18  ;;  %v5179_v40 = vmul.f32 0.0051020407, %v949_v26  ;;  %v1447_v17 = vadd.f32 %v1446_v46, %v1234_v32 }
 0x213   :  { %v1306_v10 = vmul.f32 %v1162_v60, %v1162_v60  ;;  %v1587_v58 = vadd.f32 %v1586_v51, %v1304_v62  ;;  %v1236_v45 = vmul.f32 %v1092_v52, %v1092_v52 }
 0x214   :  { %v1164_v1 = vsub.f32 %v7742_v2, %v5179_v40  ;;  %v1165_v11 = vsub.f32 %v7743_v30, %v5179_v40  ;;  %v1590_v31 = vsel %vm661_vm1, %v1307_v5, 0.0  ;;  %v1450_v13 = vsel %vm661_vm1, %v1237_v61, 0.0 }
 0x215   :  { %1448 = vadd.xlane.f32.xlu0 %v1447_v17  ;;  %1444 = vadd.xlane.f32.xlu1 %v1443_v14  ;;  %v1591_v4 = vadd.f32 %v1590_v31, %v1306_v10  ;;  %v1451_v7 = vadd.f32 %v1450_v13, %v1236_v45 }
 0x216   :  { %v1309_v18 = vmul.f32 %v1165_v11, %v1165_v11  ;;  %v1308_v26 = vmul.f32 %v1164_v1, %v1164_v1 }
 0x218   :  { %v1313_v32 = vpop.xlane.xlu0 %1312  ;;  %v1594_v62 = vsel %vm661_vm1, %v1309_v18, 0.0 }
 0x219   :  { %1592 = vadd.xlane.f32.xlu0 %v1591_v4  ;;  %1588 = vadd.xlane.f32.xlu1 %v1587_v58  ;;  %v1598_v60 = vmul.f32 0.0051020407, %v1313_v32  ;;  %v1595_v52 = vadd.f32 %v1594_v62, %v1308_v26 }
 0x21b   :  { %v1742_v46 = vadd.f32 1e-05, %v1598_v60 }
 0x21c   :  { %v1457_v51 = vpop.xlane.xlu0 %1456 }
 0x21d   :  { %1452 = vadd.xlane.f32.xlu1 %v1451_v7  ;;  %v1634_v30 = vmul.f32 0.0051020407, %v1457_v51  ;;  %3613 = vrsqrt.f32 %v1742_v46  ;;  %v1706_v51 = vld [vmem:[%s7135_s2 + $0x120] sm:$0xff] }
 0x21f   :  { %v1778_v5 = vadd.f32 1e-05, %v1634_v30  ;;  %v1670_v30 = vld [vmem:[%s7135_s2] sm:$0xff] }
 0x220   :  { %v1321_v61 = vpop.xlane.xlu0 %1320 }
 0x221   :  { %1596 = vadd.xlane.f32.xlu1 %v1595_v52  ;;  %v1317_v14 = vpop.xlane.xlu1 %1316  ;;  %3615 = vrsqrt.f32 %v1778_v5  ;;  %v1600_v7 = vmul.f32 0.0051020407, %v1321_v61 }
 0x222   :  { %v1599_v17 = vmul.f32 0.0051020407, %v1317_v14 }
 0x223   :  { %v1744_v5 = vadd.f32 1e-05, %v1600_v7 }
 0x224   :  { %v1743_v45 = vadd.f32 1e-05, %v1599_v17 }
 0x225   :  { %v1465_v1 = vpop.xlane.xlu0 %1464  ;;  %v1461_v10 = vpop.xlane.xlu1 %1460 }
 0x226   :  { %v1636_v11 = vmul.f32 0.0051020407, %v1465_v1  ;;  %v1635_v31 = vmul.f32 0.0051020407, %v1461_v10  ;;  %3617 = vrsqrt.f32 %v1743_v45 }
 0x227   :  { %v3614_v26 = vpop.eup %3613 }
 0x228   :  { %v1780_v58 = vadd.f32 1e-05, %v1636_v11  ;;  %v1779_v13 = vadd.f32 1e-05, %v1635_v31  ;;  %v1886_v46 = vmul.f32 %v3614_v26, %v1670_v30  ;;  %v7744_v31 = vld [vmem:[#allocation146_spill] sm:$0xff] }
 0x229   :  { %v1329_v4 = vpop.xlane.xlu0 %1328  ;;  %v1325_v18 = vpop.xlane.xlu1 %1324 }
 0x22a   :  { %3619 = vrsqrt.f32 %v1779_v13  ;;  %v1601_v32 = vmul.f32 0.0051020407, %v1325_v18  ;;  %v1602_v14 = vmul.f32 0.0051020407, %v1329_v4  ;;  %v1671_v13 = vld [vmem:[%s7135_s2 + $0x8] sm:$0xff] }
 0x22b   :  { %3621 = vrsqrt.f32 %v1780_v58  ;;  %v3616_v62 = vpop.eup %3615  ;;  %v1958_v58 = vmul.f32 %v1886_v46, %v7744_v31 }
 0x22c   :  { %v1745_v17 = vadd.f32 1e-05, %v1601_v32  ;;  %v1922_v1 = vmul.f32 %v3616_v62, %v1706_v51  ;;  %3623 = vrsqrt.f32 %v1744_v5  ;;  %v1746_v18 = vadd.f32 1e-05, %v1602_v14  ;;  %v1708_v5 = vld [vmem:[%s7135_s2 + $0x130] sm:$0xff] }
 0x22d   :  { %v1473_v60 = vpop.xlane.xlu0 %1472  ;;  %v1469_v52 = vpop.xlane.xlu1 %1468 }
 0x22e   :  { %v1637_v45 = vmul.f32 0.0051020407, %v1469_v52  ;;  %3625 = vrsqrt.f32 %v1745_v17  ;;  %v1638_v4 = vmul.f32 0.0051020407, %v1473_v60  ;;  %v1994_v52 = vmul.f32 %v1922_v1, %v4692_v49 }
 0x22f   :  { %2392 = vperm.xlu0 %3597, %v1886_v46   ;;  %v1707_v46 = vld [vmem:[%s7135_s2 + $0x128] sm:$0xff]  ;;  %3627 = vrsqrt.f32 %v1746_v18 }
 0x230   :  { %v3618_v10 = vpop.eup %3617  ;;  %v1781_v26 = vadd.f32 1e-05, %v1637_v45  ;;  %v1782_v60 = vadd.f32 1e-05, %v1638_v4 }
 0x231   :  { %v1337_v11 = vpop.xlane.xlu0 %1336  ;;  %v1333_v61 = vpop.xlane.xlu1 %1332  ;;  %v1887_v30 = vmul.f32 %v3618_v10, %v1671_v13 }
 0x232   :  { %2572 = vperm.xlu1 %3598, %v1922_v1   ;;  %3629 = vrsqrt.f32 %v1781_v26  ;;  %v1603_v10 = vmul.f32 0.0051020407, %v1333_v61  ;;  %v1604_v61 = vmul.f32 0.0051020407, %v1337_v11  ;;  %v1674_v11 = vld [vmem:[%s7135_s2 + $0x20] sm:$0xff] }
 0x233   :  { %2102 = vrot.lane.b32.xlu0 %v1958_v58, %s3796_s14  ;;  %v1959_v14 = vmul.f32 %v1887_v30, %v4703_v42  ;;  %3631 = vrsqrt.f32 %v1782_v60  ;;  %v1672_v42 = vld [vmem:[%s7135_s2 + $0x10] sm:$0xff] }
 0x234   :  { %v3620_v7 = vpop.eup %3619 }
 0x235   :  { %v1481_v32 = vpop.xlane.xlu0 %1480  ;;  %v1477_v62 = vpop.xlane.xlu1 %1476  ;;  %v1923_v17 = vmul.f32 %v3620_v7, %v1707_v46 }
 0x236   :  { %v3622_v51 = vpop.eup %3621  ;;  %2397 = vperm.xlu1 %3598, %v1887_v30   ;;  %v1673_v30 = vld [vmem:[%s7135_s2 + $0x18] sm:$0xff]  ;;  %v1639_v7 = vmul.f32 0.0051020407, %v1477_v62  ;;  %v1640_v62 = vmul.f32 0.0051020407, %v1481_v32 }
 0x237   :  { %2174 = vrot.lane.b32.xlu0 %v1994_v52, %s3796_s14  ;;  %v1924_v1 = vmul.f32 %v3622_v51, %v1708_v5  ;;  %v1995_v31 = vmul.f32 %v1923_v17, %v4686_v47  ;;  %v3624_v58 = vpop.eup %3623  ;;  %v1747_v47 = vadd.f32 1e-05, %v1603_v10 }
 0x238   :  { %v3626_v26 = vpop.eup %3625  ;;  %v1888_v52 = vmul.f32 %v3624_v58, %v1672_v42  ;;  %v1783_v10 = vadd.f32 1e-05, %v1639_v7  ;;  %v1784_v2 = vadd.f32 1e-05, %v1640_v62 }
 0x239   :  { %v1345_v45 = vpop.xlane.xlu0 %1344  ;;  %v1341_v49 = vpop.xlane.xlu1 %1340  ;;  %v1996_v4 = vmul.f32 %v1924_v1, %v4717_v50  ;;  %v1889_v5 = vmul.f32 %v3626_v26, %v1673_v30  ;;  %3633 = vrsqrt.f32 %v1747_v47  ;;  %v1710_v30 = vld [vmem:[%s7135_s2 + $0x140] sm:$0xff] }
 0x23a   :  { %2104 = vrot.lane.b32.xlu1 %v1959_v14, %s3796_s14  ;;  %v3628_v46 = vpop.eup %3627  ;;  %v1709_v14 = vld [vmem:[%s7135_s2 + $0x138] sm:$0xff] }
 0x23b   :  { %2577 = vperm.xlu0 %3597, %v1923_v17   ;;  %v1748_v17 = vadd.f32 1e-05, %v1604_v61  ;;  %v1890_v42 = vmul.f32 %v3628_v46, %v1674_v11  ;;  %v1960_v61 = vmul.f32 %v1888_v52, %v4705_v25 }
 0x23c   :  { %v3630_v60 = vpop.eup %3629 }
 0x23d   :  { %v5210_v13 = vpop.xlane.xlu0 %1488  ;;  %v1485_v18 = vpop.xlane.xlu1 %1484  ;;  %3635 = vrsqrt.f32 %v1748_v17  ;;  %v1962_v47 = vmul.f32 %v1890_v42, %v4733_v16  ;;  %v1675_v16 = vld [vmem:[%s7135_s2 + $0x28] sm:$0xff] }
 0x23e   :  { %2176 = vrot.lane.b32.xlu1 %v1995_v31, %s3796_s14  ;;  %v3632_v26 = vpop.eup %3631  ;;  %3637 = vrsqrt.f32 %v1783_v10 }
 0x23f   :  { %2178 = vrot.lane.b32.xlu0 %v1996_v4, %s3796_s14  ;;  %v1925_v4 = vmul.f32 %v3630_v60, %v1709_v14  ;;  %v1926_v7 = vmul.f32 %v3632_v26, %v1710_v30  ;;  %3639 = vrsqrt.f32 %v1784_v2  ;;  %v1961_v60 = vmul.f32 %v1889_v5, %v4719_v15  ;;  %v1711_v30 = vld [vmem:[%s7135_s2 + $0x148] sm:$0xff] }
 0x241   :  { %v5221_v51 = vpop.xlane.xlu0 %1352  ;;  %v5223_v50 = vpop.xlane.xlu1 %1348  ;;  %v1998_v14 = vmul.f32 %v1926_v7, %v4745_v28  ;;  %v1997_v15 = vmul.f32 %v1925_v4, %v4731_v9  ;;  %v1642_v9 = vmul.f32 0.0051020407, %v5210_v13 }
 0x242   :  { %2402 = vperm.xlu1 %3598, %v1888_v52   ;;  %v1606_v52 = vmul.f32 0.0051020407, %v1345_v45  ;;  %v1676_v45 = vld [vmem:[%s7135_s2 + $0x30] sm:$0xff] }
 0x243   :  { %2407 = vperm.xlu0 %3597, %v1889_v5   ;;  %v3634_v11 = vpop.eup %3633 }
 0x244   :  { %v1891_v28 = vmul.f32 %v3634_v11, %v1675_v16  ;;  %v1712_v11 = vld [vmem:[%s7135_s2 + $0x150] sm:$0xff]  ;;  %v1786_v16 = vadd.f32 1e-05, %v1642_v9 }
 0x245   :  { %v5231_v31 = vpop.xlane.xlu0 %1496  ;;  %v5233_v58 = vpop.xlane.xlu1 %1492 }
 0x246   :  { %2582 = vperm.xlu1 %3598, %v1924_v1   ;;  %v1605_v1 = vmul.f32 0.0051020407, %v1341_v49  ;;  %v1641_v49 = vmul.f32 0.0051020407, %v1485_v18  ;;  %v1750_v18 = vadd.f32 1e-05, %v1606_v52 }
 0x247   :  { %2587 = vperm.xlu0 %3597, %v1925_v4   ;;  %v3636_v5 = vpop.eup %3635 }
 0x248   :  { %v1749_v2 = vadd.f32 1e-05, %v1605_v1  ;;  %v3638_v62 = vpop.eup %3637  ;;  %v1785_v4 = vadd.f32 1e-05, %v1641_v49 }
 0x249   :  { %v5239_v32 = vpop.xlane.xlu0 %1360  ;;  %v3640_v1 = vpop.eup %3639 }
 0x24a   :  { %2106 = vrot.lane.b32.xlu1 %v1960_v61, %s3796_s14  ;;  %v5243_v46 = vpop.xlane.xlu1 %1356  ;;  %3641 = vrsqrt.f32 %v1749_v2  ;;  %v1927_v61 = vmul.f32 %v3638_v62, %v1711_v30  ;;  %v1928_v13 = vmul.f32 %v3640_v1, %v1712_v11  ;;  %v1678_v11 = vld [vmem:[%s7135_s2 + $0x40] sm:$0xff] }
 0x24b   :  { %2110 = vrot.lane.b32.xlu0 %v1962_v47, %s3796_s14  ;;  %v1892_v47 = vmul.f32 %v3636_v5, %v1676_v45  ;;  %3643 = vrsqrt.f32 %v1750_v18  ;;  %v1608_v45 = vmul.f32 0.0051020407, %v5221_v51  ;;  %v1713_v51 = vld [vmem:[%s7135_s2 + $0x158] sm:$0xff] }
 0x24c   :  { %3645 = vrsqrt.f32 %v1785_v4  ;;  %v2000_v5 = vmul.f32 %v1928_v13, %v4773_v56  ;;  %v1999_v56 = vmul.f32 %v1927_v61, %v4759_v35  ;;  %v1644_v35 = vmul.f32 0.0051020407, %v5231_v31 }
 0x24d   :  { %v1964_v52 = vmul.f32 %v1892_v47, %v4761_v3  ;;  %3647 = vrsqrt.f32 %v1786_v16 }
 0x24e   :  { %v5248_v17 = vpop.xlane.xlu0 %1504  ;;  %2108 = vrot.lane.b32.xlu1 %v1961_v60, %s3796_s14  ;;  %v5251_v25 = vpop.xlane.xlu1 %1500 }
 0x24f   :  { %2182 = vrot.lane.b32.xlu0 %v1998_v14, %s3796_s14 }
 0x252   :  { %v5258_v10 = vpop.xlane.xlu0 %1368  ;;  %2180 = vrot.lane.b32.xlu1 %v1997_v15, %s3796_s14  ;;  %v5261_v26 = vpop.xlane.xlu1 %1364  ;;  %v1963_v15 = vmul.f32 %v1891_v28, %v4747_v48  ;;  %v1643_v48 = vmul.f32 0.0051020407, %v5233_v58  ;;  %v1752_v58 = vadd.f32 1e-05, %v1608_v45 }
 0x253   :  { %2417 = vperm.xlu0 %3597, %v1891_v28  }
 0x254   :  { %v3642_v62 = vpop.eup %3641 }
 0x255   :  { %v3644_v28 = vpop.eup %3643 }
 0x256   :  { %v5270_v60 = vpop.xlane.xlu0 %1512  ;;  %2412 = vperm.xlu1 %3598, %v1890_v42   ;;  %v5272_v14 = vpop.xlane.xlu1 %1508  ;;  %v1607_v42 = vmul.f32 0.0051020407, %v5223_v50 }
 0x257   :  { %2597 = vperm.xlu0 %3597, %v1927_v61   ;;  %v3646_v9 = vpop.eup %3645  ;;  %v1787_v61 = vadd.f32 1e-05, %v1643_v48 }
 0x258   :  { %v1751_v50 = vadd.f32 1e-05, %v1607_v42  ;;  %v1929_v16 = vmul.f32 %v3646_v9, %v1713_v51  ;;  %v3648_v42 = vpop.eup %3647 }
 0x25a   :  { %v5278_v2 = vpop.xlane.xlu0 %1376  ;;  %2592 = vperm.xlu1 %3598, %v1926_v7   ;;  %v5280_v49 = vpop.xlane.xlu1 %1372  ;;  %v1677_v7 = vld [vmem:[%s7135_s2 + $0x38] sm:$0xff]  ;;  %3649 = vrsqrt.f32 %v1751_v50 }
 0x25b   :  { %2114 = vrot.lane.b32.xlu0 %v1964_v52, %s3796_s14  ;;  %v1893_v18 = vmul.f32 %v3642_v62, %v1677_v7  ;;  %v1894_v52 = vmul.f32 %v3644_v28, %v1678_v11  ;;  %v1714_v62 = vld [vmem:[%s7135_s2 + $0x160] sm:$0xff]  ;;  %3651 = vrsqrt.f32 %v1752_v58  ;;  %v1788_v7 = vadd.f32 1e-05, %v1644_v35 }
 0x25c   :  { %3653 = vrsqrt.f32 %v1787_v61  ;;  %v1930_v31 = vmul.f32 %v3648_v42, %v1714_v62  ;;  %v1610_v11 = vmul.f32 0.0051020407, %v5239_v32  ;;  %v1715_v32 = vld [vmem:[%s7135_s2 + $0x168] sm:$0xff]  ;;  %v1680_v62 = vld [vmem:[%s7135_s2 + $0x50] sm:$0xff] }
 0x25d   :  { %v1966_v45 = vmul.f32 %v1894_v52, %v4789_v24  ;;  %3655 = vrsqrt.f32 %v1788_v7 }
 0x25e   :  { %v5286_v30 = vpop.xlane.xlu0 %1520  ;;  %2112 = vrot.lane.b32.xlu1 %v1963_v15, %s3796_s14  ;;  %v5289_v3 = vpop.xlane.xlu1 %1516  ;;  %v2002_v28 = vmul.f32 %v1930_v31, %v4801_v41  ;;  %v2001_v41 = vmul.f32 %v1929_v16, %v4787_v53  ;;  %v1646_v53 = vmul.f32 0.0051020407, %v5248_v17 }
 0x25f   :  { %2186 = vrot.lane.b32.xlu0 %v2000_v5, %s3796_s14 }
 0x262   :  { %v5298_v4 = vpop.xlane.xlu0 %1384  ;;  %2184 = vrot.lane.b32.xlu1 %v1999_v56, %s3796_s14  ;;  %v5301_v1 = vpop.xlane.xlu1 %1380  ;;  %v1965_v56 = vmul.f32 %v1893_v18, %v4775_v19  ;;  %v1645_v19 = vmul.f32 0.0051020407, %v5251_v25  ;;  %v1754_v25 = vadd.f32 1e-05, %v1610_v11 }
 0x263   :  { %2427 = vperm.xlu0 %3597, %v1893_v18  }
 0x264   :  { %v3650_v9 = vpop.eup %3649 }
 0x265   :  { %v3652_v18 = vpop.eup %3651 }
 0x266   :  { %v5310_v15 = vpop.xlane.xlu0 %1528  ;;  %2422 = vperm.xlu1 %3598, %v1892_v47   ;;  %v5312_v5 = vpop.xlane.xlu1 %1524  ;;  %v1609_v47 = vmul.f32 0.0051020407, %v5243_v46 }
 0x267   :  { %2607 = vperm.xlu0 %3597, %v1929_v16   ;;  %v3654_v35 = vpop.eup %3653  ;;  %v1789_v16 = vadd.f32 1e-05, %v1645_v19 }
 0x268   :  { %v1753_v46 = vadd.f32 1e-05, %v1609_v47  ;;  %v1931_v7 = vmul.f32 %v3654_v35, %v1715_v32  ;;  %v3656_v47 = vpop.eup %3655 }
 0x26a   :  { %v5318_v50 = vpop.xlane.xlu0 %1392  ;;  %2602 = vperm.xlu1 %3598, %v1928_v13   ;;  %v5320_v48 = vpop.xlane.xlu1 %1388  ;;  %v1679_v13 = vld [vmem:[%s7135_s2 + $0x48] sm:$0xff]  ;;  %3657 = vrsqrt.f32 %v1753_v46 }
 0x26b   :  { %2118 = vrot.lane.b32.xlu0 %v1966_v45, %s3796_s14  ;;  %v1895_v58 = vmul.f32 %v3650_v9, %v1679_v13  ;;  %v1896_v45 = vmul.f32 %v3652_v18, %v1680_v62  ;;  %v1716_v9 = vld [vmem:[%s7135_s2 + $0x170] sm:$0xff]  ;;  %3659 = vrsqrt.f32 %v1754_v25  ;;  %v1790_v13 = vadd.f32 1e-05, %v1646_v53 }
 0x26c   :  { %3661 = vrsqrt.f32 %v1789_v16  ;;  %v1932_v17 = vmul.f32 %v3656_v47, %v1716_v9  ;;  %v1612_v62 = vmul.f32 0.0051020407, %v5258_v10  ;;  %v1717_v10 = vld [vmem:[%s7135_s2 + $0x178] sm:$0xff]  ;;  %v1682_v9 = vld [vmem:[%s7135_s2 + $0x60] sm:$0xff] }
 0x26d   :  { %v1968_v11 = vmul.f32 %v1896_v45, %v4817_v43  ;;  %3663 = vrsqrt.f32 %v1790_v13 }
 0x26e   :  { %v5326_v51 = vpop.xlane.xlu0 %1536  ;;  %2116 = vrot.lane.b32.xlu1 %v1965_v56, %s3796_s14  ;;  %v5329_v24 = vpop.xlane.xlu1 %1532  ;;  %v2004_v18 = vmul.f32 %v1932_v17, %v4829_v57  ;;  %v2003_v57 = vmul.f32 %v1931_v7, %v4815_v55  ;;  %v1648_v55 = vmul.f32 0.0051020407, %v5270_v60 }
 0x26f   :  { %2190 = vrot.lane.b32.xlu0 %v2002_v28, %s3796_s14 }
 0x272   :  { %v5338_v61 = vpop.xlane.xlu0 %1400  ;;  %2188 = vrot.lane.b32.xlu1 %v2001_v41, %s3796_s14  ;;  %v5341_v42 = vpop.xlane.xlu1 %1396  ;;  %v1967_v41 = vmul.f32 %v1895_v58, %v4803_v38  ;;  %v1647_v38 = vmul.f32 0.0051020407, %v5272_v14  ;;  %v1756_v14 = vadd.f32 1e-05, %v1612_v62 }
 0x273   :  { %2437 = vperm.xlu0 %3597, %v1895_v58  }
 0x274   :  { %v3658_v35 = vpop.eup %3657 }
 0x275   :  { %v3660_v58 = vpop.eup %3659 }
 0x276   :  { %v5350_v56 = vpop.xlane.xlu0 %1544  ;;  %2432 = vperm.xlu1 %3598, %v1894_v52   ;;  %v5352_v28 = vpop.xlane.xlu1 %1540  ;;  %v1611_v52 = vmul.f32 0.0051020407, %v5261_v26 }
 0x277   :  { %2617 = vperm.xlu0 %3597, %v1931_v7   ;;  %v3662_v53 = vpop.eup %3661  ;;  %v1791_v7 = vadd.f32 1e-05, %v1647_v38 }
 0x278   :  { %v1755_v26 = vadd.f32 1e-05, %v1611_v52  ;;  %v1933_v13 = vmul.f32 %v3662_v53, %v1717_v10  ;;  %v3664_v52 = vpop.eup %3663 }
 0x27a   :  { %v5358_v46 = vpop.xlane.xlu0 %1408  ;;  %2612 = vperm.xlu1 %3598, %v1930_v31   ;;  %v5360_v19 = vpop.xlane.xlu1 %1404  ;;  %v1681_v31 = vld [vmem:[%s7135_s2 + $0x58] sm:$0xff]  ;;  %3665 = vrsqrt.f32 %v1755_v26 }
 0x27b   :  { %2122 = vrot.lane.b32.xlu0 %v1968_v11, %s3796_s14  ;;  %v1897_v25 = vmul.f32 %v3658_v35, %v1681_v31  ;;  %v1898_v11 = vmul.f32 %v3660_v58, %v1682_v9  ;;  %v1718_v35 = vld [vmem:[%s7135_s2 + $0x180] sm:$0xff]  ;;  %3667 = vrsqrt.f32 %v1756_v14  ;;  %v1792_v31 = vadd.f32 1e-05, %v1648_v55 }
 0x27c   :  { %3669 = vrsqrt.f32 %v1791_v7  ;;  %v1934_v60 = vmul.f32 %v3664_v52, %v1718_v35  ;;  %v1614_v9 = vmul.f32 0.0051020407, %v5278_v2  ;;  %v1719_v2 = vld [vmem:[%s7135_s2 + $0x188] sm:$0xff]  ;;  %v1684_v35 = vld [vmem:[%s7135_s2 + $0x70] sm:$0xff] }
 0x27d   :  { %v1970_v62 = vmul.f32 %v1898_v11, %v4845_v37  ;;  %3671 = vrsqrt.f32 %v1792_v31 }
 0x27e   :  { %v5366_v32 = vpop.xlane.xlu0 %1552  ;;  %2120 = vrot.lane.b32.xlu1 %v1967_v41, %s3796_s14  ;;  %v5369_v43 = vpop.xlane.xlu1 %1548  ;;  %v2006_v58 = vmul.f32 %v1934_v60, %v4857_v44  ;;  %v2005_v44 = vmul.f32 %v1933_v13, %v4843_v8  ;;  %v1650_v8 = vmul.f32 0.0051020407, %v5286_v30 }
 0x27f   :  { %2194 = vrot.lane.b32.xlu0 %v2004_v18, %s3796_s14 }
 0x282   :  { %v5378_v16 = vpop.xlane.xlu0 %1416  ;;  %2192 = vrot.lane.b32.xlu1 %v2003_v57, %s3796_s14  ;;  %v5381_v47 = vpop.xlane.xlu1 %1412  ;;  %v1969_v57 = vmul.f32 %v1897_v25, %v4831_v21  ;;  %v1649_v21 = vmul.f32 0.0051020407, %v5289_v3  ;;  %v1758_v3 = vadd.f32 1e-05, %v1614_v9 }
 0x283   :  { %2447 = vperm.xlu0 %3597, %v1897_v25  }
 0x284   :  { %v3666_v53 = vpop.eup %3665 }
 0x285   :  { %v3668_v25 = vpop.eup %3667 }
 0x286   :  { %v5390_v41 = vpop.xlane.xlu0 %1560  ;;  %2442 = vperm.xlu1 %3598, %v1896_v45   ;;  %v5392_v18 = vpop.xlane.xlu1 %1556  ;;  %v1613_v45 = vmul.f32 0.0051020407, %v5280_v49 }
 0x287   :  { %2627 = vperm.xlu0 %3597, %v1933_v13   ;;  %v3670_v55 = vpop.eup %3669  ;;  %v1793_v13 = vadd.f32 1e-05, %v1649_v21 }
 0x288   :  { %v1757_v49 = vadd.f32 1e-05, %v1613_v45  ;;  %v1935_v31 = vmul.f32 %v3670_v55, %v1719_v2  ;;  %v3672_v45 = vpop.eup %3671 }
 0x28a   :  { %v5398_v26 = vpop.xlane.xlu0 %1424  ;;  %2622 = vperm.xlu1 %3598, %v1932_v17   ;;  %v5400_v38 = vpop.xlane.xlu1 %1420  ;;  %v1683_v17 = vld [vmem:[%s7135_s2 + $0x68] sm:$0xff]  ;;  %3673 = vrsqrt.f32 %v1757_v49 }
 0x28b   :  { %2126 = vrot.lane.b32.xlu0 %v1970_v62, %s3796_s14  ;;  %v1899_v14 = vmul.f32 %v3666_v53, %v1683_v17  ;;  %v1900_v62 = vmul.f32 %v3668_v25, %v1684_v35  ;;  %v1720_v53 = vld [vmem:[%s7135_s2 + $0x190] sm:$0xff]  ;;  %3675 = vrsqrt.f32 %v1758_v3  ;;  %v1794_v17 = vadd.f32 1e-05, %v1650_v8 }
 0x28c   :  { %3677 = vrsqrt.f32 %v1793_v13  ;;  %v1936_v30 = vmul.f32 %v3672_v45, %v1720_v53  ;;  %v1616_v35 = vmul.f32 0.0051020407, %v5298_v4  ;;  %v1721_v45 = vld [vmem:[%s7135_s2 + $0x198] sm:$0xff]  ;;  %v1686_v4 = vld [vmem:[%s7135_s2 + $0x80] sm:$0xff] }
 0x28d   :  { %v1972_v9 = vmul.f32 %v1900_v62, %v4873_v23  ;;  %3679 = vrsqrt.f32 %v1794_v17 }
 0x28e   :  { %v5406_v10 = vpop.xlane.xlu0 %1568  ;;  %2124 = vrot.lane.b32.xlu1 %v1969_v57, %s3796_s14  ;;  %v5409_v37 = vpop.xlane.xlu1 %1564  ;;  %v2008_v25 = vmul.f32 %v1936_v30, %v4885_v0  ;;  %v2007_v0 = vmul.f32 %v1935_v31, %v4871_v20  ;;  %v1760_v53 = vadd.f32 1e-05, %v1616_v35  ;;  %v1652_v20 = vmul.f32 0.0051020407, %v5310_v15 }
 0x28f   :  { %2198 = vrot.lane.b32.xlu0 %v2006_v58, %s3796_s14 }
 0x292   :  { %v5418_v7 = vpop.xlane.xlu0 %1432  ;;  %2196 = vrot.lane.b32.xlu1 %v2005_v44, %s3796_s14  ;;  %v5421_v52 = vpop.xlane.xlu1 %1428  ;;  %v1971_v44 = vmul.f32 %v1899_v14, %v4859_v36  ;;  %v1651_v36 = vmul.f32 0.0051020407, %v5312_v5 }
 0x293   :  { %2457 = vperm.xlu0 %3597, %v1899_v14  }
 0x294   :  { %v3674_v55 = vpop.eup %3673  ;;  %v1795_v5 = vadd.f32 1e-05, %v1651_v36 }
 0x295   :  { %v3676_v14 = vpop.eup %3675 }
 0x296   :  { %v5430_v57 = vpop.xlane.xlu0 %1576  ;;  %2452 = vperm.xlu1 %3598, %v1898_v11   ;;  %v5432_v58 = vpop.xlane.xlu1 %1572  ;;  %v1615_v11 = vmul.f32 0.0051020407, %v5301_v1 }
 0x297   :  { %2637 = vperm.xlu0 %3597, %v1935_v31   ;;  %v3678_v8 = vpop.eup %3677 }
 0x298   :  { %v1759_v1 = vadd.f32 1e-05, %v1615_v11  ;;  %v1937_v17 = vmul.f32 %v3678_v8, %v1721_v45  ;;  %v3680_v11 = vpop.eup %3679  ;;  %v1618_v45 = vmul.f32 0.0051020407, %v5318_v50  ;;  %v1723_v50 = vld [vmem:[%s7135_s2 + $0x1a8] sm:$0xff] }
 0x29a   :  { %v5438_v49 = vpop.xlane.xlu0 %1440  ;;  %2632 = vperm.xlu1 %3598, %v1934_v60   ;;  %v5440_v21 = vpop.xlane.xlu1 %1436  ;;  %v1685_v60 = vld [vmem:[%s7135_s2 + $0x78] sm:$0xff]  ;;  %3681 = vrsqrt.f32 %v1759_v1 }
 0x29b   :  { %2130 = vrot.lane.b32.xlu0 %v1972_v9, %s3796_s14  ;;  %v1901_v3 = vmul.f32 %v3674_v55, %v1685_v60  ;;  %v1902_v9 = vmul.f32 %v3676_v14, %v1686_v4  ;;  %3683 = vrsqrt.f32 %v1760_v53  ;;  %v1796_v55 = vadd.f32 1e-05, %v1652_v20 }
 0x29c   :  { %3685 = vrsqrt.f32 %v1795_v5 }
 0x29d   :  { %v1974_v60 = vmul.f32 %v1902_v9, %v4901_v59  ;;  %3687 = vrsqrt.f32 %v1796_v55  ;;  %v1973_v36 = vmul.f32 %v1901_v3, %v4887_v39  ;;  %v1653_v39 = vmul.f32 0.0051020407, %v5329_v24 }
 0x29e   :  { %v5446_v2 = vpop.xlane.xlu0 %1584  ;;  %2128 = vrot.lane.b32.xlu1 %v1971_v44, %s3796_s14  ;;  %v5449_v23 = vpop.xlane.xlu1 %1580  ;;  %v1762_v24 = vadd.f32 1e-05, %v1618_v45 }
 0x29f   :  { %2202 = vrot.lane.b32.xlu0 %v2008_v25, %s3796_s14  ;;  %v1722_v25 = vld [vmem:[%s7135_s2 + $0x1a0] sm:$0xff] }
 0x2a0   :  { %v1938_v15 = vmul.f32 %v3680_v11, %v1722_v25  ;;  %v5507_v11 = vld [vmem:[%s7135_s2 + $0x90] sm:$0xff] }
 0x2a2   :  { %2200 = vrot.lane.b32.xlu1 %v2007_v0, %s3796_s14  ;;  %v5459_v13 = vpop.xlane.xlu1 %1444  ;;  %v5468_v31 = vpop.xlane.xlu0 %1448  ;;  %v2010_v0 = vmul.f32 %v1938_v15, %v4913_v33  ;;  %v2009_v33 = vmul.f32 %v1937_v17, %v4899_v22  ;;  %v1654_v22 = vmul.f32 0.0051020407, %v5326_v51 }
 0x2a3   :  { %2467 = vperm.xlu0 %3597, %v1901_v3  }
 0x2a4   :  { %v3682_v14 = vpop.eup %3681 }
 0x2a5   :  { %v3684_v3 = vpop.eup %3683 }
 0x2a6   :  { %2462 = vperm.xlu1 %3598, %v1900_v62   ;;  %v5470_v44 = vpop.xlane.xlu1 %1588  ;;  %v5476_v35 = vpop.xlane.xlu0 %1592  ;;  %v1617_v62 = vmul.f32 0.0051020407, %v5320_v48  ;;  %v1904_v55 = vmul.f32 %v3684_v3, %v5507_v11 }
 0x2a7   :  { %2647 = vperm.xlu0 %3597, %v1937_v17   ;;  %v3686_v53 = vpop.eup %3685  ;;  %v1797_v17 = vadd.f32 1e-05, %v1653_v39 }
 0x2a8   :  { %v1761_v48 = vadd.f32 1e-05, %v1617_v62  ;;  %v1939_v25 = vmul.f32 %v3686_v53, %v1723_v50  ;;  %v1976_v51 = vmul.f32 %v1904_v55, %v4929_v34  ;;  %v1620_v50 = vmul.f32 0.0051020407, %v5338_v61  ;;  %v1725_v61 = vld [vmem:[%s7135_s2 + $0x1b8] sm:$0xff] }
 0x2aa   :  { %2642 = vperm.xlu1 %3598, %v1936_v30   ;;  %v5478_v1 = vpop.xlane.xlu1 %1452  ;;  %v1687_v30 = vld [vmem:[%s7135_s2 + $0x88] sm:$0xff]  ;;  %3689 = vrsqrt.f32 %v1761_v48 }
 0x2ab   :  { %2134 = vrot.lane.b32.xlu0 %v1974_v60, %s3796_s14  ;;  %v1903_v4 = vmul.f32 %v3682_v14, %v1687_v30  ;;  %v3688_v60 = vpop.eup %3687  ;;  %3691 = vrsqrt.f32 %v1762_v24  ;;  %v1798_v14 = vadd.f32 1e-05, %v1654_v22 }
 0x2ac   :  { %3693 = vrsqrt.f32 %v1797_v17 }
 0x2ad   :  { %3695 = vrsqrt.f32 %v1798_v14  ;;  %v1975_v39 = vmul.f32 %v1903_v4, %v4915_v29  ;;  %v1655_v29 = vmul.f32 0.0051020407, %v5352_v28  ;;  %v1764_v28 = vadd.f32 1e-05, %v1620_v50 }
 0x2ae   :  { %v5484_v8 = vpop.permute.xlu0 %2392  ;;  %2132 = vrot.lane.b32.xlu1 %v1973_v36, %s3796_s14  ;;  %v5487_v59 = vpop.xlane.xlu1 %1596 }
 0x2af   :  { %7745 = vst [vmem:[#allocation146_spill] sm:$0xff] %v5484_v8  ;;  %2206 = vrot.lane.b32.xlu0 %v2010_v0, %s3796_s14  ;;  %v5518_v0 = vld [vmem:[%s7135_s2 + $0x1b0] sm:$0xff]  ;;  %v5668_v8 = vld [vmem:[%s7135_s2 + $0x1e0] sm:$0xff] }
 0x2b0   :  { %v1940_v30 = vmul.f32 %v3688_v60, %v5518_v0  ;;  %7774 = vst [vmem:[#allocation187_spill] sm:$0xff] %v5668_v8 }
 0x2b2   :  { %v5496_v20 = vpop.permute.xlu0 %2102  ;;  %2204 = vrot.lane.b32.xlu1 %v2009_v33, %s3796_s14  ;;  %v5499_v5 = vpop.permute.xlu1 %2572  ;;  %v2012_v33 = vmul.f32 %v1940_v30, %v4941_v12 }
 0x2b3   :  { %2477 = vperm.xlu0 %3597, %v1903_v4   ;;  %v7747_v4 = vld [vmem:[#allocation147_spill] sm:$0xff] }
 0x2b4   :  { %v3690_v3 = vpop.eup %3689  ;;  %v2011_v12 = vmul.f32 %v1939_v25, %v7747_v4 }
 0x2b5   :  { %v3692_v24 = vpop.eup %3691 }
 0x2b6   :  { %v5511_v62 = vpop.permute.xlu0 %2174  ;;  %2472 = vperm.xlu1 %3598, %v1902_v9   ;;  %v5513_v36 = vpop.permute.xlu1 %2397  ;;  %v1619_v9 = vmul.f32 0.0051020407, %v5341_v42 }
 0x2b7   :  { %2657 = vperm.xlu0 %3597, %v1939_v25   ;;  %v3694_v17 = vpop.eup %3693  ;;  %v1656_v25 = vmul.f32 0.0051020407, %v5350_v56  ;;  %v7752_v56 = vld [vmem:[#allocation150_spill] sm:$0xff] }
 0x2b8   :  { %v1763_v42 = vadd.f32 1e-05, %v1619_v9  ;;  %v1799_v9 = vadd.f32 1e-05, %v1655_v29 }
 0x2b9   :  { %v1800_v50 = vadd.f32 1e-05, %v1656_v25 }
 0x2ba   :  { %v5522_v45 = vpop.permute.xlu0 %2577  ;;  %2652 = vperm.xlu1 %3598, %v1938_v15   ;;  %v5524_v48 = vpop.permute.xlu1 %2104  ;;  %v1689_v15 = vld [vmem:[%s7135_s2 + $0x98] sm:$0xff]  ;;  %3697 = vrsqrt.f32 %v1763_v42 }
 0x2bb   :  { %7746 = vst [vmem:[#allocation177_spill] sm:$0xff] %v5522_v45  ;;  %2138 = vrot.lane.b32.xlu0 %v1976_v51, %s3796_s14  ;;  %v1905_v22 = vmul.f32 %v3690_v3, %v1689_v15  ;;  %v5553_v51 = vld [vmem:[%s7135_s2 + $0xa0] sm:$0xff]  ;;  %v3696_v3 = vpop.eup %3695  ;;  %3699 = vrsqrt.f32 %v1764_v28  ;;  %v7754_v28 = vld [vmem:[#allocation151_spill] sm:$0xff] }
 0x2bc   :  { %3701 = vrsqrt.f32 %v1799_v9 }
 0x2bd   :  { %3703 = vrsqrt.f32 %v1800_v50  ;;  %v1622_v50 = vmul.f32 0.0051020407, %v5358_v46  ;;  %v5599_v46 = vld [vmem:[%s7135_s2 + $0x1c8] sm:$0xff] }
 0x2be   :  { %v5530_v53 = vpop.permute.xlu0 %2178  ;;  %2136 = vrot.lane.b32.xlu1 %v1975_v39, %s3796_s14  ;;  %v5533_v34 = vpop.permute.xlu1 %2176  ;;  %v1941_v39 = vmul.f32 %v3694_v17, %v1725_v61  ;;  %v7753_v61 = vld [vmem:[#allocation148_spill] sm:$0xff]  ;;  %7758 = vst [vmem:[#allocation151_spill] sm:$0xff] %v5599_v46 }
 0x2bf   :  { %2210 = vrot.lane.b32.xlu0 %v2012_v33, %s3796_s14  ;;  %v1906_v33 = vmul.f32 %v3692_v24, %v5553_v51 }
 0x2c1   :  { %v1978_v42 = vmul.f32 %v1906_v33, %v7752_v56  ;;  %v7756_v56 = vld [vmem:[#allocation149_spill] sm:$0xff] }
 0x2c2   :  { %v5542_v60 = vpop.permute.xlu0 %2407  ;;  %2208 = vrot.lane.b32.xlu1 %v2011_v12, %s3796_s14  ;;  %v5545_v14 = vpop.permute.xlu1 %2402  ;;  %v5564_v12 = vld [vmem:[%s7135_s2 + $0x1c0] sm:$0xff] }
 0x2c3   :  { %7748 = vst [vmem:[#allocation147_spill] sm:$0xff] %v5542_v60  ;;  %7749 = vst [vmem:[#allocation178_spill] sm:$0xff] %v5545_v14  ;;  %2487 = vperm.xlu0 %3597, %v1905_v22   ;;  %v1942_v29 = vmul.f32 %v3696_v3, %v5564_v12 }
 0x2c4   :  { %v3698_v25 = vpop.eup %3697 }
 0x2c5   :  { %v2014_v60 = vmul.f32 %v1942_v29, %v7754_v28 }
 0x2c6   :  { %v5557_v15 = vpop.permute.xlu0 %2587  ;;  %2482 = vperm.xlu1 %3598, %v1904_v55   ;;  %v5559_v4 = vpop.permute.xlu1 %2582  ;;  %v1621_v55 = vmul.f32 0.0051020407, %v5360_v19 }
 0x2c7   :  { %7750 = vst [vmem:[#allocation179_spill] sm:$0xff] %v5557_v15  ;;  %7751 = vst [vmem:[#allocation180_spill] sm:$0xff] %v5559_v4  ;;  %2667 = vperm.xlu0 %3597, %v1941_v39   ;;  %v1977_v15 = vmul.f32 %v1905_v22, %v7753_v61  ;;  %v1657_v22 = vmul.f32 0.0051020407, %v5369_v43  ;;  %v3700_v61 = vpop.eup %3699  ;;  %v5604_v43 = vld [vmem:[%s7135_s2 + $0xb0] sm:$0xff] }
 0x2c8   :  { %v1765_v19 = vadd.f32 1e-05, %v1621_v55  ;;  %7759 = vst [vmem:[#allocation149_spill] sm:$0xff] %v5604_v43 }
 0x2c9   :  { %v1801_v55 = vadd.f32 1e-05, %v1657_v22 }
 0x2ca   :  { %v5568_v24 = vpop.permute.xlu0 %2110  ;;  %2662 = vperm.xlu1 %3598, %v1940_v30   ;;  %v5570_v17 = vpop.permute.xlu1 %2106  ;;  %v5584_v30 = vld [vmem:[%s7135_s2 + $0xa8] sm:$0xff]  ;;  %3705 = vrsqrt.f32 %v1765_v19 }
 0x2cb   :  { %2142 = vrot.lane.b32.xlu0 %v1978_v42, %s3796_s14  ;;  %7755 = vst [vmem:[#allocation150_spill] sm:$0xff] %v5584_v30  ;;  %v2013_v42 = vmul.f32 %v1941_v39, %v7756_v56  ;;  %v1907_v28 = vmul.f32 %v3698_v25, %v5584_v30  ;;  %v1658_v39 = vmul.f32 0.0051020407, %v5366_v32  ;;  %v1908_v56 = vmul.f32 %v3700_v61, %v5604_v43  ;;  %v5616_v30 = vld [vmem:[%s7135_s2 + $0x1d0] sm:$0xff]  ;;  %v7763_v32 = vld [vmem:[#allocation154_spill] sm:$0xff] }
 0x2cc   :  { %7762 = vst [vmem:[#allocation183_spill] sm:$0xff] %v5616_v30 }
 0x2cd   :  { %v1980_v19 = vmul.f32 %v1908_v56, %v7763_v32 }
 0x2ce   :  { %v5576_v9 = vpop.permute.xlu0 %2182  ;;  %2140 = vrot.lane.b32.xlu1 %v1977_v15, %s3796_s14  ;;  %v5579_v3 = vpop.permute.xlu1 %2108 }
 0x2cf   :  { %2214 = vrot.lane.b32.xlu0 %v2014_v60, %s3796_s14  ;;  %v3702_v15 = vpop.eup %3701  ;;  %v1766_v60 = vadd.f32 1e-05, %v1622_v50  ;;  %v1802_v50 = vadd.f32 1e-05, %v1658_v39 }
 0x2d0   :  { %v1943_v25 = vmul.f32 %v3702_v15, %v5599_v46 }
 0x2d1   :  { %3707 = vrsqrt.f32 %v1766_v60  ;;  %v7766_v60 = vld [vmem:[#allocation155_spill] sm:$0xff] }
 0x2d2   :  { %v5591_v14 = vpop.permute.xlu0 %2417  ;;  %2212 = vrot.lane.b32.xlu1 %v2013_v42, %s3796_s14  ;;  %v5594_v4 = vpop.permute.xlu1 %2180  ;;  %3709 = vrsqrt.f32 %v1801_v55 }
 0x2d3   :  { %7757 = vst [vmem:[#allocation148_spill] sm:$0xff] %v5591_v14  ;;  %2497 = vperm.xlu0 %3597, %v1907_v28   ;;  %v3704_v42 = vpop.eup %3703  ;;  %3711 = vrsqrt.f32 %v1802_v50  ;;  %v1624_v50 = vmul.f32 0.0051020407, %v5378_v16  ;;  %v5651_v16 = vld [vmem:[%s7135_s2 + $0x1d8] sm:$0xff] }
 0x2d4   :  { %v1944_v22 = vmul.f32 %v3704_v42, %v5616_v30  ;;  %v3706_v39 = vpop.eup %3705 }
 0x2d6   :  { %v5609_v14 = vpop.permute.xlu0 %2597  ;;  %2492 = vperm.xlu1 %3598, %v1906_v33   ;;  %v5611_v45 = vpop.permute.xlu1 %2412  ;;  %v1623_v33 = vmul.f32 0.0051020407, %v5381_v47  ;;  %v2016_v46 = vmul.f32 %v1944_v22, %v7766_v60 }
 0x2d7   :  { %7760 = vst [vmem:[#allocation181_spill] sm:$0xff] %v5609_v14  ;;  %7761 = vst [vmem:[#allocation182_spill] sm:$0xff] %v5611_v45  ;;  %2677 = vperm.xlu0 %3597, %v1943_v25   ;;  %v7765_v14 = vld [vmem:[#allocation152_spill] sm:$0xff] }
 0x2d8   :  { %v1979_v45 = vmul.f32 %v1907_v28, %v7765_v14  ;;  %v1767_v47 = vadd.f32 1e-05, %v1623_v33  ;;  %v1659_v14 = vmul.f32 0.0051020407, %v5392_v18  ;;  %v7768_v28 = vld [vmem:[#allocation153_spill] sm:$0xff]  ;;  %v5656_v18 = vld [vmem:[%s7135_s2 + $0xc0] sm:$0xff] }
 0x2d9   :  { %v2015_v32 = vmul.f32 %v1943_v25, %v7768_v28  ;;  %7770 = vst [vmem:[#allocation153_spill] sm:$0xff] %v5651_v16  ;;  %7771 = vst [vmem:[#allocation184_spill] sm:$0xff] %v5656_v18  ;;  %v1660_v25 = vmul.f32 0.0051020407, %v5390_v41  ;;  %v7775_v41 = vld [vmem:[#allocation158_spill] sm:$0xff] }
 0x2da   :  { %v5620_v61 = vpop.permute.xlu0 %2114  ;;  %2672 = vperm.xlu1 %3598, %v1942_v29   ;;  %v5622_v15 = vpop.permute.xlu1 %2592  ;;  %v5636_v29 = vld [vmem:[%s7135_s2 + $0xb8] sm:$0xff]  ;;  %3713 = vrsqrt.f32 %v1767_v47  ;;  %v1803_v33 = vadd.f32 1e-05, %v1659_v14 }
 0x2db   :  { %7764 = vst [vmem:[#allocation154_spill] sm:$0xff] %v5622_v15  ;;  %2146 = vrot.lane.b32.xlu0 %v1980_v19, %s3796_s14  ;;  %7767 = vst [vmem:[#allocation152_spill] sm:$0xff] %v5636_v29  ;;  %v3708_v19 = vpop.eup %3707  ;;  %v1909_v60 = vmul.f32 %v3706_v39, %v5636_v29 }
 0x2dc   :  { %v1910_v28 = vmul.f32 %v3708_v19, %v5656_v18  ;;  %v5720_v18 = vld [vmem:[%s7135_s2 + $0x1f0] sm:$0xff] }
 0x2dd   :  { %7786 = vst [vmem:[#allocation191_spill] sm:$0xff] %v5720_v18 }
 0x2de   :  { %v5628_v55 = vpop.permute.xlu0 %2186  ;;  %2144 = vrot.lane.b32.xlu1 %v1979_v45, %s3796_s14  ;;  %v5631_v42 = vpop.permute.xlu1 %2112  ;;  %v1982_v47 = vmul.f32 %v1910_v28, %v7775_v41 }
 0x2df   :  { %2218 = vrot.lane.b32.xlu0 %v2016_v46, %s3796_s14  ;;  %v3710_v45 = vpop.eup %3709  ;;  %v1768_v46 = vadd.f32 1e-05, %v1624_v50  ;;  %v1804_v50 = vadd.f32 1e-05, %v1660_v25 }
 0x2e0   :  { %v1945_v39 = vmul.f32 %v3710_v45, %v5651_v16 }
 0x2e1   :  { %3715 = vrsqrt.f32 %v1768_v46  ;;  %v7778_v46 = vld [vmem:[#allocation159_spill] sm:$0xff] }
 0x2e2   :  { %v5643_v15 = vpop.permute.xlu0 %2427  ;;  %2216 = vrot.lane.b32.xlu1 %v2015_v32, %s3796_s14  ;;  %v5646_v30 = vpop.permute.xlu1 %2184  ;;  %3717 = vrsqrt.f32 %v1803_v33 }
 0x2e3   :  { %7769 = vst [vmem:[#allocation155_spill] sm:$0xff] %v5643_v15  ;;  %2507 = vperm.xlu0 %3597, %v1909_v60   ;;  %v3712_v32 = vpop.eup %3711  ;;  %3719 = vrsqrt.f32 %v1804_v50  ;;  %v1626_v50 = vmul.f32 0.0051020407, %v5398_v26  ;;  %v5703_v26 = vld [vmem:[%s7135_s2 + $0x1e8] sm:$0xff] }
 0x2e4   :  { %v1946_v14 = vmul.f32 %v3712_v32, %v5668_v8  ;;  %v3714_v25 = vpop.eup %3713 }
 0x2e6   :  { %v5661_v15 = vpop.permute.xlu0 %2607  ;;  %2502 = vperm.xlu1 %3598, %v1908_v56   ;;  %v5663_v29 = vpop.permute.xlu1 %2422  ;;  %v1625_v56 = vmul.f32 0.0051020407, %v5400_v38  ;;  %v2018_v16 = vmul.f32 %v1946_v14, %v7778_v46 }
 0x2e7   :  { %7772 = vst [vmem:[#allocation185_spill] sm:$0xff] %v5661_v15  ;;  %7773 = vst [vmem:[#allocation186_spill] sm:$0xff] %v5663_v29  ;;  %2687 = vperm.xlu0 %3597, %v1945_v39   ;;  %v7777_v15 = vld [vmem:[#allocation156_spill] sm:$0xff] }
 0x2e8   :  { %v1981_v29 = vmul.f32 %v1909_v60, %v7777_v15  ;;  %v1769_v38 = vadd.f32 1e-05, %v1625_v56  ;;  %v1661_v15 = vmul.f32 0.0051020407, %v5409_v37  ;;  %v7780_v60 = vld [vmem:[#allocation157_spill] sm:$0xff]  ;;  %v5708_v37 = vld [vmem:[%s7135_s2 + $0xd0] sm:$0xff] }
 0x2e9   :  { %v2017_v41 = vmul.f32 %v1945_v39, %v7780_v60  ;;  %7782 = vst [vmem:[#allocation157_spill] sm:$0xff] %v5703_v26  ;;  %7783 = vst [vmem:[#allocation188_spill] sm:$0xff] %v5708_v37  ;;  %v1662_v39 = vmul.f32 0.0051020407, %v5406_v10  ;;  %v7787_v10 = vld [vmem:[#allocation162_spill] sm:$0xff] }
 0x2ea   :  { %v5672_v19 = vpop.permute.xlu0 %2118  ;;  %2682 = vperm.xlu1 %3598, %v1944_v22   ;;  %v5674_v45 = vpop.permute.xlu1 %2602  ;;  %v5688_v22 = vld [vmem:[%s7135_s2 + $0xc8] sm:$0xff]  ;;  %3721 = vrsqrt.f32 %v1769_v38  ;;  %v1805_v56 = vadd.f32 1e-05, %v1661_v15 }
 0x2eb   :  { %7776 = vst [vmem:[#allocation158_spill] sm:$0xff] %v5674_v45  ;;  %2150 = vrot.lane.b32.xlu0 %v1982_v47, %s3796_s14  ;;  %7779 = vst [vmem:[#allocation156_spill] sm:$0xff] %v5688_v22  ;;  %v3716_v47 = vpop.eup %3715  ;;  %v1911_v46 = vmul.f32 %v3714_v25, %v5688_v22 }
 0x2ec   :  { %v1912_v60 = vmul.f32 %v3716_v47, %v5708_v37  ;;  %v7801_v37 = vld [vmem:[#allocation167_spill] sm:$0xff] }
 0x2ee   :  { %v5680_v33 = vpop.permute.xlu0 %2190  ;;  %2148 = vrot.lane.b32.xlu1 %v1981_v29, %s3796_s14  ;;  %v5683_v32 = vpop.permute.xlu1 %2116  ;;  %v1984_v38 = vmul.f32 %v1912_v60, %v7787_v10 }
 0x2ef   :  { %2222 = vrot.lane.b32.xlu0 %v2018_v16, %s3796_s14  ;;  %v3718_v29 = vpop.eup %3717  ;;  %v1770_v16 = vadd.f32 1e-05, %v1626_v50  ;;  %v1806_v50 = vadd.f32 1e-05, %v1662_v39 }
 0x2f0   :  { %v1947_v25 = vmul.f32 %v3718_v29, %v5703_v26 }
 0x2f1   :  { %3723 = vrsqrt.f32 %v1770_v16  ;;  %v7790_v16 = vld [vmem:[#allocation163_spill] sm:$0xff] }
 0x2f2   :  { %v5695_v45 = vpop.permute.xlu0 %2437  ;;  %2220 = vrot.lane.b32.xlu1 %v2017_v41, %s3796_s14  ;;  %v5698_v8 = vpop.permute.xlu1 %2188  ;;  %3725 = vrsqrt.f32 %v1805_v56 }
 0x2f3   :  { %7781 = vst [vmem:[#allocation159_spill] sm:$0xff] %v5695_v45  ;;  %2517 = vperm.xlu0 %3597, %v1911_v46   ;;  %v3720_v41 = vpop.eup %3719  ;;  %3727 = vrsqrt.f32 %v1806_v50 }
 0x2f4   :  { %v1948_v15 = vmul.f32 %v3720_v41, %v5720_v18  ;;  %v3722_v39 = vpop.eup %3721  ;;  %v5754_v18 = vld [vmem:[%s7135_s2 + $0x1f8] sm:$0xff] }
 0x2f6   :  { %v5713_v45 = vpop.permute.xlu0 %2617  ;;  %2512 = vperm.xlu1 %3598, %v1910_v28   ;;  %v5715_v22 = vpop.permute.xlu1 %2432  ;;  %v1627_v28 = vmul.f32 0.0051020407, %v5421_v52  ;;  %v2020_v26 = vmul.f32 %v1948_v15, %v7790_v16  ;;  %v1663_v52 = vmul.f32 0.0051020407, %v5432_v58  ;;  %v5759_v58 = vld [vmem:[%s7135_s2 + $0xe0] sm:$0xff] }
 0x2f7   :  { %7784 = vst [vmem:[#allocation189_spill] sm:$0xff] %v5713_v45  ;;  %7785 = vst [vmem:[#allocation190_spill] sm:$0xff] %v5715_v22  ;;  %2697 = vperm.xlu0 %3597, %v1947_v25   ;;  %v7789_v45 = vld [vmem:[#allocation160_spill] sm:$0xff] }
 0x2f8   :  { %v1983_v22 = vmul.f32 %v1911_v46, %v7789_v45  ;;  %v1771_v50 = vadd.f32 1e-05, %v1627_v28  ;;  %v7792_v45 = vld [vmem:[#allocation161_spill] sm:$0xff]  ;;  %7795 = vst [vmem:[#allocation192_spill] sm:$0xff] %v5759_v58 }
 0x2f9   :  { %v2019_v46 = vmul.f32 %v1947_v25, %v7792_v45  ;;  %7794 = vst [vmem:[#allocation161_spill] sm:$0xff] %v5754_v18 }
 0x2fa   :  { %v5724_v47 = vpop.permute.xlu0 %2122  ;;  %2692 = vperm.xlu1 %3598, %v1946_v14   ;;  %v5726_v29 = vpop.permute.xlu1 %2612  ;;  %v5740_v14 = vld [vmem:[%s7135_s2 + $0xd8] sm:$0xff]  ;;  %3729 = vrsqrt.f32 %v1771_v50  ;;  %v1628_v50 = vmul.f32 0.0051020407, %v5418_v7 }
 0x2fb   :  { %7788 = vst [vmem:[#allocation162_spill] sm:$0xff] %v5726_v29  ;;  %2154 = vrot.lane.b32.xlu0 %v1984_v38, %s3796_s14  ;;  %7791 = vst [vmem:[#allocation160_spill] sm:$0xff] %v5740_v14  ;;  %v3724_v10 = vpop.eup %3723  ;;  %v1913_v38 = vmul.f32 %v3722_v39, %v5740_v14 }
 0x2fc   :  { %v3726_v16 = vpop.eup %3725  ;;  %v1914_v28 = vmul.f32 %v3724_v10, %v5759_v58  ;;  %v1664_v58 = vmul.f32 0.0051020407, %v5430_v57 }
 0x2fd   :  { %v1949_v25 = vmul.f32 %v3726_v16, %v5754_v18  ;;  %v3728_v39 = vpop.eup %3727  ;;  %v1772_v18 = vadd.f32 1e-05, %v1628_v50 }
 0x2fe   :  { %v5732_v56 = vpop.permute.xlu0 %2194  ;;  %2152 = vrot.lane.b32.xlu1 %v1983_v22, %s3796_s14  ;;  %v5735_v41 = vpop.permute.xlu1 %2120  ;;  %v1808_v57 = vadd.f32 1e-05, %v1664_v58 }
 0x2ff   :  { %2226 = vrot.lane.b32.xlu0 %v2020_v26, %s3796_s14  ;;  %v1807_v26 = vadd.f32 1e-05, %v1663_v52  ;;  %v7798_v52 = vld [vmem:[#allocation166_spill] sm:$0xff] }
 0x300   :  { %v1986_v14 = vmul.f32 %v1914_v28, %v7798_v52 }
 0x301   :  { %3731 = vrsqrt.f32 %v1807_v26 }
 0x302   :  { %v5746_v29 = vpop.permute.xlu0 %2447  ;;  %2224 = vrot.lane.b32.xlu1 %v2019_v46, %s3796_s14  ;;  %v5749_v22 = vpop.permute.xlu1 %2192  ;;  %3733 = vrsqrt.f32 %v1772_v18 }
 0x303   :  { %7793 = vst [vmem:[#allocation163_spill] sm:$0xff] %v5746_v29  ;;  %2527 = vperm.xlu0 %3597, %v1913_v38   ;;  %v5770_v29 = vld [vmem:[%s7135_s2 + $0x200] sm:$0xff]  ;;  %3735 = vrsqrt.f32 %v1808_v57 }
 0x304   :  { %v1950_v16 = vmul.f32 %v3728_v39, %v5770_v29  ;;  %v3730_v43 = vpop.eup %3729 }
 0x306   :  { %v5763_v45 = vpop.permute.xlu0 %2627  ;;  %2522 = vperm.xlu1 %3598, %v1912_v60   ;;  %v5765_v46 = vpop.permute.xlu1 %2442  ;;  %v7800_v60 = vld [vmem:[#allocation164_spill] sm:$0xff]  ;;  %v2022_v26 = vmul.f32 %v1950_v16, %v7801_v37 }
 0x307   :  { %7796 = vst [vmem:[#allocation193_spill] sm:$0xff] %v5763_v45  ;;  %7797 = vst [vmem:[#allocation194_spill] sm:$0xff] %v5765_v46  ;;  %2707 = vperm.xlu0 %3597, %v1949_v25   ;;  %v1985_v46 = vmul.f32 %v1913_v38, %v7800_v60  ;;  %v5804_v60 = vld [vmem:[%s7135_s2 + $0x208] sm:$0xff] }
 0x30a   :  { %v5775_v10 = vpop.permute.xlu0 %2126  ;;  %2702 = vperm.xlu1 %3598, %v1948_v15   ;;  %v5777_v45 = vpop.permute.xlu1 %2622  ;;  %v5791_v15 = vld [vmem:[%s7135_s2 + $0xe8] sm:$0xff] }
 0x30b   :  { %7799 = vst [vmem:[#allocation166_spill] sm:$0xff] %v5777_v45  ;;  %2158 = vrot.lane.b32.xlu0 %v1986_v14, %s3796_s14  ;;  %7802 = vst [vmem:[#allocation164_spill] sm:$0xff] %v5791_v15  ;;  %v7803_v14 = vld [vmem:[#allocation165_spill] sm:$0xff]  ;;  %v1915_v37 = vmul.f32 %v3730_v43, %v5791_v15  ;;  %v3732_v50 = vpop.eup %3731 }
 0x30c   :  { %v2021_v38 = vmul.f32 %v1949_v25, %v7803_v14  ;;  %7805 = vst [vmem:[#allocation165_spill] sm:$0xff] %v5804_v60  ;;  %v1629_v25 = vmul.f32 0.0051020407, %v5440_v21  ;;  %v1951_v18 = vmul.f32 %v3732_v50, %v5804_v60  ;;  %v1665_v14 = vmul.f32 0.0051020407, %v5449_v23  ;;  %v3734_v50 = vpop.eup %3733  ;;  %v7809_v23 = vld [vmem:[#allocation168_spill] sm:$0xff] }
 0x30d   :  { %v3736_v45 = vpop.eup %3735 }
 0x30e   :  { %v5783_v7 = vpop.permute.xlu0 %2198  ;;  %2156 = vrot.lane.b32.xlu1 %v1985_v46, %s3796_s14  ;;  %v5786_v39 = vpop.permute.xlu1 %2124 }
 0x30f   :  { %2230 = vrot.lane.b32.xlu0 %v2022_v26, %s3796_s14  ;;  %v1773_v26 = vadd.f32 1e-05, %v1629_v25  ;;  %v1987_v25 = vmul.f32 %v1915_v37, %v7809_v23  ;;  %v1666_v23 = vmul.f32 0.0051020407, %v5446_v2 }
 0x311   :  { %3737 = vrsqrt.f32 %v1773_v26  ;;  %v7812_v26 = vld [vmem:[#allocation169_spill] sm:$0xff]  ;;  %v1810_v2 = vadd.f32 1e-05, %v1666_v23 }
 0x312   :  { %v5796_v52 = vpop.permute.xlu0 %2457  ;;  %2228 = vrot.lane.b32.xlu1 %v2021_v38, %s3796_s14  ;;  %v5799_v46 = vpop.permute.xlu1 %2196  ;;  %v3757_v38 = vld [vmem:[%s7135_s2 + $0x120] sm:$0xff] }
 0x313   :  { %7804 = vst [vmem:[#allocation167_spill] sm:$0xff] %v5796_v52  ;;  %2537 = vperm.xlu0 %3597, %v1915_v37   ;;  %v2354_v52 = vsub.f32 %v3757_v38, %v5511_v62  ;;  %v1630_v62 = vmul.f32 0.0051020407, %v5438_v49  ;;  %v7810_v37 = vmov 1   ;;  %v5843_v49 = vld [vmem:[%s7135_s2 + $0x210] sm:$0xff] }
 0x314   :  { %7811 = vst [vmem:[#allocation168_spill] sm:$0xff] %v5843_v49  ;;  %v1952_v15 = vmul.f32 %v3736_v45, %v5843_v49 }
 0x316   :  { %v5808_v58 = vpop.permute.xlu0 %2637  ;;  %2532 = vperm.xlu1 %3598, %v1914_v28   ;;  %v5810_v43 = vpop.permute.xlu1 %2452  ;;  %v5825_v28 = vld [vmem:[%s7135_s2 + $0xf0] sm:$0xff] }
 0x317   :  { %7806 = vst [vmem:[#allocation195_spill] sm:$0xff] %v5808_v58  ;;  %7807 = vst [vmem:[#allocation196_spill] sm:$0xff] %v5810_v43  ;;  %2717 = vperm.xlu0 %3597, %v1951_v18   ;;  %v7449_v58 = vmov 1   ;;  %v1809_v43 = vadd.f32 1e-05, %v1665_v14  ;;  %v2023_v14 = vmul.f32 %v1951_v18, %v7812_v26 }
 0x319   :  { %3739 = vrsqrt.f32 %v1809_v43  ;;  %v7815_v43 = vmov 0  }
 0x31a   :  { %v5817_v57 = vpop.permute.xlu0 %2130  ;;  %2712 = vperm.xlu1 %3598, %v1950_v16   ;;  %v5819_v21 = vpop.permute.xlu1 %2632  ;;  %v3758_v16 = vld [vmem:[%s7135_s2 + $0x8] sm:$0xff] }
 0x31b   :  { %7808 = vst [vmem:[#allocation197_spill] sm:$0xff] %v5819_v21  ;;  %3600 = vset.pattern.permute.xlu0 %v7449_v58  ;;  %v2319_v38 = vsub.f32 %v3758_v16, %v5524_v48  ;;  %v1774_v48 = vadd.f32 1e-05, %v1630_v62  ;;  %v7814_v16 = vld [vmem:[#allocation170_spill] sm:$0xff]  ;;  %v3738_v45 = vpop.eup %3737 }
 0x31c   :  { %3076 = vperm.xlu0 %3600, %v2354_v52   ;;  %v1916_v52 = vmul.f32 %v3734_v50, %v5825_v28 }
 0x31d   :  { %3741 = vrsqrt.f32 %v1774_v48 }
 0x31e   :  { %v5833_v21 = vpop.permute.xlu0 %2202  ;;  %2160 = vrot.lane.b32.xlu1 %v1987_v25, %s3796_s14  ;;  %v5836_v58 = vpop.permute.xlu1 %2128  ;;  %v1988_v60 = vmul.f32 %v1916_v52, %v7814_v16  ;;  %3743 = vrsqrt.f32 %v1810_v2  ;;  %v1667_v2 = vmul.f32 0.0051020407, %v5470_v44  ;;  %v3760_v44 = vld [vmem:[%s7135_s2 + $0x128] sm:$0xff] }
 0x31f   :  { %3599 = vset.pattern.permute.xlu1 %v7810_v37 }
 0x320   :  { %2901 = vperm.xlu0 %3600, %v2319_v38   ;;  %v3759_v38 = vld [vmem:[%s7135_s2] sm:$0xff] }
 0x321   :  { %v2318_v18 = vsub.f32 %v3759_v38, %v5496_v20  ;;  %v1631_v20 = vmul.f32 0.0051020407, %v5459_v13 }
 0x322   :  { %v5847_v25 = vpop.permute.xlu0 %2467  ;;  %2232 = vrot.lane.b32.xlu1 %v2023_v14, %s3796_s14  ;;  %v5850_v50 = vpop.permute.xlu1 %2200  ;;  %v7818_v14 = vld [vmem:[#allocation171_spill] sm:$0xff] }
 0x323   :  { %7813 = vst [vmem:[#allocation169_spill] sm:$0xff] %v5847_v25  ;;  %v2024_v16 = vmul.f32 %v1952_v15, %v7818_v14  ;;  %v5868_v25 = vld [vmem:[%s7135_s2 + $0xf8] sm:$0xff]  ;;  %v3740_v38 = vpop.eup %3739  ;;  %v1775_v14 = vadd.f32 1e-05, %v1631_v20  ;;  %v2355_v20 = vsub.f32 %v3760_v44, %v5533_v34  ;;  %v5912_v34 = vld [vmem:[%s7135_s2 + $0x220] sm:$0xff] }
 0x324   :  { %2162 = vrot.lane.b32.xlu0 %v1988_v60, %s3796_s14  ;;  %7819 = vst [vmem:[#allocation171_spill] sm:$0xff] %v5868_v25  ;;  %v1917_v23 = vmul.f32 %v3738_v45, %v5868_v25  ;;  %v1811_v45 = vadd.f32 1e-05, %v1667_v2 }
 0x325   :  { %3603 = vset.pattern.permute.xlu0 %v7815_v43  ;;  %3745 = vrsqrt.f32 %v1775_v14 }
 0x326   :  { %v5860_v62 = vpop.permute.xlu0 %2647  ;;  %2896 = vperm.xlu1 %3599, %v2318_v18   ;;  %v5862_v26 = vpop.permute.xlu1 %2462  ;;  %v5881_v18 = vld [vmem:[%s7135_s2 + $0x218] sm:$0xff]  ;;  %3747 = vrsqrt.f32 %v1811_v45 }
 0x327   :  { %7816 = vst [vmem:[#allocation170_spill] sm:$0xff] %v5860_v62  ;;  %7817 = vst [vmem:[#allocation198_spill] sm:$0xff] %v5862_v26  ;;  %v1953_v62 = vmul.f32 %v3740_v38, %v5881_v18  ;;  %v7829_v45 = vld [vmem:[#allocation173_spill] sm:$0xff] }
 0x328   :  { %2234 = vrot.lane.b32.xlu0 %v2024_v16, %s3796_s14  ;;  %7821 = vst [vmem:[#allocation200_spill] sm:$0xff] %v5881_v18  ;;  %v1632_v18 = vmul.f32 0.0051020407, %v5468_v31  ;;  %v7830_v31 = vld [vmem:[#allocation175_spill] sm:$0xff] }
 0x32a   :  { %v5872_v60 = vpop.permute.xlu0 %2134  ;;  %3601 = vset.pattern.permute.xlu1 %v7815_v43  ;;  %v5875_v48 = vpop.permute.xlu1 %2642 }
 0x32b   :  { %7820 = vst [vmem:[#allocation199_spill] sm:$0xff] %v5875_v48  ;;  %2542 = vperm.xlu1 %3601, %v1916_v52   ;;  %v3742_v48 = vpop.eup %3741  ;;  %v5892_v52 = vld [vmem:[%s7135_s2 + $0x100] sm:$0xff] }
 0x32c   :  { %2547 = vperm.xlu0 %3603, %v1917_v23   ;;  %7822 = vst [vmem:[#allocation201_spill] sm:$0xff] %v5892_v52  ;;  %v1918_v14 = vmul.f32 %v3742_v48, %v5892_v52  ;;  %v3744_v2 = vpop.eup %3743  ;;  %v7827_v48 = vld [vmem:[#allocation174_spill] sm:$0xff] }
 0x32d   :  { %v1954_v49 = vmul.f32 %v3744_v2, %v5912_v34 }
 0x32e   :  { %v5884_v13 = vpop.permute.xlu0 %2206  ;;  %v5886_v16 = vpop.permute.xlu1 %2132  ;;  %v1990_v52 = vmul.f32 %v1918_v14, %v7827_v48 }
 0x32f   :  { %2722 = vperm.xlu1 %3601, %v1952_v15   ;;  %v3761_v15 = vld [vmem:[%s7135_s2 + $0x130] sm:$0xff]  ;;  %v3746_v48 = vpop.eup %3745 }
 0x330   :  { %2727 = vperm.xlu0 %3603, %v1953_v62   ;;  %v2356_v38 = vsub.f32 %v3761_v15, %v5530_v53  ;;  %v7826_v53 = vld [vmem:[#allocation172_spill] sm:$0xff] }
 0x331   :  { %v1989_v15 = vmul.f32 %v1917_v23, %v7826_v53  ;;  %v1668_v23 = vmul.f32 0.0051020407, %v5476_v35  ;;  %v2026_v53 = vmul.f32 %v1954_v49, %v7830_v31  ;;  %v5951_v31 = vld [vmem:[%s7135_s2 + $0x228] sm:$0xff] }
 0x332   :  { %v5898_v26 = vpop.permute.xlu0 %2477  ;;  %v5900_v25 = vpop.permute.xlu1 %2204  ;;  %7832 = vst [vmem:[#allocation173_spill] sm:$0xff] %v5951_v31 }
 0x333   :  { %7823 = vst [vmem:[#allocation202_spill] sm:$0xff] %v5898_v26  ;;  %3602 = vset.pattern.permute.xlu1 %v7810_v37 }
 0x334   :  { %3604 = vset.pattern.permute.xlu0 %v7810_v37  ;;  %3081 = vperm.xlu1 %3602, %v2355_v20  }
 0x335   :  { %3086 = vperm.xlu0 %3604, %v2356_v38  }
 0x336   :  { %v5914_v44 = vpop.permute.xlu0 %2657  ;;  %v5916_v26 = vpop.permute.xlu1 %2472 }
 0x337   :  { %7824 = vst [vmem:[#allocation203_spill] sm:$0xff] %v5914_v44  ;;  %7825 = vst [vmem:[#allocation204_spill] sm:$0xff] %v5916_v26  ;;  %v2025_v44 = vmul.f32 %v1953_v62, %v7829_v45  ;;  %v1776_v26 = vadd.f32 1e-05, %v1632_v18  ;;  %v3762_v62 = vld [vmem:[%s7135_s2 + $0x10] sm:$0xff]  ;;  %v3748_v45 = vpop.eup %3747 }
 0x338   :  { %2164 = vrot.lane.b32.xlu1 %v1989_v15, %s3796_s14  ;;  %v2320_v18 = vsub.f32 %v3762_v62, %v5570_v17  ;;  %v1812_v15 = vadd.f32 1e-05, %v1668_v23  ;;  %v1633_v17 = vmul.f32 0.0051020407, %v5478_v1 }
 0x339   :  { %2166 = vrot.lane.b32.xlu0 %v1990_v52, %s3796_s14  ;;  %v5936_v52 = vld [vmem:[%s7135_s2 + $0x108] sm:$0xff]  ;;  %3749 = vrsqrt.f32 %v1776_v26  ;;  %v1955_v26 = vmul.f32 %v3748_v45, %v5951_v31 }
 0x33a   :  { %v5924_v20 = vpop.permute.xlu0 %2138  ;;  %v5926_v38 = vpop.permute.xlu1 %2652  ;;  %3607 = vset.pattern.permute.xlu0 %v7815_v43  ;;  %7831 = vst [vmem:[#allocation174_spill] sm:$0xff] %v5936_v52  ;;  %3751 = vrsqrt.f32 %v1812_v15  ;;  %v1777_v62 = vadd.f32 1e-05, %v1633_v17 }
 0x33b   :  { %7828 = vst [vmem:[#allocation172_spill] sm:$0xff] %v5926_v38 }
 0x33c   :  { %2236 = vrot.lane.b32.xlu1 %v2025_v44, %s3796_s14  ;;  %v1919_v44 = vmul.f32 %v3746_v48, %v5936_v52  ;;  %3753 = vrsqrt.f32 %v1777_v62  ;;  %v5992_v62 = vld [vmem:[%s7135_s2 + $0x230] sm:$0xff] }
 0x33d   :  { %2238 = vrot.lane.b32.xlu0 %v2026_v53, %s3796_s14 }
 0x33e   :  { %v5943_v2 = vpop.permute.xlu0 %2210  ;;  %v5945_v35 = vpop.permute.xlu1 %2136 }
 0x340   :  { %2906 = vperm.xlu1 %3602, %v2320_v18   ;;  %v1669_v18 = vmul.f32 0.0051020407, %v5487_v59 }
 0x341   :  { %2557 = vperm.xlu0 %3607, %v1919_v44  }
 0x342   :  { %v5953_v53 = vpop.permute.xlu0 %2487  ;;  %v5955_v38 = vpop.permute.xlu1 %2208  ;;  %v1813_v59 = vadd.f32 1e-05, %v1669_v18 }
 0x343   :  { %7833 = vst [vmem:[#allocation175_spill] sm:$0xff] %v5953_v53  ;;  %v3763_v53 = vld [vmem:[%s7135_s2 + $0x20] sm:$0xff]  ;;  %v3750_v1 = vpop.eup %3749 }
 0x344   :  { %3605 = vset.pattern.permute.xlu1 %v7815_v43  ;;  %v2322_v15 = vsub.f32 %v3763_v53, %v5568_v24  ;;  %v3764_v24 = vld [vmem:[%s7135_s2 + $0x140] sm:$0xff]  ;;  %v3752_v31 = vpop.eup %3751  ;;  %3755 = vrsqrt.f32 %v1813_v59  ;;  %v7837_v59 = vld [vmem:[#allocation176_spill] sm:$0xff] }
 0x345   :  { %2737 = vperm.xlu0 %3607, %v1955_v26   ;;  %2552 = vperm.xlu1 %3605, %v1918_v14   ;;  %v5973_v14 = vld [vmem:[%s7135_s2 + $0x110] sm:$0xff]  ;;  %v2358_v53 = vsub.f32 %v3764_v24, %v5576_v9  ;;  %v1956_v24 = vmul.f32 %v3752_v31, %v5992_v62 }
 0x346   :  { %v5960_v23 = vpop.permute.xlu0 %2667  ;;  %v5962_v48 = vpop.permute.xlu1 %2482 }
 0x347   :  { %7834 = vst [vmem:[#allocation205_spill] sm:$0xff] %v5960_v23  ;;  %7835 = vst [vmem:[#allocation206_spill] sm:$0xff] %v5962_v48  ;;  %v1920_v48 = vmul.f32 %v3750_v1, %v5973_v14  ;;  %v3754_v52 = vpop.eup %3753 }
 0x349   :  { %3608 = vset.pattern.permute.xlu0 %v7810_v37  ;;  %2732 = vperm.xlu1 %3605, %v1954_v49   ;;  %v3765_v49 = vld [vmem:[%s7135_s2 + $0x18] sm:$0xff]  ;;  %v1992_v1 = vmul.f32 %v1920_v48, %v5153_v54 }
 0x34a   :  { %v5975_v45 = vpop.permute.xlu0 %2142  ;;  %2916 = vperm.xlu0 %3608, %v2322_v15   ;;  %v5977_v17 = vpop.permute.xlu1 %2662  ;;  %v2321_v23 = vsub.f32 %v3765_v49, %v5579_v3  ;;  %v3766_v3 = vld [vmem:[%s7135_s2 + $0x138] sm:$0xff] }
 0x34b   :  { %7836 = vst [vmem:[#allocation207_spill] sm:$0xff] %v5977_v17  ;;  %v2357_v15 = vsub.f32 %v3766_v3, %v5594_v4  ;;  %v1991_v17 = vmul.f32 %v1919_v44, %v7837_v59  ;;  %v6015_v54 = vld [vmem:[%s7135_s2 + $0x118] sm:$0xff]  ;;  %v2027_v44 = vmul.f32 %v1955_v26, %v5151_v27 }
 0x34d   :  { %3606 = vset.pattern.permute.xlu1 %v7810_v37 }
 0x34e   :  { %v5994_v18 = vpop.permute.xlu0 %2214  ;;  %3096 = vperm.xlu0 %3608, %v2358_v53   ;;  %2911 = vperm.xlu1 %3606, %v2321_v23   ;;  %v5996_v9 = vpop.permute.xlu1 %2140  ;;  %v2028_v23 = vmul.f32 %v1956_v24, %v5165_v63  ;;  %v1921_v63 = vmul.f32 %v3754_v52, %v6015_v54  ;;  %v3767_v52 = vld [vmem:[%s7135_s2 + $0x30] sm:$0xff] }
 0x34f   :  { %v3756_v3 = vpop.eup %3755  ;;  %v2324_v26 = vsub.f32 %v3767_v52, %v5620_v61 }
 0x352   :  { %v6004_v49 = vpop.permute.xlu0 %2497  ;;  %2170 = vrot.lane.b32.xlu0 %v1992_v1, %s3796_s14  ;;  %3091 = vperm.xlu1 %3606, %v2357_v15   ;;  %v6007_v53 = vpop.permute.xlu1 %2212  ;;  %v6029_v15 = vld [vmem:[%s7135_s2 + $0x238] sm:$0xff] }
 0x353   :  { %3611 = vset.pattern.permute.xlu0 %v7815_v43 }
 0x356   :  { %v6017_v4 = vpop.permute.xlu0 %2677  ;;  %2242 = vrot.lane.b32.xlu0 %v2028_v23, %s3796_s14  ;;  %2168 = vrot.lane.b32.xlu1 %v1991_v17, %s3796_s14  ;;  %v6021_v31 = vpop.permute.xlu1 %2492  ;;  %v1957_v23 = vmul.f32 %v3756_v3, %v6029_v15 }
 0x357   :  { %7838 = vst [vmem:[#allocation176_spill] sm:$0xff] %v6017_v4  ;;  %3609 = vset.pattern.permute.xlu1 %v7815_v43  ;;  %v3769_v4 = vld [vmem:[%s7135_s2 + $0x28] sm:$0xff] }
 0x358   :  { %v2323_v61 = vsub.f32 %v3769_v4, %v5631_v42 }
 0x35a   :  { %v6031_v1 = vpop.permute.xlu0 %2146  ;;  %2567 = vperm.xlu0 %3611, %v1921_v63   ;;  %2240 = vrot.lane.b32.xlu1 %v2027_v44, %s3796_s14  ;;  %v6034_v17 = vpop.permute.xlu1 %2672 }
 0x35e   :  { %v6037_v43 = vpop.permute.xlu0 %2218  ;;  %2747 = vperm.xlu0 %3611, %v1957_v23   ;;  %2562 = vperm.xlu1 %3609, %v1920_v48   ;;  %v6039_v27 = vpop.permute.xlu1 %2144  ;;  %v3768_v48 = vld [vmem:[%s7135_s2 + $0x150] sm:$0xff] }
 0x35f   :  { %v2360_v3 = vsub.f32 %v3768_v48, %v5628_v55  ;;  %v3771_v48 = vld [vmem:[%s7135_s2 + $0x148] sm:$0xff] }
 0x360   :  { %v2359_v42 = vsub.f32 %v3771_v48, %v5646_v30  ;;  %v3773_v30 = vld [vmem:[%s7135_s2 + $0x50] sm:$0xff] }
 0x362   :  { %v6045_v59 = vpop.permute.xlu0 %2507  ;;  %3612 = vset.pattern.permute.xlu0 %v7810_v37  ;;  %2742 = vperm.xlu1 %3609, %v1956_v24   ;;  %v6048_v44 = vpop.permute.xlu1 %2216 }
 0x363   :  { %2926 = vperm.xlu0 %3612, %v2324_v26   ;;  %v3770_v26 = vld [vmem:[%s7135_s2 + $0x40] sm:$0xff] }
 0x364   :  { %v2326_v55 = vsub.f32 %v3770_v26, %v5672_v19  ;;  %v1993_v26 = vmul.f32 %v1921_v63, %v5167_v6  ;;  %v3774_v6 = vld [vmem:[%s7135_s2 + $0x170] sm:$0xff] }
 0x365   :  { %v2364_v63 = vsub.f32 %v3774_v6, %v5732_v56  ;;  %v3777_v56 = vld [vmem:[%s7135_s2 + $0x158] sm:$0xff] }
 0x366   :  { %v6058_v52 = vpop.permute.xlu0 %2687  ;;  %3610 = vset.pattern.permute.xlu1 %v7810_v37  ;;  %v6061_v24 = vpop.permute.xlu1 %2502  ;;  %v3772_v37 = vld [vmem:[%s7135_s2 + $0x160] sm:$0xff] }
 0x367   :  { %7839 = vst [vmem:[#allocation208_spill] sm:$0xff] %v6058_v52  ;;  %3106 = vperm.xlu0 %3612, %v2360_v3   ;;  %2921 = vperm.xlu1 %3610, %v2323_v61   ;;  %v2362_v3 = vsub.f32 %v3772_v37, %v5680_v33  ;;  %v2029_v33 = vmul.f32 %v1957_v23, %v5179_v40  ;;  %v3775_v37 = vld [vmem:[%s7135_s2 + $0x38] sm:$0xff]  ;;  %v3776_v40 = vld [vmem:[%s7135_s2 + $0x60] sm:$0xff] }
 0x368   :  { %v2330_v23 = vsub.f32 %v3776_v40, %v5775_v10  ;;  %v3779_v10 = vld [vmem:[%s7135_s2 + $0x48] sm:$0xff] }
 0x36a   :  { %v6071_v4 = vpop.permute.xlu0 %2150  ;;  %v6073_v52 = vpop.permute.xlu1 %2682 }
 0x36b   :  { %2936 = vperm.xlu0 %3612, %v2326_v55   ;;  %3101 = vperm.xlu1 %3610, %v2359_v42   ;;  %v2328_v55 = vsub.f32 %v3773_v30, %v5724_v47  ;;  %v2325_v47 = vsub.f32 %v3775_v37, %v5683_v32  ;;  %v2361_v30 = vsub.f32 %v3777_v56, %v5698_v8 }
 0x36e   :  { %v6079_v61 = vpop.permute.xlu0 %2222  ;;  %v6081_v19 = vpop.permute.xlu1 %2148 }
 0x36f   :  { %3116 = vperm.xlu0 %3612, %v2362_v3   ;;  %2172 = vrot.lane.b32.xlu1 %v1993_v26, %s3796_s14 }
 0x372   :  { %v6089_v48 = vpop.permute.xlu0 %2517  ;;  %v6091_v42 = vpop.permute.xlu1 %2220 }
 0x373   :  { %2946 = vperm.xlu0 %3612, %v2328_v55   ;;  %2244 = vrot.lane.b32.xlu1 %v2029_v33, %s3796_s14  ;;  %v3778_v33 = vld [vmem:[%s7135_s2 + $0x180] sm:$0xff] }
 0x374   :  { %v2366_v6 = vsub.f32 %v3778_v33, %v5783_v7  ;;  %v3781_v7 = vld [vmem:[%s7135_s2 + $0x168] sm:$0xff] }
 0x376   :  { %v6103_v3 = vpop.permute.xlu0 %2697  ;;  %v6105_v26 = vpop.permute.xlu1 %2512 }
 0x377   :  { %3126 = vperm.xlu0 %3612, %v2364_v63   ;;  %2931 = vperm.xlu1 %3610, %v2325_v47   ;;  %v2327_v63 = vsub.f32 %v3779_v10, %v5735_v41  ;;  %v3780_v47 = vld [vmem:[%s7135_s2 + $0x70] sm:$0xff] }
 0x378   :  { %v2332_v40 = vsub.f32 %v3780_v47, %v5817_v57  ;;  %v3783_v57 = vld [vmem:[%s7135_s2 + $0x58] sm:$0xff] }
 0x37a   :  { %v6115_v55 = vpop.permute.xlu0 %2154  ;;  %v6117_v32 = vpop.permute.xlu1 %2692 }
 0x37b   :  { %2956 = vperm.xlu0 %3612, %v2330_v23   ;;  %3111 = vperm.xlu1 %3610, %v2361_v30   ;;  %v2363_v23 = vsub.f32 %v3781_v7, %v5749_v22  ;;  %v3782_v30 = vld [vmem:[%s7135_s2 + $0x190] sm:$0xff] }
 0x37c   :  { %v2368_v33 = vsub.f32 %v3782_v30, %v5833_v21  ;;  %v3785_v21 = vld [vmem:[%s7135_s2 + $0x178] sm:$0xff] }
 0x37e   :  { %v6127_v37 = vpop.permute.xlu0 %2226  ;;  %v6129_v8 = vpop.permute.xlu1 %2152 }
 0x37f   :  { %3136 = vperm.xlu0 %3612, %v2366_v6   ;;  %2941 = vperm.xlu1 %3610, %v2327_v63   ;;  %v2329_v6 = vsub.f32 %v3783_v57, %v5786_v39  ;;  %v3784_v63 = vld [vmem:[%s7135_s2 + $0x80] sm:$0xff] }
 0x380   :  { %v2334_v47 = vsub.f32 %v3784_v63, %v5872_v60  ;;  %v3787_v60 = vld [vmem:[%s7135_s2 + $0x68] sm:$0xff] }
 0x381   :  { %v3788_v63 = vld [vmem:[%s7135_s2 + $0x188] sm:$0xff] }
 0x382   :  { %v6139_v56 = vpop.permute.xlu0 %2527  ;;  %v6141_v41 = vpop.permute.xlu1 %2224 }
 0x383   :  { %2966 = vperm.xlu0 %3612, %v2332_v40   ;;  %3121 = vperm.xlu1 %3610, %v2363_v23   ;;  %v2365_v40 = vsub.f32 %v3785_v21, %v5799_v46  ;;  %v3786_v23 = vld [vmem:[%s7135_s2 + $0x1a0] sm:$0xff] }
 0x384   :  { %v2370_v30 = vsub.f32 %v3786_v23, %v5884_v13  ;;  %v2367_v13 = vsub.f32 %v3788_v63, %v5850_v50  ;;  %v7842_v23 = vld [vmem:[#allocation120_spill] sm:$0xff]  ;;  %v7843_v63 = vld [vmem:[#allocation119_spill] sm:$0xff] }
 0x386   :  { %v6151_v10 = vpop.permute.xlu0 %2707  ;;  %v6153_v22 = vpop.permute.xlu1 %2522 }
 0x387   :  { %3146 = vperm.xlu0 %3612, %v2368_v33   ;;  %2951 = vperm.xlu1 %3610, %v2329_v6   ;;  %v2331_v33 = vsub.f32 %v3787_v60, %v5836_v58  ;;  %v2336_v6 = vsub.f32 %v5507_v11, %v5924_v20  ;;  %v2372_v11 = vsub.f32 %v5518_v0, %v5943_v2  ;;  %v3789_v20 = vld [vmem:[%s7135_s2 + $0x78] sm:$0xff]  ;;  %v7845_v2 = vld [vmem:[#allocation3_spill] sm:$0xff] }
 0x388   :  { %v2333_v50 = vsub.f32 %v3789_v20, %v5886_v16  ;;  %v2338_v0 = vsub.f32 %v5553_v51, %v5975_v45  ;;  %v2374_v51 = vsub.f32 %v5564_v12, %v5994_v18  ;;  %v7847_v45 = vld [vmem:[#allocation6_spill] sm:$0xff] }
 0x38a   :  { %v6163_v7 = vpop.permute.xlu0 %2158  ;;  %v6165_v39 = vpop.permute.xlu1 %2702 }
 0x38b   :  { %2976 = vperm.xlu0 %3612, %v2334_v47   ;;  %3131 = vperm.xlu1 %3610, %v2365_v40   ;;  %v7840_v40 = vld [vmem:[#allocation118_spill] sm:$0xff] }
 0x38e   :  { %v6175_v57 = vpop.permute.xlu0 %2230  ;;  %v6177_v46 = vpop.permute.xlu1 %2156 }
 0x38f   :  { %3156 = vperm.xlu0 %3612, %v2370_v30   ;;  %2961 = vperm.xlu1 %3610, %v2331_v33  }
 0x392   :  { %v2538_v47 = vpop.permute.xlu0 %2537  ;;  %v6185_v21 = vpop.permute.xlu1 %2228 }
 0x393   :  { %v6188_v58 = vmul.f32 %v2538_v47, %v7840_v40  ;;  %v6191_v60 = vmul.f32 %v2538_v47, %v7842_v23  ;;  %2986 = vperm.xlu0 %3612, %v2336_v6   ;;  %3141 = vperm.xlu1 %3610, %v2367_v13   ;;  %v2822_v6 = vmul.f32 %v5499_v5, %v7845_v2  ;;  %v7846_v13 = vld [vmem:[#allocation5_spill] sm:$0xff] }
 0x394   :  { %v2823_v16 = vmul.f32 %v5499_v5, %v7846_v13  ;;  %v3790_v23 = vld [vmem:[%s7135_s2 + $0x198] sm:$0xff]  ;;  %v7848_v5 = vld [vmem:[#allocation8_spill] sm:$0xff] }
 0x395   :  { %7841 = vst [vmem:[#allocation118_spill] sm:$0xff] %v6188_v58  ;;  %v7844_v58 = vld [vmem:[#allocation121_spill] sm:$0xff]  ;;  %v2369_v20 = vsub.f32 %v3790_v23, %v5900_v25  ;;  %v2753_v2 = vmul.f32 %v5513_v36, %v7848_v5  ;;  %v3791_v25 = vld [vmem:[%s7135_s2 + $0x88] sm:$0xff] }
 0x396   :  { %v2718_v30 = vpop.permute.xlu0 %2717  ;;  %v6199_v33 = vpop.permute.xlu1 %2532  ;;  %v2335_v13 = vsub.f32 %v3791_v25, %v5945_v35  ;;  %v3792_v35 = vld [vmem:[%s7135_s2 + $0x1a8] sm:$0xff]  ;;  %v3793_v5 = vld [vmem:[%s7135_s2 + $0x98] sm:$0xff] }
 0x397   :  { %v6202_v40 = vmul.f32 %v2718_v30, %v7843_v63  ;;  %v6205_v47 = vmul.f32 %v2718_v30, %v7844_v58  ;;  %3166 = vperm.xlu0 %3612, %v2372_v11   ;;  %2971 = vperm.xlu1 %3610, %v2333_v50   ;;  %v2752_v30 = vmul.f32 %v5513_v36, %v7847_v45  ;;  %v7853_v45 = vld [vmem:[#allocation183_spill] sm:$0xff] }
 0x398   :  { %v2371_v23 = vsub.f32 %v3792_v35, %v5955_v38  ;;  %v7855_v35 = vld [vmem:[#allocation122_spill] sm:$0xff] }
 0x39a   :  { %v6217_v63 = vpop.permute.xlu1 %2712 }
 0x39b   :  { %v3077_v58 = vpop.permute.xlu0 %3076  ;;  %2996 = vperm.xlu0 %3612, %v2338_v0   ;;  %3151 = vperm.xlu1 %3610, %v2369_v20  }
 0x39c   :  { %v3326_v11 = vadd.f32 %v3077_v58, %v2822_v6  ;;  %v3327_v50 = vadd.f32 %v3077_v58, %v2823_v16  ;;  %v7849_v6 = vld [vmem:[#allocation149_spill] sm:$0xff] }
 0x39d   :  { %v2340_v16 = vsub.f32 %v7849_v6, %v6031_v1  ;;  %v7850_v1 = vld [vmem:[#allocation2_spill] sm:$0xff] }
 0x39e   :  { %3470 = vst [vmem:[%s7136_s3 + $0x240] sm:$0xff] %v3326_v11  ;;  %3471 = vst.msk [vmem:[%s7136_s3 + $0x248] sm:$0xff] %vm661_vm1, %v3327_v50  ;;  %v6236_v12 = vpop.permute.xlu1 %2160  ;;  %v7851_v11 = vld [vmem:[#allocation146_spill] sm:$0xff] }
 0x39f   :  { %3176 = vperm.xlu0 %3612, %v2374_v51   ;;  %v2902_v18 = vpop.permute.xlu0 %2901  ;;  %2981 = vperm.xlu1 %3610, %v2335_v13   ;;  %v2750_v50 = vmul.f32 %v7851_v11, %v7850_v1  ;;  %v7852_v51 = vld [vmem:[#allocation4_spill] sm:$0xff] }
 0x3a0   :  { %v3256_v36 = vadd.f32 %v2902_v18, %v2752_v30  ;;  %v3257_v0 = vadd.f32 %v2902_v18, %v2753_v2  ;;  %v2751_v38 = vmul.f32 %v7851_v11, %v7852_v51  ;;  %v2376_v30 = vsub.f32 %v7853_v45, %v6037_v43 }
 0x3a1   :  { %v2337_v2 = vsub.f32 %v3793_v5, %v5996_v9  ;;  %v3794_v9 = vld [vmem:[%s7135_s2 + $0x1b8] sm:$0xff] }
 0x3a2   :  { %3400 = vst [vmem:[%s7136_s3 + $0x10] sm:$0xff] %v3256_v36  ;;  %3401 = vst.msk [vmem:[%s7136_s3 + $0x18] sm:$0xff] %vm661_vm1, %v3257_v0  ;;  %v6251_v20 = vpop.permute.xlu1 %2232  ;;  %v7854_v0 = vld [vmem:[#allocation184_spill] sm:$0xff]  ;;  %v2373_v43 = vsub.f32 %v3794_v9, %v6007_v53  ;;  %v7861_v53 = vld [vmem:[#allocation150_spill] sm:$0xff] }
 0x3a3   :  { %3006 = vperm.xlu0 %3612, %v2340_v16   ;;  %v6253_v58 = vpop.permute.xlu0 %2162  ;;  %3161 = vperm.xlu1 %3610, %v2371_v23   ;;  %v2342_v6 = vsub.f32 %v7854_v0, %v6071_v4  ;;  %v7856_v4 = vld [vmem:[#allocation124_spill] sm:$0xff]  ;;  %v7863_v0 = vld [vmem:[#allocation125_spill] sm:$0xff] }
 0x3a6   :  { %v2897_v25 = vpop.permute.xlu1 %2896 }
 0x3a7   :  { %v3254_v13 = vadd.f32 %v2897_v25, %v2750_v50  ;;  %v3255_v18 = vadd.f32 %v2897_v25, %v2751_v38  ;;  %3186 = vperm.xlu0 %3612, %v2376_v30   ;;  %v6265_v36 = vpop.permute.xlu0 %2234  ;;  %2991 = vperm.xlu1 %3610, %v2337_v2   ;;  %v7857_v50 = vld [vmem:[#allocation126_spill] sm:$0xff]  ;;  %v7858_v38 = vld [vmem:[#allocation128_spill] sm:$0xff]  ;;  %v7860_v30 = vld [vmem:[#allocation187_spill] sm:$0xff]  ;;  %v2339_v2 = vsub.f32 %v7861_v53, %v6039_v27 }
 0x3a8   :  { %v2378_v5 = vsub.f32 %v7860_v30, %v6079_v61  ;;  %v7868_v61 = vld [vmem:[#allocation188_spill] sm:$0xff]  ;;  %v7869_v27 = vld [vmem:[#allocation7_spill] sm:$0xff]  ;;  %v7871_v30 = vld [vmem:[#allocation9_spill] sm:$0xff] }
 0x3a9   :  { %3398 = vst [vmem:[%s7136_s3] sm:$0xff] %v3254_v13  ;;  %3399 = vst.msk [vmem:[%s7136_s3 + $0x8] sm:$0xff] %vm661_vm1, %v3255_v18  ;;  %v7862_v13 = vld [vmem:[#allocation123_spill] sm:$0xff] }
 0x3aa   :  { %v2543_v16 = vpop.permute.xlu1 %2542 }
 0x3ab   :  { %v6281_v23 = vmul.f32 %v2543_v16, %v7855_v35  ;;  %v6284_v1 = vmul.f32 %v2543_v16, %v7856_v4  ;;  %3016 = vperm.xlu0 %3612, %v2342_v6   ;;  %v2548_v11 = vpop.permute.xlu0 %2547  ;;  %3171 = vperm.xlu1 %3610, %v2373_v43   ;;  %v7864_v16 = vld [vmem:[#allocation127_spill] sm:$0xff]  ;;  %v7866_v4 = vld [vmem:[#allocation129_spill] sm:$0xff] }
 0x3ac   :  { %v6287_v51 = vmul.f32 %v2548_v11, %v7857_v50  ;;  %v6290_v45 = vmul.f32 %v2548_v11, %v7858_v38  ;;  %v2344_v11 = vsub.f32 %v7868_v61, %v6115_v55  ;;  %v7870_v50 = vld [vmem:[#allocation177_spill] sm:$0xff] }
 0x3ad   :  { %v2824_v38 = vmul.f32 %v7870_v50, %v7869_v27  ;;  %v2825_v53 = vmul.f32 %v7870_v50, %v7871_v30  ;;  %v7876_v27 = vld [vmem:[#allocation191_spill] sm:$0xff]  ;;  %v7877_v30 = vld [vmem:[#allocation152_spill] sm:$0xff] }
 0x3ae   :  { %7859 = vst [vmem:[#allocation120_spill] sm:$0xff] %v6290_v45  ;;  %v2723_v25 = vpop.permute.xlu1 %2722 }
 0x3af   :  { %v6297_v18 = vmul.f32 %v2723_v25, %v7862_v13  ;;  %v6300_v6 = vmul.f32 %v2723_v25, %v7863_v0  ;;  %3196 = vperm.xlu0 %3612, %v2378_v5   ;;  %v2728_v9 = vpop.permute.xlu0 %2727  ;;  %3001 = vperm.xlu1 %3610, %v2339_v2   ;;  %v7872_v25 = vld [vmem:[#allocation151_spill] sm:$0xff]  ;;  %v7874_v0 = vld [vmem:[#allocation180_spill] sm:$0xff] }
 0x3b0   :  { %v6303_v35 = vmul.f32 %v2728_v9, %v7864_v16  ;;  %v6306_v43 = vmul.f32 %v2728_v9, %v7866_v4  ;;  %v2375_v5 = vsub.f32 %v7872_v25, %v6048_v44  ;;  %v7873_v13 = vld [vmem:[#allocation11_spill] sm:$0xff]  ;;  %v2341_v44 = vsub.f32 %v7877_v30, %v6081_v19 }
 0x3b1   :  { %v2826_v16 = vmul.f32 %v7874_v0, %v7873_v13  ;;  %v7880_v13 = vld [vmem:[#allocation10_spill] sm:$0xff] }
 0x3b2   :  { %7865 = vst [vmem:[#allocation119_spill] sm:$0xff] %v6303_v35  ;;  %7867 = vst [vmem:[#allocation121_spill] sm:$0xff] %v6306_v43  ;;  %v7875_v35 = vld [vmem:[#allocation13_spill] sm:$0xff]  ;;  %v2380_v43 = vsub.f32 %v7876_v27, %v6127_v37  ;;  %v2348_v27 = vsub.f32 %v5825_v28, %v6253_v58  ;;  %v7887_v28 = vld [vmem:[#allocation168_spill] sm:$0xff] }
 0x3b3   :  { %v2827_v9 = vmul.f32 %v7874_v0, %v7875_v35  ;;  %3026 = vperm.xlu0 %3612, %v2344_v11   ;;  %v3082_v2 = vpop.permute.xlu1 %3081  ;;  %3181 = vperm.xlu1 %3610, %v2375_v5   ;;  %v7878_v35 = vld [vmem:[#allocation192_spill] sm:$0xff]  ;;  %v2382_v5 = vsub.f32 %v5770_v29, %v6175_v57 }
 0x3b4   :  { %v3328_v4 = vadd.f32 %v3082_v2, %v2824_v38  ;;  %v3329_v55 = vadd.f32 %v3082_v2, %v2825_v53  ;;  %v3087_v61 = vpop.permute.xlu0 %3086  ;;  %v2346_v11 = vsub.f32 %v7878_v35, %v6163_v7  ;;  %v7879_v38 = vld [vmem:[#allocation153_spill] sm:$0xff]  ;;  %v7883_v2 = vld [vmem:[#allocation156_spill] sm:$0xff] }
 0x3b5   :  { %v3330_v45 = vadd.f32 %v3087_v61, %v2826_v16  ;;  %v3331_v50 = vadd.f32 %v3087_v61, %v2827_v9  ;;  %v2377_v53 = vsub.f32 %v7879_v38, %v6091_v42  ;;  %v7882_v16 = vld [vmem:[#allocation12_spill] sm:$0xff]  ;;  %v2343_v7 = vsub.f32 %v7883_v2, %v6129_v8  ;;  %v7888_v38 = vld [vmem:[#allocation135_spill] sm:$0xff] }
 0x3b6   :  { %3472 = vst [vmem:[%s7136_s3 + $0x250] sm:$0xff] %v3328_v4  ;;  %3473 = vst.msk [vmem:[%s7136_s3 + $0x258] sm:$0xff] %vm661_vm1, %v3329_v55  ;;  %v7885_v57 = vld [vmem:[#allocation136_spill] sm:$0xff]  ;;  %v2384_v8 = vsub.f32 %v7887_v28, %v6265_v36  ;;  %v7893_v36 = vld [vmem:[#allocation18_spill] sm:$0xff] }
 0x3b7   :  { %3474 = vst [vmem:[%s7136_s3 + $0x260] sm:$0xff] %v3330_v45  ;;  %3475 = vst.msk [vmem:[%s7136_s3 + $0x268] sm:$0xff] %vm661_vm1, %v3331_v50  ;;  %3206 = vperm.xlu0 %3612, %v2380_v43   ;;  %v6338_v19 = vpop.permute.xlu1 %2164  ;;  %3011 = vperm.xlu1 %3610, %v2341_v44   ;;  %v7881_v43 = vld [vmem:[#allocation178_spill] sm:$0xff]  ;;  %v7886_v44 = vld [vmem:[#allocation157_spill] sm:$0xff] }
 0x3b8   :  { %v2167_v37 = vpop.permute.xlu0 %2166  ;;  %v2754_v0 = vmul.f32 %v7881_v43, %v7880_v13  ;;  %v2755_v9 = vmul.f32 %v7881_v43, %v7882_v16  ;;  %v7884_v50 = vld [vmem:[#allocation134_spill] sm:$0xff]  ;;  %v2379_v35 = vsub.f32 %v7886_v44, %v6141_v41  ;;  %v7889_v41 = vld [vmem:[#allocation137_spill] sm:$0xff] }
 0x3b9   :  { %v7890_v13 = vld [vmem:[#allocation130_spill] sm:$0xff] }
 0x3bb   :  { %3036 = vperm.xlu0 %3612, %v2346_v11   ;;  %v6344_v25 = vpop.permute.xlu1 %2236  ;;  %3191 = vperm.xlu1 %3610, %v2377_v53  }
 0x3bc   :  { %v2239_v45 = vpop.permute.xlu0 %2238 }
 0x3bf   :  { %3216 = vperm.xlu0 %3612, %v2382_v5   ;;  %v2907_v4 = vpop.permute.xlu1 %2906  ;;  %3021 = vperm.xlu1 %3610, %v2343_v7   ;;  %v7894_v7 = vld [vmem:[#allocation182_spill] sm:$0xff] }
 0x3c0   :  { %v3258_v42 = vadd.f32 %v2907_v4, %v2754_v0  ;;  %v3259_v55 = vadd.f32 %v2907_v4, %v2755_v9  ;;  %v2558_v61 = vpop.permute.xlu0 %2557  ;;  %v7891_v0 = vld [vmem:[#allocation132_spill] sm:$0xff]  ;;  %v2758_v4 = vmul.f32 %v7894_v7, %v7893_v36  ;;  %v7904_v36 = vld [vmem:[#allocation154_spill] sm:$0xff] }
 0x3c1   :  { %v6357_v29 = vmul.f32 %v2558_v61, %v7884_v50  ;;  %v6360_v30 = vmul.f32 %v2558_v61, %v7885_v57  ;;  %v7892_v9 = vld [vmem:[#allocation160_spill] sm:$0xff]  ;;  %v7897_v57 = vld [vmem:[#allocation131_spill] sm:$0xff] }
 0x3c2   :  { %3402 = vst [vmem:[%s7136_s3 + $0x20] sm:$0xff] %v3258_v42  ;;  %3403 = vst.msk [vmem:[%s7136_s3 + $0x28] sm:$0xff] %vm661_vm1, %v3259_v55  ;;  %v2345_v2 = vsub.f32 %v7892_v9, %v6177_v46  ;;  %v7895_v42 = vld [vmem:[#allocation20_spill] sm:$0xff]  ;;  %v7899_v46 = vld [vmem:[#allocation161_spill] sm:$0xff] }
 0x3c3   :  { %3046 = vperm.xlu0 %3612, %v2348_v27   ;;  %3201 = vperm.xlu1 %3610, %v2379_v35   ;;  %v2759_v55 = vmul.f32 %v7894_v7, %v7895_v42  ;;  %v7896_v27 = vld [vmem:[#allocation201_spill] sm:$0xff]  ;;  %v7902_v9 = vld [vmem:[#allocation16_spill] sm:$0xff] }
 0x3c4   :  { %v2738_v58 = vpop.permute.xlu0 %2737  ;;  %v2553_v11 = vpop.permute.xlu1 %2552  ;;  %v2350_v50 = vsub.f32 %v7896_v27, %v2167_v37  ;;  %v7898_v35 = vld [vmem:[#allocation133_spill] sm:$0xff]  ;;  %v7903_v37 = vld [vmem:[#allocation19_spill] sm:$0xff] }
 0x3c5   :  { %v6374_v53 = vmul.f32 %v2738_v58, %v7888_v38  ;;  %v6377_v5 = vmul.f32 %v2738_v58, %v7889_v41  ;;  %v6380_v43 = vmul.f32 %v2553_v11, %v7890_v13  ;;  %v6383_v16 = vmul.f32 %v2553_v11, %v7891_v0  ;;  %v7900_v41 = vld [vmem:[#allocation14_spill] sm:$0xff]  ;;  %v7901_v13 = vld [vmem:[#allocation147_spill] sm:$0xff]  ;;  %v7905_v42 = vld [vmem:[#allocation21_spill] sm:$0xff] }
 0x3c6   :  { %v2756_v0 = vmul.f32 %v7901_v13, %v7900_v41  ;;  %v2830_v7 = vmul.f32 %v7904_v36, %v7903_v37  ;;  %v7907_v41 = vld [vmem:[#allocation15_spill] sm:$0xff] }
 0x3c7   :  { %3226 = vperm.xlu0 %3612, %v2384_v8   ;;  %3031 = vperm.xlu1 %3610, %v2345_v2   ;;  %v2381_v8 = vsub.f32 %v7899_v46, %v6185_v21  ;;  %v2757_v2 = vmul.f32 %v7901_v13, %v7902_v9  ;;  %v7906_v21 = vld [vmem:[#allocation164_spill] sm:$0xff]  ;;  %v7909_v9 = vld [vmem:[#allocation17_spill] sm:$0xff] }
 0x3c8   :  { %v2733_v61 = vpop.permute.xlu1 %2732 }
 0x3c9   :  { %v6393_v44 = vmul.f32 %v2733_v61, %v7897_v57  ;;  %v6396_v28 = vmul.f32 %v2733_v61, %v7898_v35  ;;  %v2917_v58 = vpop.permute.xlu0 %2916  ;;  %v2831_v61 = vmul.f32 %v7904_v36, %v7905_v42  ;;  %v7911_v42 = vld [vmem:[#allocation171_spill] sm:$0xff] }
 0x3ca   :  { %v3262_v11 = vadd.f32 %v2917_v58, %v2758_v4  ;;  %v3263_v38 = vadd.f32 %v2917_v58, %v2759_v55  ;;  %v2347_v4 = vsub.f32 %v7906_v21, %v6236_v12  ;;  %v2386_v55 = vsub.f32 %v5912_v34, %v2239_v45  ;;  %v7910_v45 = vld [vmem:[#allocation165_spill] sm:$0xff] }
 0x3cb   :  { %3056 = vperm.xlu0 %3612, %v2350_v50   ;;  %3211 = vperm.xlu1 %3610, %v2381_v8   ;;  %v2383_v8 = vsub.f32 %v7910_v45, %v6251_v20  ;;  %v2349_v20 = vsub.f32 %v7911_v42, %v6338_v19  ;;  %v7920_v45 = vld [vmem:[#allocation26_spill] sm:$0xff] }
 0x3cc   :  { %3406 = vst [vmem:[%s7136_s3 + $0x40] sm:$0xff] %v3262_v11  ;;  %3407 = vst.msk [vmem:[%s7136_s3 + $0x48] sm:$0xff] %vm661_vm1, %v3263_v38  ;;  %v7908_v11 = vld [vmem:[#allocation179_spill] sm:$0xff] }
 0x3cd   :  { %v3097_v27 = vpop.permute.xlu0 %3096  ;;  %v2912_v50 = vpop.permute.xlu1 %2911  ;;  %v2828_v13 = vmul.f32 %v7908_v11, %v7907_v41  ;;  %v2829_v37 = vmul.f32 %v7908_v11, %v7909_v9  ;;  %v7916_v11 = vld [vmem:[#allocation143_spill] sm:$0xff] }
 0x3ce   :  { %v3334_v57 = vadd.f32 %v3097_v27, %v2830_v7  ;;  %v3335_v35 = vadd.f32 %v3097_v27, %v2831_v61  ;;  %v3260_v58 = vadd.f32 %v2912_v50, %v2756_v0  ;;  %v3261_v46 = vadd.f32 %v2912_v50, %v2757_v2  ;;  %v7913_v27 = vld [vmem:[#allocation142_spill] sm:$0xff] }
 0x3cf   :  { %3236 = vperm.xlu0 %3612, %v2386_v55   ;;  %3041 = vperm.xlu1 %3610, %v2347_v4   ;;  %v7912_v4 = vld [vmem:[#allocation200_spill] sm:$0xff] }
 0x3d0   :  { %3478 = vst [vmem:[%s7136_s3 + $0x280] sm:$0xff] %v3334_v57  ;;  %3479 = vst.msk [vmem:[%s7136_s3 + $0x288] sm:$0xff] %vm661_vm1, %v3335_v35  ;;  %v2385_v55 = vsub.f32 %v7912_v4, %v6344_v25  ;;  %v7914_v57 = vld [vmem:[#allocation144_spill] sm:$0xff] }
 0x3d1   :  { %3404 = vst [vmem:[%s7136_s3 + $0x30] sm:$0xff] %v3260_v58  ;;  %3405 = vst.msk [vmem:[%s7136_s3 + $0x38] sm:$0xff] %vm661_vm1, %v3261_v46  ;;  %v2171_v34 = vpop.permute.xlu0 %2170  ;;  %v3092_v12 = vpop.permute.xlu1 %3091  ;;  %v7915_v58 = vld [vmem:[#allocation174_spill] sm:$0xff]  ;;  %v7919_v25 = vld [vmem:[#allocation140_spill] sm:$0xff] }
 0x3d2   :  { %v2352_v38 = vsub.f32 %v5973_v14, %v2171_v34  ;;  %v3332_v0 = vadd.f32 %v3092_v12, %v2828_v13  ;;  %v3333_v2 = vadd.f32 %v3092_v12, %v2829_v37  ;;  %v7917_v13 = vld [vmem:[#allocation145_spill] sm:$0xff]  ;;  %v7918_v37 = vld [vmem:[#allocation138_spill] sm:$0xff] }
 0x3d3   :  { %3221 = vperm.xlu1 %3610, %v2383_v8   ;;  %v7921_v8 = vld [vmem:[#allocation186_spill] sm:$0xff] }
 0x3d4   :  { %3476 = vst [vmem:[%s7136_s3 + $0x270] sm:$0xff] %v3332_v0  ;;  %3477 = vst.msk [vmem:[%s7136_s3 + $0x278] sm:$0xff] %vm661_vm1, %v3333_v2  ;;  %3066 = vperm.xlu0 %3612, %v2352_v38   ;;  %v2762_v38 = vmul.f32 %v7921_v8, %v7920_v45  ;;  %v7922_v0 = vld [vmem:[#allocation28_spill] sm:$0xff] }
 0x3d5   :  { %v2243_v36 = vpop.permute.xlu0 %2242  ;;  %v2169_v7 = vpop.permute.xlu1 %2168  ;;  %v2763_v2 = vmul.f32 %v7921_v8, %v7922_v0 }
 0x3d6   :  { %v2388_v14 = vsub.f32 %v5992_v62, %v2243_v36  ;;  %v2351_v46 = vsub.f32 %v7915_v58, %v2169_v7  ;;  %v7923_v7 = vld [vmem:[#allocation173_spill] sm:$0xff]  ;;  %v7926_v58 = vld [vmem:[#allocation27_spill] sm:$0xff] }
 0x3d7   :  { %3051 = vperm.xlu1 %3610, %v2349_v20   ;;  %v7924_v20 = vld [vmem:[#allocation139_spill] sm:$0xff] }
 0x3d8   :  { %3246 = vperm.xlu0 %3612, %v2388_v14  }
 0x3d9   :  { %v2568_v61 = vpop.permute.xlu0 %2567  ;;  %v2241_v21 = vpop.permute.xlu1 %2240 }
 0x3da   :  { %v6452_v50 = vmul.f32 %v2568_v61, %v7913_v27  ;;  %v6455_v35 = vmul.f32 %v2568_v61, %v7914_v57  ;;  %v2387_v42 = vsub.f32 %v7923_v7, %v2241_v21  ;;  %v7925_v61 = vld [vmem:[#allocation141_spill] sm:$0xff]  ;;  %v7929_v21 = vld [vmem:[#allocation22_spill] sm:$0xff] }
 0x3db   :  { %3231 = vperm.xlu1 %3610, %v2385_v55  }
 0x3dd   :  { %v2748_v41 = vpop.permute.xlu0 %2747  ;;  %v2563_v19 = vpop.permute.xlu1 %2562 }
 0x3de   :  { %v6459_v62 = vmul.f32 %v2748_v41, %v7916_v11  ;;  %v6462_v9 = vmul.f32 %v2748_v41, %v7917_v13  ;;  %v6465_v34 = vmul.f32 %v2563_v19, %v7918_v37  ;;  %v6468_v12 = vmul.f32 %v2563_v19, %v7919_v25  ;;  %v7928_v19 = vld [vmem:[#allocation29_spill] sm:$0xff]  ;;  %v7930_v13 = vld [vmem:[#allocation148_spill] sm:$0xff] }
 0x3df   :  { %3061 = vperm.xlu1 %3610, %v2351_v46   ;;  %v7927_v46 = vld [vmem:[#allocation158_spill] sm:$0xff]  ;;  %v2760_v37 = vmul.f32 %v7930_v13, %v7929_v21  ;;  %v7931_v25 = vld [vmem:[#allocation24_spill] sm:$0xff] }
 0x3e0   :  { %v2834_v41 = vmul.f32 %v7927_v46, %v7926_v58  ;;  %v2835_v11 = vmul.f32 %v7927_v46, %v7928_v19  ;;  %v2761_v45 = vmul.f32 %v7930_v13, %v7931_v25  ;;  %v7936_v58 = vld [vmem:[#allocation181_spill] sm:$0xff] }
 0x3e1   :  { %v2743_v36 = vpop.permute.xlu1 %2742 }
 0x3e2   :  { %v6476_v14 = vmul.f32 %v2743_v36, %v7924_v20  ;;  %v6479_v4 = vmul.f32 %v2743_v36, %v7925_v61  ;;  %v2927_v55 = vpop.permute.xlu0 %2926  ;;  %v7933_v20 = vld [vmem:[#allocation190_spill] sm:$0xff] }
 0x3e3   :  { %v3266_v27 = vadd.f32 %v2927_v55, %v2762_v38  ;;  %v3267_v57 = vadd.f32 %v2927_v55, %v2763_v2  ;;  %3241 = vperm.xlu1 %3610, %v2387_v42   ;;  %v7932_v42 = vld [vmem:[#allocation34_spill] sm:$0xff]  ;;  %v7934_v55 = vld [vmem:[#allocation36_spill] sm:$0xff] }
 0x3e4   :  { %v2766_v61 = vmul.f32 %v7933_v20, %v7932_v42 }
 0x3e5   :  { %3410 = vst [vmem:[%s7136_s3 + $0x60] sm:$0xff] %v3266_v27  ;;  %3411 = vst.msk [vmem:[%s7136_s3 + $0x68] sm:$0xff] %vm661_vm1, %v3267_v57  ;;  %v2767_v27 = vmul.f32 %v7933_v20, %v7934_v55  ;;  %v7935_v57 = vld [vmem:[#allocation23_spill] sm:$0xff] }
 0x3e6   :  { %v3107_v8 = vpop.permute.xlu0 %3106  ;;  %v2922_v2 = vpop.permute.xlu1 %2921  ;;  %v2832_v46 = vmul.f32 %v7936_v58, %v7935_v57  ;;  %v7942_v57 = vld [vmem:[#allocation194_spill] sm:$0xff] }
 0x3e7   :  { %v3338_v38 = vadd.f32 %v3107_v8, %v2834_v41  ;;  %v3339_v0 = vadd.f32 %v3107_v8, %v2835_v11  ;;  %v3264_v36 = vadd.f32 %v2922_v2, %v2760_v37  ;;  %v3265_v7 = vadd.f32 %v2922_v2, %v2761_v45  ;;  %v7937_v41 = vld [vmem:[#allocation25_spill] sm:$0xff]  ;;  %v7938_v8 = vld [vmem:[#allocation35_spill] sm:$0xff] }
 0x3e8   :  { %v2833_v19 = vmul.f32 %v7936_v58, %v7937_v41  ;;  %v7940_v2 = vld [vmem:[#allocation37_spill] sm:$0xff] }
 0x3e9   :  { %3482 = vst [vmem:[%s7136_s3 + $0x2a0] sm:$0xff] %v3338_v38  ;;  %3483 = vst.msk [vmem:[%s7136_s3 + $0x2a8] sm:$0xff] %vm661_vm1, %v3339_v0  ;;  %v7939_v38 = vld [vmem:[#allocation162_spill] sm:$0xff] }
 0x3ea   :  { %3408 = vst [vmem:[%s7136_s3 + $0x50] sm:$0xff] %v3264_v36  ;;  %3409 = vst.msk [vmem:[%s7136_s3 + $0x58] sm:$0xff] %vm661_vm1, %v3265_v7  ;;  %v2937_v11 = vpop.permute.xlu0 %2936  ;;  %v3102_v37 = vpop.permute.xlu1 %3101  ;;  %v2838_v0 = vmul.f32 %v7939_v38, %v7938_v8  ;;  %v2839_v42 = vmul.f32 %v7939_v38, %v7940_v2  ;;  %v7946_v8 = vld [vmem:[#allocation45_spill] sm:$0xff]  ;;  %v7948_v2 = vld [vmem:[#allocation155_spill] sm:$0xff] }
 0x3eb   :  { %v3270_v21 = vadd.f32 %v2937_v11, %v2766_v61  ;;  %v3271_v13 = vadd.f32 %v2937_v11, %v2767_v27  ;;  %v3336_v25 = vadd.f32 %v3102_v37, %v2832_v46  ;;  %v3337_v45 = vadd.f32 %v3102_v37, %v2833_v19  ;;  %v7941_v27 = vld [vmem:[#allocation42_spill] sm:$0xff]  ;;  %v7943_v46 = vld [vmem:[#allocation44_spill] sm:$0xff]  ;;  %v7944_v37 = vld [vmem:[#allocation43_spill] sm:$0xff] }
 0x3ec   :  { %v2770_v58 = vmul.f32 %v7942_v57, %v7941_v27  ;;  %v2771_v41 = vmul.f32 %v7942_v57, %v7943_v46  ;;  %v7951_v46 = vld [vmem:[#allocation196_spill] sm:$0xff] }
 0x3ed   :  { %3414 = vst [vmem:[%s7136_s3 + $0x80] sm:$0xff] %v3270_v21  ;;  %3415 = vst.msk [vmem:[%s7136_s3 + $0x88] sm:$0xff] %vm661_vm1, %v3271_v13 }
 0x3ee   :  { %3480 = vst [vmem:[%s7136_s3 + $0x290] sm:$0xff] %v3336_v25  ;;  %3481 = vst.msk [vmem:[%s7136_s3 + $0x298] sm:$0xff] %vm661_vm1, %v3337_v45  ;;  %v3117_v36 = vpop.permute.xlu0 %3116  ;;  %v2173_v61 = vpop.permute.xlu1 %2172  ;;  %v7945_v25 = vld [vmem:[#allocation166_spill] sm:$0xff] }
 0x3ef   :  { %v3342_v7 = vadd.f32 %v3117_v36, %v2838_v0  ;;  %v3343_v20 = vadd.f32 %v3117_v36, %v2839_v42  ;;  %v2353_v55 = vsub.f32 %v6015_v54, %v2173_v61  ;;  %v2842_v45 = vmul.f32 %v7945_v25, %v7944_v37  ;;  %v7947_v0 = vld [vmem:[#allocation30_spill] sm:$0xff]  ;;  %v7949_v36 = vld [vmem:[#allocation32_spill] sm:$0xff]  ;;  %v7955_v37 = vld [vmem:[#allocation33_spill] sm:$0xff] }
 0x3f0   :  { %v2843_v38 = vmul.f32 %v7945_v25, %v7946_v8  ;;  %v2764_v42 = vmul.f32 %v7948_v2, %v7947_v0 }
 0x3f1   :  { %3486 = vst [vmem:[%s7136_s3 + $0x2c0] sm:$0xff] %v3342_v7  ;;  %3487 = vst.msk [vmem:[%s7136_s3 + $0x2c8] sm:$0xff] %vm661_vm1, %v3343_v20  ;;  %3071 = vperm.xlu1 %3610, %v2353_v55  }
 0x3f2   :  { %v2947_v19 = vpop.permute.xlu0 %2946  ;;  %v2245_v54 = vpop.permute.xlu1 %2244 }
 0x3f3   :  { %v3274_v11 = vadd.f32 %v2947_v19, %v2770_v58  ;;  %v3275_v21 = vadd.f32 %v2947_v19, %v2771_v41  ;;  %v2389_v13 = vsub.f32 %v6029_v15, %v2245_v54  ;;  %v2765_v15 = vmul.f32 %v7948_v2, %v7949_v36  ;;  %v7950_v58 = vld [vmem:[#allocation50_spill] sm:$0xff]  ;;  %v7952_v19 = vld [vmem:[#allocation52_spill] sm:$0xff]  ;;  %v7954_v54 = vld [vmem:[#allocation185_spill] sm:$0xff] }
 0x3f4   :  { %v2774_v41 = vmul.f32 %v7951_v46, %v7950_v58  ;;  %v2837_v25 = vmul.f32 %v7954_v54, %v7955_v37  ;;  %v7956_v36 = vld [vmem:[#allocation51_spill] sm:$0xff]  ;;  %v7961_v58 = vld [vmem:[#allocation40_spill] sm:$0xff]  ;;  %v7962_v37 = vld [vmem:[#allocation58_spill] sm:$0xff] }
 0x3f5   :  { %3418 = vst [vmem:[%s7136_s3 + $0xa0] sm:$0xff] %v3274_v11  ;;  %3419 = vst.msk [vmem:[%s7136_s3 + $0xa8] sm:$0xff] %vm661_vm1, %v3275_v21  ;;  %3251 = vperm.xlu1 %3610, %v2389_v13   ;;  %v2775_v11 = vmul.f32 %v7951_v46, %v7952_v19  ;;  %v7953_v21 = vld [vmem:[#allocation31_spill] sm:$0xff] }
 0x3f6   :  { %v3127_v7 = vpop.permute.xlu0 %3126  ;;  %v2932_v55 = vpop.permute.xlu1 %2931  ;;  %v2836_v13 = vmul.f32 %v7954_v54, %v7953_v21 }
 0x3f7   :  { %v3346_v20 = vadd.f32 %v3127_v7, %v2842_v45  ;;  %v3347_v61 = vadd.f32 %v3127_v7, %v2843_v38  ;;  %v3268_v27 = vadd.f32 %v2932_v55, %v2764_v42  ;;  %v3269_v57 = vadd.f32 %v2932_v55, %v2765_v15  ;;  %v7957_v15 = vld [vmem:[#allocation197_spill] sm:$0xff]  ;;  %v7959_v55 = vld [vmem:[#allocation38_spill] sm:$0xff] }
 0x3f8   :  { %v2846_v7 = vmul.f32 %v7957_v15, %v7956_v36  ;;  %v7967_v36 = vld [vmem:[#allocation41_spill] sm:$0xff] }
 0x3f9   :  { %3490 = vst [vmem:[%s7136_s3 + $0x2e0] sm:$0xff] %v3346_v20  ;;  %3491 = vst.msk [vmem:[%s7136_s3 + $0x2e8] sm:$0xff] %vm661_vm1, %v3347_v61  ;;  %v7958_v20 = vld [vmem:[#allocation53_spill] sm:$0xff] }
 0x3fa   :  { %3412 = vst [vmem:[%s7136_s3 + $0x70] sm:$0xff] %v3268_v27  ;;  %3413 = vst.msk [vmem:[%s7136_s3 + $0x78] sm:$0xff] %vm661_vm1, %v3269_v57  ;;  %v2957_v45 = vpop.permute.xlu0 %2956  ;;  %v3112_v0 = vpop.permute.xlu1 %3111  ;;  %v2847_v61 = vmul.f32 %v7957_v15, %v7958_v20  ;;  %v7960_v27 = vld [vmem:[#allocation159_spill] sm:$0xff] }
 0x3fb   :  { %v3278_v8 = vadd.f32 %v2957_v45, %v2774_v41  ;;  %v3279_v38 = vadd.f32 %v2957_v45, %v2775_v11  ;;  %v3340_v2 = vadd.f32 %v3112_v0, %v2836_v13  ;;  %v3341_v42 = vadd.f32 %v3112_v0, %v2837_v25  ;;  %v7963_v25 = vld [vmem:[#allocation198_spill] sm:$0xff]  ;;  %v7965_v0 = vld [vmem:[#allocation39_spill] sm:$0xff] }
 0x3fc   :  { %v2768_v57 = vmul.f32 %v7960_v27, %v7959_v55  ;;  %v2769_v46 = vmul.f32 %v7960_v27, %v7961_v58  ;;  %v2778_v45 = vmul.f32 %v7963_v25, %v7962_v37  ;;  %v7968_v58 = vld [vmem:[#allocation59_spill] sm:$0xff]  ;;  %v7973_v37 = vld [vmem:[#allocation48_spill] sm:$0xff] }
 0x3fd   :  { %3422 = vst [vmem:[%s7136_s3 + $0xc0] sm:$0xff] %v3278_v8  ;;  %3423 = vst.msk [vmem:[%s7136_s3 + $0xc8] sm:$0xff] %vm661_vm1, %v3279_v38  ;;  %v7964_v8 = vld [vmem:[#allocation60_spill] sm:$0xff] }
 0x3fe   :  { %3484 = vst [vmem:[%s7136_s3 + $0x2b0] sm:$0xff] %v3340_v2  ;;  %3485 = vst.msk [vmem:[%s7136_s3 + $0x2b8] sm:$0xff] %vm661_vm1, %v3341_v42  ;;  %v3137_v41 = vpop.permute.xlu0 %3136  ;;  %v2942_v21 = vpop.permute.xlu1 %2941  ;;  %v2779_v38 = vmul.f32 %v7963_v25, %v7964_v8  ;;  %v7966_v2 = vld [vmem:[#allocation189_spill] sm:$0xff] }
 0x3ff   :  { %v3350_v19 = vadd.f32 %v3137_v41, %v2846_v7  ;;  %v3351_v11 = vadd.f32 %v3137_v41, %v2847_v61  ;;  %v3272_v54 = vadd.f32 %v2942_v21, %v2768_v57  ;;  %v3273_v13 = vadd.f32 %v2942_v21, %v2769_v46  ;;  %v7969_v46 = vld [vmem:[#allocation199_spill] sm:$0xff]  ;;  %v7971_v21 = vld [vmem:[#allocation46_spill] sm:$0xff] }
 0x400   :  { %v2840_v42 = vmul.f32 %v7966_v2, %v7965_v0  ;;  %v2841_v15 = vmul.f32 %v7966_v2, %v7967_v36  ;;  %v2850_v41 = vmul.f32 %v7969_v46, %v7968_v58  ;;  %v7974_v36 = vld [vmem:[#allocation66_spill] sm:$0xff]  ;;  %v7979_v58 = vld [vmem:[#allocation49_spill] sm:$0xff] }
 0x401   :  { %3494 = vst [vmem:[%s7136_s3 + $0x300] sm:$0xff] %v3350_v19  ;;  %3495 = vst.msk [vmem:[%s7136_s3 + $0x308] sm:$0xff] %vm661_vm1, %v3351_v11  ;;  %v7970_v19 = vld [vmem:[#allocation61_spill] sm:$0xff] }
 0x402   :  { %3416 = vst [vmem:[%s7136_s3 + $0x90] sm:$0xff] %v3272_v54  ;;  %3417 = vst.msk [vmem:[%s7136_s3 + $0x98] sm:$0xff] %vm661_vm1, %v3273_v13  ;;  %v2967_v7 = vpop.permute.xlu0 %2966  ;;  %v3122_v55 = vpop.permute.xlu1 %3121  ;;  %v2851_v11 = vmul.f32 %v7969_v46, %v7970_v19  ;;  %v7972_v54 = vld [vmem:[#allocation163_spill] sm:$0xff] }
 0x403   :  { %v3282_v20 = vadd.f32 %v2967_v7, %v2778_v45  ;;  %v3283_v61 = vadd.f32 %v2967_v7, %v2779_v38  ;;  %v3344_v27 = vadd.f32 %v3122_v55, %v2840_v42  ;;  %v3345_v57 = vadd.f32 %v3122_v55, %v2841_v15  ;;  %v7975_v15 = vld [vmem:[#allocation204_spill] sm:$0xff]  ;;  %v7977_v55 = vld [vmem:[#allocation47_spill] sm:$0xff] }
 0x404   :  { %v2772_v13 = vmul.f32 %v7972_v54, %v7971_v21  ;;  %v2773_v25 = vmul.f32 %v7972_v54, %v7973_v37  ;;  %v2782_v7 = vmul.f32 %v7975_v15, %v7974_v36  ;;  %v7980_v37 = vld [vmem:[#allocation67_spill] sm:$0xff]  ;;  %v7985_v36 = vld [vmem:[#allocation56_spill] sm:$0xff] }
 0x405   :  { %3426 = vst [vmem:[%s7136_s3 + $0xe0] sm:$0xff] %v3282_v20  ;;  %3427 = vst.msk [vmem:[%s7136_s3 + $0xe8] sm:$0xff] %vm661_vm1, %v3283_v61  ;;  %v7976_v20 = vld [vmem:[#allocation68_spill] sm:$0xff] }
 0x406   :  { %3488 = vst [vmem:[%s7136_s3 + $0x2d0] sm:$0xff] %v3344_v27  ;;  %3489 = vst.msk [vmem:[%s7136_s3 + $0x2d8] sm:$0xff] %vm661_vm1, %v3345_v57  ;;  %v3147_v45 = vpop.permute.xlu0 %3146  ;;  %v2952_v0 = vpop.permute.xlu1 %2951  ;;  %v2783_v61 = vmul.f32 %v7975_v15, %v7976_v20  ;;  %v7978_v27 = vld [vmem:[#allocation193_spill] sm:$0xff] }
 0x407   :  { %v3354_v8 = vadd.f32 %v3147_v45, %v2850_v41  ;;  %v3355_v38 = vadd.f32 %v3147_v45, %v2851_v11  ;;  %v3276_v2 = vadd.f32 %v2952_v0, %v2772_v13  ;;  %v3277_v42 = vadd.f32 %v2952_v0, %v2773_v25  ;;  %v7981_v25 = vld [vmem:[#allocation172_spill] sm:$0xff]  ;;  %v7983_v0 = vld [vmem:[#allocation54_spill] sm:$0xff] }
 0x408   :  { %v2844_v57 = vmul.f32 %v7978_v27, %v7977_v55  ;;  %v2845_v46 = vmul.f32 %v7978_v27, %v7979_v58  ;;  %v2854_v45 = vmul.f32 %v7981_v25, %v7980_v37  ;;  %v7986_v58 = vld [vmem:[#allocation74_spill] sm:$0xff]  ;;  %v7991_v37 = vld [vmem:[#allocation57_spill] sm:$0xff] }
 0x409   :  { %3498 = vst [vmem:[%s7136_s3 + $0x320] sm:$0xff] %v3354_v8  ;;  %3499 = vst.msk [vmem:[%s7136_s3 + $0x328] sm:$0xff] %vm661_vm1, %v3355_v38  ;;  %v7982_v8 = vld [vmem:[#allocation69_spill] sm:$0xff] }
 0x40a   :  { %3420 = vst [vmem:[%s7136_s3 + $0xb0] sm:$0xff] %v3276_v2  ;;  %3421 = vst.msk [vmem:[%s7136_s3 + $0xb8] sm:$0xff] %vm661_vm1, %v3277_v42  ;;  %v2977_v41 = vpop.permute.xlu0 %2976  ;;  %v3132_v21 = vpop.permute.xlu1 %3131  ;;  %v2855_v38 = vmul.f32 %v7981_v25, %v7982_v8  ;;  %v7984_v2 = vld [vmem:[#allocation167_spill] sm:$0xff] }
 0x40b   :  { %v3286_v19 = vadd.f32 %v2977_v41, %v2782_v7  ;;  %v3287_v11 = vadd.f32 %v2977_v41, %v2783_v61  ;;  %v3348_v54 = vadd.f32 %v3132_v21, %v2844_v57  ;;  %v3349_v13 = vadd.f32 %v3132_v21, %v2845_v46  ;;  %v7987_v46 = vld [vmem:[#allocation206_spill] sm:$0xff]  ;;  %v7989_v21 = vld [vmem:[#allocation55_spill] sm:$0xff] }
 0x40c   :  { %v2776_v42 = vmul.f32 %v7984_v2, %v7983_v0  ;;  %v2777_v15 = vmul.f32 %v7984_v2, %v7985_v36  ;;  %v2786_v41 = vmul.f32 %v7987_v46, %v7986_v58  ;;  %v7992_v36 = vld [vmem:[#allocation75_spill] sm:$0xff]  ;;  %v7997_v58 = vld [vmem:[#allocation64_spill] sm:$0xff] }
 0x40d   :  { %3430 = vst [vmem:[%s7136_s3 + $0x100] sm:$0xff] %v3286_v19  ;;  %3431 = vst.msk [vmem:[%s7136_s3 + $0x108] sm:$0xff] %vm661_vm1, %v3287_v11  ;;  %v7988_v19 = vld [vmem:[#allocation76_spill] sm:$0xff] }
 0x40e   :  { %3492 = vst [vmem:[%s7136_s3 + $0x2f0] sm:$0xff] %v3348_v54  ;;  %3493 = vst.msk [vmem:[%s7136_s3 + $0x2f8] sm:$0xff] %vm661_vm1, %v3349_v13  ;;  %v3157_v7 = vpop.permute.xlu0 %3156  ;;  %v2962_v55 = vpop.permute.xlu1 %2961  ;;  %v2787_v11 = vmul.f32 %v7987_v46, %v7988_v19  ;;  %v7990_v54 = vld [vmem:[#allocation195_spill] sm:$0xff] }
 0x40f   :  { %v3358_v20 = vadd.f32 %v3157_v7, %v2854_v45  ;;  %v3359_v61 = vadd.f32 %v3157_v7, %v2855_v38  ;;  %v3280_v27 = vadd.f32 %v2962_v55, %v2776_v42  ;;  %v3281_v57 = vadd.f32 %v2962_v55, %v2777_v15  ;;  %v7993_v15 = vld [vmem:[#allocation207_spill] sm:$0xff]  ;;  %v7995_v55 = vld [vmem:[#allocation62_spill] sm:$0xff] }
 0x410   :  { %v2848_v13 = vmul.f32 %v7990_v54, %v7989_v21  ;;  %v2849_v25 = vmul.f32 %v7990_v54, %v7991_v37  ;;  %v2858_v7 = vmul.f32 %v7993_v15, %v7992_v36  ;;  %v7998_v37 = vld [vmem:[#allocation82_spill] sm:$0xff] }
 0x411   :  { %3502 = vst [vmem:[%s7136_s3 + $0x340] sm:$0xff] %v3358_v20  ;;  %3503 = vst.msk [vmem:[%s7136_s3 + $0x348] sm:$0xff] %vm661_vm1, %v3359_v61  ;;  %v7994_v20 = vld [vmem:[#allocation77_spill] sm:$0xff] }
 0x412   :  { %3424 = vst [vmem:[%s7136_s3 + $0xd0] sm:$0xff] %v3280_v27  ;;  %3425 = vst.msk [vmem:[%s7136_s3 + $0xd8] sm:$0xff] %vm661_vm1, %v3281_v57  ;;  %v2987_v45 = vpop.permute.xlu0 %2986  ;;  %v3142_v0 = vpop.permute.xlu1 %3141  ;;  %v2859_v61 = vmul.f32 %v7993_v15, %v7994_v20  ;;  %v7996_v27 = vld [vmem:[#allocation169_spill] sm:$0xff] }
 0x413   :  { %v3290_v8 = vadd.f32 %v2987_v45, %v2786_v41  ;;  %v3291_v38 = vadd.f32 %v2987_v45, %v2787_v11  ;;  %v3352_v2 = vadd.f32 %v3142_v0, %v2848_v13  ;;  %v3353_v42 = vadd.f32 %v3142_v0, %v2849_v25  ;;  %v7999_v45 = vld [vmem:[#allocation84_spill] sm:$0xff]  ;;  %v8001_v0 = vld [vmem:[#allocation170_spill] sm:$0xff] }
 0x414   :  { %v2780_v57 = vmul.f32 %v7996_v27, %v7995_v55  ;;  %v2781_v46 = vmul.f32 %v7996_v27, %v7997_v58  ;;  %v2790_v25 = vmul.f32 %v6021_v31, %v7998_v37  ;;  %v8003_v27 = vld [vmem:[#allocation83_spill] sm:$0xff]  ;;  %v8004_v58 = vld [vmem:[#allocation85_spill] sm:$0xff] }
 0x415   :  { %3434 = vst [vmem:[%s7136_s3 + $0x120] sm:$0xff] %v3290_v8  ;;  %3435 = vst.msk [vmem:[%s7136_s3 + $0x128] sm:$0xff] %vm661_vm1, %v3291_v38  ;;  %v2791_v8 = vmul.f32 %v6021_v31, %v7999_v45  ;;  %v8000_v38 = vld [vmem:[#allocation63_spill] sm:$0xff] }
 0x416   :  { %3496 = vst [vmem:[%s7136_s3 + $0x310] sm:$0xff] %v3352_v2  ;;  %3497 = vst.msk [vmem:[%s7136_s3 + $0x318] sm:$0xff] %vm661_vm1, %v3353_v42  ;;  %v3167_v41 = vpop.permute.xlu0 %3166  ;;  %v2972_v21 = vpop.permute.xlu1 %2971  ;;  %v2852_v2 = vmul.f32 %v8001_v0, %v8000_v38  ;;  %v8002_v42 = vld [vmem:[#allocation65_spill] sm:$0xff]  ;;  %v8008_v38 = vld [vmem:[#allocation90_spill] sm:$0xff] }
 0x417   :  { %v3362_v19 = vadd.f32 %v3167_v41, %v2858_v7  ;;  %v3363_v11 = vadd.f32 %v3167_v41, %v2859_v61  ;;  %v3284_v54 = vadd.f32 %v2972_v21, %v2780_v57  ;;  %v3285_v13 = vadd.f32 %v2972_v21, %v2781_v46  ;;  %v8005_v41 = vld [vmem:[#allocation70_spill] sm:$0xff]  ;;  %v8007_v21 = vld [vmem:[#allocation72_spill] sm:$0xff] }
 0x418   :  { %v2853_v36 = vmul.f32 %v8001_v0, %v8002_v42  ;;  %v2862_v57 = vmul.f32 %v6034_v17, %v8003_v27  ;;  %v2863_v46 = vmul.f32 %v6034_v17, %v8004_v58  ;;  %v2794_v0 = vmul.f32 %v6061_v24, %v8008_v38 }
 0x419   :  { %3506 = vst [vmem:[%s7136_s3 + $0x360] sm:$0xff] %v3362_v19  ;;  %3507 = vst.msk [vmem:[%s7136_s3 + $0x368] sm:$0xff] %vm661_vm1, %v3363_v11  ;;  %v8006_v19 = vld [vmem:[#allocation202_spill] sm:$0xff] }
 0x41a   :  { %3428 = vst [vmem:[%s7136_s3 + $0xf0] sm:$0xff] %v3284_v54  ;;  %3429 = vst.msk [vmem:[%s7136_s3 + $0xf8] sm:$0xff] %vm661_vm1, %v3285_v13  ;;  %v2997_v31 = vpop.permute.xlu0 %2996  ;;  %v3152_v20 = vpop.permute.xlu1 %3151  ;;  %v2784_v11 = vmul.f32 %v8006_v19, %v8005_v41  ;;  %v2785_v54 = vmul.f32 %v8006_v19, %v8007_v21  ;;  %v8014_v19 = vld [vmem:[#allocation93_spill] sm:$0xff]  ;;  %v8015_v21 = vld [vmem:[#allocation78_spill] sm:$0xff] }
 0x41b   :  { %v3294_v15 = vadd.f32 %v2997_v31, %v2790_v25  ;;  %v3295_v7 = vadd.f32 %v2997_v31, %v2791_v8  ;;  %v3356_v61 = vadd.f32 %v3152_v20, %v2852_v2  ;;  %v3357_v55 = vadd.f32 %v3152_v20, %v2853_v36  ;;  %v8009_v2 = vld [vmem:[#allocation92_spill] sm:$0xff]  ;;  %v8010_v36 = vld [vmem:[#allocation71_spill] sm:$0xff] }
 0x41c   :  { %v2795_v42 = vmul.f32 %v6061_v24, %v8009_v2  ;;  %v8011_v31 = vld [vmem:[#allocation203_spill] sm:$0xff]  ;;  %v8018_v2 = vld [vmem:[#allocation98_spill] sm:$0xff] }
 0x41d   :  { %3438 = vst [vmem:[%s7136_s3 + $0x140] sm:$0xff] %v3294_v15  ;;  %3439 = vst.msk [vmem:[%s7136_s3 + $0x148] sm:$0xff] %vm661_vm1, %v3295_v7  ;;  %v2856_v15 = vmul.f32 %v8011_v31, %v8010_v36  ;;  %v8012_v7 = vld [vmem:[#allocation73_spill] sm:$0xff]  ;;  %v8019_v36 = vld [vmem:[#allocation100_spill] sm:$0xff] }
 0x41e   :  { %3500 = vst [vmem:[%s7136_s3 + $0x330] sm:$0xff] %v3356_v61  ;;  %3501 = vst.msk [vmem:[%s7136_s3 + $0x338] sm:$0xff] %vm661_vm1, %v3357_v55  ;;  %v3177_v17 = vpop.permute.xlu0 %3176  ;;  %v2982_v25 = vpop.permute.xlu1 %2981  ;;  %v2857_v20 = vmul.f32 %v8011_v31, %v8012_v7  ;;  %v2799_v31 = vmul.f32 %v6105_v26, %v8019_v36  ;;  %v8021_v7 = vld [vmem:[#allocation205_spill] sm:$0xff]  ;;  %v8029_v36 = vld [vmem:[#allocation87_spill] sm:$0xff] }
 0x41f   :  { %v3366_v13 = vadd.f32 %v3177_v17, %v2862_v57  ;;  %v3367_v37 = vadd.f32 %v3177_v17, %v2863_v46  ;;  %v3288_v45 = vadd.f32 %v2982_v25, %v2784_v11  ;;  %v3289_v8 = vadd.f32 %v2982_v25, %v2785_v54  ;;  %v8013_v46 = vld [vmem:[#allocation91_spill] sm:$0xff] }
 0x420   :  { %v2866_v41 = vmul.f32 %v6073_v52, %v8013_v46  ;;  %v2867_v11 = vmul.f32 %v6073_v52, %v8014_v19  ;;  %v8016_v54 = vld [vmem:[#allocation175_spill] sm:$0xff] }
 0x421   :  { %3510 = vst [vmem:[%s7136_s3 + $0x380] sm:$0xff] %v3366_v13  ;;  %3511 = vst.msk [vmem:[%s7136_s3 + $0x388] sm:$0xff] %vm661_vm1, %v3367_v37  ;;  %v2788_v17 = vmul.f32 %v8016_v54, %v8015_v21  ;;  %v8017_v13 = vld [vmem:[#allocation80_spill] sm:$0xff] }
 0x422   :  { %3432 = vst [vmem:[%s7136_s3 + $0x110] sm:$0xff] %v3288_v45  ;;  %3433 = vst.msk [vmem:[%s7136_s3 + $0x118] sm:$0xff] %vm661_vm1, %v3289_v8  ;;  %v3007_v24 = vpop.permute.xlu0 %3006  ;;  %v3162_v27 = vpop.permute.xlu1 %3161  ;;  %v2789_v37 = vmul.f32 %v8016_v54, %v8017_v13  ;;  %v8025_v54 = vld [vmem:[#allocation86_spill] sm:$0xff]  ;;  %v8026_v13 = vld [vmem:[#allocation88_spill] sm:$0xff] }
 0x423   :  { %v3298_v61 = vadd.f32 %v3007_v24, %v2794_v0  ;;  %v3299_v55 = vadd.f32 %v3007_v24, %v2795_v42  ;;  %v3360_v57 = vadd.f32 %v3162_v27, %v2856_v15  ;;  %v3361_v58 = vadd.f32 %v3162_v27, %v2857_v20  ;;  %v8020_v15 = vld [vmem:[#allocation79_spill] sm:$0xff]  ;;  %v8022_v24 = vld [vmem:[#allocation81_spill] sm:$0xff] }
 0x424   :  { %v2798_v42 = vmul.f32 %v6105_v26, %v8018_v2  ;;  %v2860_v20 = vmul.f32 %v8021_v7, %v8020_v15 }
 0x425   :  { %3442 = vst [vmem:[%s7136_s3 + $0x160] sm:$0xff] %v3298_v61  ;;  %3443 = vst.msk [vmem:[%s7136_s3 + $0x168] sm:$0xff] %vm661_vm1, %v3299_v55  ;;  %v2861_v61 = vmul.f32 %v8021_v7, %v8022_v24  ;;  %v8031_v7 = vld [vmem:[#allocation89_spill] sm:$0xff] }
 0x426   :  { %3504 = vst [vmem:[%s7136_s3 + $0x350] sm:$0xff] %v3360_v57  ;;  %3505 = vst.msk [vmem:[%s7136_s3 + $0x358] sm:$0xff] %vm661_vm1, %v3361_v58  ;;  %v3187_v52 = vpop.permute.xlu0 %3186  ;;  %v2992_v8 = vpop.permute.xlu1 %2991 }
 0x427   :  { %v3370_v25 = vadd.f32 %v3187_v52, %v2866_v41  ;;  %v3371_v45 = vadd.f32 %v3187_v52, %v2867_v11  ;;  %v3292_v38 = vadd.f32 %v2992_v8, %v2788_v17  ;;  %v3293_v0 = vadd.f32 %v2992_v8, %v2789_v37  ;;  %v8023_v41 = vld [vmem:[#allocation99_spill] sm:$0xff]  ;;  %v8024_v11 = vld [vmem:[#allocation101_spill] sm:$0xff] }
 0x428   :  { %v2870_v19 = vmul.f32 %v6117_v32, %v8023_v41  ;;  %v2871_v21 = vmul.f32 %v6117_v32, %v8024_v11  ;;  %v2792_v17 = vmul.f32 %v6004_v49, %v8025_v54  ;;  %v2793_v37 = vmul.f32 %v6004_v49, %v8026_v13 }
 0x429   :  { %3514 = vst [vmem:[%s7136_s3 + $0x3a0] sm:$0xff] %v3370_v25  ;;  %3515 = vst.msk [vmem:[%s7136_s3 + $0x3a8] sm:$0xff] %vm661_vm1, %v3371_v45 }
 0x42a   :  { %3436 = vst [vmem:[%s7136_s3 + $0x130] sm:$0xff] %v3292_v38  ;;  %3437 = vst.msk [vmem:[%s7136_s3 + $0x138] sm:$0xff] %vm661_vm1, %v3293_v0  ;;  %v3017_v26 = vpop.permute.xlu0 %3016  ;;  %v3172_v57 = vpop.permute.xlu1 %3171  ;;  %v8027_v0 = vld [vmem:[#allocation106_spill] sm:$0xff] }
 0x42b   :  { %v3302_v55 = vadd.f32 %v3017_v26, %v2798_v42  ;;  %v3303_v27 = vadd.f32 %v3017_v26, %v2799_v31  ;;  %v3364_v58 = vadd.f32 %v3172_v57, %v2860_v20  ;;  %v3365_v46 = vadd.f32 %v3172_v57, %v2861_v61  ;;  %v8028_v42 = vld [vmem:[#allocation108_spill] sm:$0xff]  ;;  %v8032_v57 = vld [vmem:[#allocation107_spill] sm:$0xff] }
 0x42c   :  { %v2802_v2 = vmul.f32 %v6153_v22, %v8027_v0  ;;  %v2803_v49 = vmul.f32 %v6153_v22, %v8028_v42  ;;  %v8030_v31 = vld [vmem:[#allocation176_spill] sm:$0xff]  ;;  %v8040_v42 = vld [vmem:[#allocation97_spill] sm:$0xff] }
 0x42d   :  { %3446 = vst [vmem:[%s7136_s3 + $0x180] sm:$0xff] %v3302_v55  ;;  %3447 = vst.msk [vmem:[%s7136_s3 + $0x188] sm:$0xff] %vm661_vm1, %v3303_v27  ;;  %v2864_v15 = vmul.f32 %v8030_v31, %v8029_v36  ;;  %v2865_v20 = vmul.f32 %v8030_v31, %v8031_v7  ;;  %v8039_v0 = vld [vmem:[#allocation208_spill] sm:$0xff] }
 0x42e   :  { %3508 = vst [vmem:[%s7136_s3 + $0x370] sm:$0xff] %v3364_v58  ;;  %3509 = vst.msk [vmem:[%s7136_s3 + $0x378] sm:$0xff] %vm661_vm1, %v3365_v46  ;;  %v3197_v32 = vpop.permute.xlu0 %3196  ;;  %v3002_v45 = vpop.permute.xlu1 %3001  ;;  %v2874_v58 = vmul.f32 %v6165_v39, %v8032_v57  ;;  %v8033_v46 = vld [vmem:[#allocation109_spill] sm:$0xff]  ;;  %v8044_v57 = vld [vmem:[#allocation104_spill] sm:$0xff] }
 0x42f   :  { %v3374_v52 = vadd.f32 %v3197_v32, %v2870_v19  ;;  %v3375_v25 = vadd.f32 %v3197_v32, %v2871_v21  ;;  %v3296_v8 = vadd.f32 %v3002_v45, %v2792_v17  ;;  %v3297_v38 = vadd.f32 %v3002_v45, %v2793_v37  ;;  %v8034_v19 = vld [vmem:[#allocation94_spill] sm:$0xff]  ;;  %v8035_v21 = vld [vmem:[#allocation96_spill] sm:$0xff] }
 0x430   :  { %v2875_v41 = vmul.f32 %v6165_v39, %v8033_v46  ;;  %v2796_v11 = vmul.f32 %v6045_v59, %v8034_v19  ;;  %v2797_v54 = vmul.f32 %v6045_v59, %v8035_v21 }
 0x431   :  { %3518 = vst [vmem:[%s7136_s3 + $0x3c0] sm:$0xff] %v3374_v52  ;;  %3519 = vst.msk [vmem:[%s7136_s3 + $0x3c8] sm:$0xff] %vm661_vm1, %v3375_v25  ;;  %v8036_v25 = vld [vmem:[#allocation114_spill] sm:$0xff] }
 0x432   :  { %3440 = vst [vmem:[%s7136_s3 + $0x150] sm:$0xff] %v3296_v8  ;;  %3441 = vst.msk [vmem:[%s7136_s3 + $0x158] sm:$0xff] %vm661_vm1, %v3297_v38  ;;  %v3027_v22 = vpop.permute.xlu0 %3026  ;;  %v3182_v26 = vpop.permute.xlu1 %3181  ;;  %v2806_v45 = vmul.f32 %v6199_v33, %v8036_v25  ;;  %v8037_v8 = vld [vmem:[#allocation116_spill] sm:$0xff]  ;;  %v8038_v38 = vld [vmem:[#allocation95_spill] sm:$0xff] }
 0x433   :  { %v3306_v24 = vadd.f32 %v3027_v22, %v2802_v2  ;;  %v3307_v61 = vadd.f32 %v3027_v22, %v2803_v49  ;;  %v3368_v55 = vadd.f32 %v3182_v26, %v2864_v15  ;;  %v3369_v27 = vadd.f32 %v3182_v26, %v2865_v20  ;;  %v8041_v22 = vld [vmem:[#allocation115_spill] sm:$0xff] }
 0x434   :  { %v2807_v59 = vmul.f32 %v6199_v33, %v8037_v8  ;;  %v2868_v2 = vmul.f32 %v8039_v0, %v8038_v38  ;;  %v2869_v49 = vmul.f32 %v8039_v0, %v8040_v42 }
 0x435   :  { %3450 = vst [vmem:[%s7136_s3 + $0x1a0] sm:$0xff] %v3306_v24  ;;  %3451 = vst.msk [vmem:[%s7136_s3 + $0x1a8] sm:$0xff] %vm661_vm1, %v3307_v61  ;;  %v2878_v24 = vmul.f32 %v6217_v63, %v8041_v22  ;;  %v8042_v61 = vld [vmem:[#allocation117_spill] sm:$0xff] }
 0x436   :  { %3512 = vst [vmem:[%s7136_s3 + $0x390] sm:$0xff] %v3368_v55  ;;  %3513 = vst.msk [vmem:[%s7136_s3 + $0x398] sm:$0xff] %vm661_vm1, %v3369_v27  ;;  %v3207_v39 = vpop.permute.xlu0 %3206  ;;  %v3012_v37 = vpop.permute.xlu1 %3011  ;;  %v2879_v26 = vmul.f32 %v6217_v63, %v8042_v61  ;;  %v8043_v55 = vld [vmem:[#allocation102_spill] sm:$0xff] }
 0x437   :  { %v3378_v17 = vadd.f32 %v3207_v39, %v2874_v58  ;;  %v3379_v13 = vadd.f32 %v3207_v39, %v2875_v41  ;;  %v3300_v32 = vadd.f32 %v3012_v37, %v2796_v11  ;;  %v3301_v52 = vadd.f32 %v3012_v37, %v2797_v54  ;;  %v8046_v39 = vld [vmem:[#allocation105_spill] sm:$0xff]  ;;  %v8051_v61 = vld [vmem:[#allocation118_spill] sm:$0xff] }
 0x438   :  { %v2800_v27 = vmul.f32 %v6089_v48, %v8043_v55  ;;  %v2801_v58 = vmul.f32 %v6089_v48, %v8044_v57  ;;  %v8045_v48 = vld [vmem:[#allocation103_spill] sm:$0xff] }
 0x439   :  { %3522 = vst [vmem:[%s7136_s3 + $0x3e0] sm:$0xff] %v3378_v17  ;;  %3523 = vst.msk [vmem:[%s7136_s3 + $0x3e8] sm:$0xff] %vm661_vm1, %v3379_v13  ;;  %v2872_v54 = vmul.f32 %v6103_v3, %v8045_v48  ;;  %v2873_v17 = vmul.f32 %v6103_v3, %v8046_v39  ;;  %v8047_v3 = vld [vmem:[#allocation110_spill] sm:$0xff] }
 0x43a   :  { %3444 = vst [vmem:[%s7136_s3 + $0x170] sm:$0xff] %v3300_v32  ;;  %3445 = vst.msk [vmem:[%s7136_s3 + $0x178] sm:$0xff] %vm661_vm1, %v3301_v52  ;;  %v3037_v33 = vpop.permute.xlu0 %3036  ;;  %v3192_v15 = vpop.permute.xlu1 %3191  ;;  %v2804_v8 = vmul.f32 %v6139_v56, %v8047_v3 }
 0x43b   :  { %v3310_v36 = vadd.f32 %v3037_v33, %v2806_v45  ;;  %v3311_v31 = vadd.f32 %v3037_v33, %v2807_v59  ;;  %v3372_v7 = vadd.f32 %v3192_v15, %v2868_v2  ;;  %v3373_v20 = vadd.f32 %v3192_v15, %v2869_v49  ;;  %v8048_v59 = vld [vmem:[#allocation112_spill] sm:$0xff] }
 0x43d   :  { %3454 = vst [vmem:[%s7136_s3 + $0x1c0] sm:$0xff] %v3310_v36  ;;  %3455 = vst.msk [vmem:[%s7136_s3 + $0x1c8] sm:$0xff] %vm661_vm1, %v3311_v31  ;;  %v8050_v36 = vld [vmem:[#allocation113_spill] sm:$0xff] }
 0x43e   :  { %3516 = vst [vmem:[%s7136_s3 + $0x3b0] sm:$0xff] %v3372_v7  ;;  %3517 = vst.msk [vmem:[%s7136_s3 + $0x3b8] sm:$0xff] %vm661_vm1, %v3373_v20  ;;  %v3217_v63 = vpop.permute.xlu0 %3216  ;;  %v3022_v19 = vpop.permute.xlu1 %3021 }
 0x43f   :  { %v3382_v46 = vadd.f32 %v3217_v63, %v2878_v24  ;;  %v3383_v41 = vadd.f32 %v3217_v63, %v2879_v26  ;;  %v3304_v11 = vadd.f32 %v3022_v19, %v2800_v27  ;;  %v3305_v21 = vadd.f32 %v3022_v19, %v2801_v58  ;;  %v8054_v19 = vld [vmem:[#allocation121_spill] sm:$0xff] }
 0x441   :  { %3526 = vst [vmem:[%s7136_s3 + $0x400] sm:$0xff] %v3382_v46  ;;  %3527 = vst.msk [vmem:[%s7136_s3 + $0x408] sm:$0xff] %vm661_vm1, %v3383_v41 }
 0x442   :  { %3448 = vst [vmem:[%s7136_s3 + $0x190] sm:$0xff] %v3304_v11  ;;  %3449 = vst.msk [vmem:[%s7136_s3 + $0x198] sm:$0xff] %vm661_vm1, %v3305_v21  ;;  %v3047_v13 = vpop.permute.xlu0 %3046  ;;  %v3202_v52 = vpop.permute.xlu1 %3201 }
 0x443   :  { %v3314_v37 = vadd.f32 %v3047_v13, %v6281_v23  ;;  %v3315_v32 = vadd.f32 %v3047_v13, %v6284_v1  ;;  %v3376_v25 = vadd.f32 %v3202_v52, %v2872_v54  ;;  %v3377_v45 = vadd.f32 %v3202_v52, %v2873_v17 }
 0x444   :  { %v2805_v23 = vmul.f32 %v6139_v56, %v8048_v59  ;;  %v8049_v56 = vld [vmem:[#allocation111_spill] sm:$0xff] }
 0x445   :  { %3458 = vst [vmem:[%s7136_s3 + $0x1e0] sm:$0xff] %v3314_v37  ;;  %3459 = vst.msk [vmem:[%s7136_s3 + $0x1e8] sm:$0xff] %vm661_vm1, %v3315_v32  ;;  %v2876_v33 = vmul.f32 %v6151_v10, %v8049_v56 }
 0x446   :  { %3520 = vst [vmem:[%s7136_s3 + $0x3d0] sm:$0xff] %v3376_v25  ;;  %3521 = vst.msk [vmem:[%s7136_s3 + $0x3d8] sm:$0xff] %vm661_vm1, %v3377_v45  ;;  %v3227_v1 = vpop.permute.xlu0 %3226  ;;  %v3032_v2 = vpop.permute.xlu1 %3031 }
 0x447   :  { %v3386_v38 = vadd.f32 %v3227_v1, %v6297_v18  ;;  %v3387_v0 = vadd.f32 %v3227_v1, %v6300_v6  ;;  %v3308_v42 = vadd.f32 %v3032_v2, %v2804_v8  ;;  %v3309_v49 = vadd.f32 %v3032_v2, %v2805_v23 }
 0x448   :  { %v2877_v18 = vmul.f32 %v6151_v10, %v8050_v36 }
 0x449   :  { %3530 = vst [vmem:[%s7136_s3 + $0x420] sm:$0xff] %v3386_v38  ;;  %3531 = vst.msk [vmem:[%s7136_s3 + $0x428] sm:$0xff] %vm661_vm1, %v3387_v0 }
 0x44a   :  { %3452 = vst [vmem:[%s7136_s3 + $0x1b0] sm:$0xff] %v3308_v42  ;;  %3453 = vst.msk [vmem:[%s7136_s3 + $0x1b8] sm:$0xff] %vm661_vm1, %v3309_v49  ;;  %v3057_v6 = vpop.permute.xlu0 %3056  ;;  %v3212_v7 = vpop.permute.xlu1 %3211 }
 0x44b   :  { %v3318_v31 = vadd.f32 %v3057_v6, %v6380_v43  ;;  %v3319_v15 = vadd.f32 %v3057_v6, %v6383_v16  ;;  %v3380_v20 = vadd.f32 %v3212_v7, %v2876_v33  ;;  %v3381_v22 = vadd.f32 %v3212_v7, %v2877_v18 }
 0x44d   :  { %3462 = vst [vmem:[%s7136_s3 + $0x200] sm:$0xff] %v3318_v31  ;;  %3463 = vst.msk [vmem:[%s7136_s3 + $0x208] sm:$0xff] %vm661_vm1, %v3319_v15 }
 0x44e   :  { %3524 = vst [vmem:[%s7136_s3 + $0x3f0] sm:$0xff] %v3380_v20  ;;  %3525 = vst.msk [vmem:[%s7136_s3 + $0x3f8] sm:$0xff] %vm661_vm1, %v3381_v22  ;;  %v3237_v10 = vpop.permute.xlu0 %3236  ;;  %v3042_v24 = vpop.permute.xlu1 %3041 }
 0x44f   :  { %v3390_v43 = vadd.f32 %v3237_v10, %v6393_v44  ;;  %v3391_v16 = vadd.f32 %v3237_v10, %v6396_v28  ;;  %v3312_v26 = vadd.f32 %v3042_v24, %v8051_v61  ;;  %v3313_v55 = vadd.f32 %v3042_v24, %v6191_v60 }
 0x451   :  { %3534 = vst [vmem:[%s7136_s3 + $0x440] sm:$0xff] %v3390_v43  ;;  %3535 = vst.msk [vmem:[%s7136_s3 + $0x448] sm:$0xff] %vm661_vm1, %v3391_v16 }
 0x452   :  { %3456 = vst [vmem:[%s7136_s3 + $0x1d0] sm:$0xff] %v3312_v26  ;;  %3457 = vst.msk [vmem:[%s7136_s3 + $0x1d8] sm:$0xff] %vm661_vm1, %v3313_v55  ;;  %v3222_v44 = vpop.permute.xlu1 %3221 }
 0x453   :  { %v3067_v60 = vpop.permute.xlu0 %3066  ;;  %v3384_v28 = vadd.f32 %v3222_v44, %v6202_v40  ;;  %v3385_v27 = vadd.f32 %v3222_v44, %v6205_v47 }
 0x454   :  { %v3322_v57 = vadd.f32 %v3067_v60, %v6465_v34  ;;  %v3323_v58 = vadd.f32 %v3067_v60, %v6468_v12  ;;  %v8052_v12 = vld [vmem:[#allocation120_spill] sm:$0xff] }
 0x455   :  { %3528 = vst [vmem:[%s7136_s3 + $0x410] sm:$0xff] %v3384_v28  ;;  %3529 = vst.msk [vmem:[%s7136_s3 + $0x418] sm:$0xff] %vm661_vm1, %v3385_v27 }
 0x456   :  { %3466 = vst [vmem:[%s7136_s3 + $0x220] sm:$0xff] %v3322_v57  ;;  %3467 = vst.msk [vmem:[%s7136_s3 + $0x228] sm:$0xff] %vm661_vm1, %v3323_v58  ;;  %v3052_v40 = vpop.permute.xlu1 %3051 }
 0x457   :  { %v3247_v47 = vpop.permute.xlu0 %3246  ;;  %v3316_v34 = vadd.f32 %v3052_v40, %v6287_v51  ;;  %v3317_v63 = vadd.f32 %v3052_v40, %v8052_v12 }
 0x458   :  { %v3394_v46 = vadd.f32 %v3247_v47, %v6476_v14  ;;  %v3395_v41 = vadd.f32 %v3247_v47, %v6479_v4  ;;  %v8053_v14 = vld [vmem:[#allocation119_spill] sm:$0xff] }
 0x459   :  { %3460 = vst [vmem:[%s7136_s3 + $0x1f0] sm:$0xff] %v3316_v34  ;;  %3461 = vst.msk [vmem:[%s7136_s3 + $0x1f8] sm:$0xff] %vm661_vm1, %v3317_v63 }
 0x45a   :  { %3538 = vst [vmem:[%s7136_s3 + $0x460] sm:$0xff] %v3394_v46  ;;  %3539 = vst.msk [vmem:[%s7136_s3 + $0x468] sm:$0xff] %vm661_vm1, %v3395_v41  ;;  %v3232_v51 = vpop.permute.xlu1 %3231 }
 0x45b   :  { %v3388_v4 = vadd.f32 %v3232_v51, %v8053_v14  ;;  %v3389_v11 = vadd.f32 %v3232_v51, %v8054_v19 }
 0x45d   :  { %3532 = vst [vmem:[%s7136_s3 + $0x430] sm:$0xff] %v3388_v4  ;;  %3533 = vst.msk [vmem:[%s7136_s3 + $0x438] sm:$0xff] %vm661_vm1, %v3389_v11 }
 0x45e   :  { %v3062_v21 = vpop.permute.xlu1 %3061 }
 0x45f   :  { %v3320_v48 = vadd.f32 %v3062_v21, %v6357_v29  ;;  %v3321_v54 = vadd.f32 %v3062_v21, %v6360_v30 }
 0x461   :  { %3464 = vst [vmem:[%s7136_s3 + $0x210] sm:$0xff] %v3320_v48  ;;  %3465 = vst.msk [vmem:[%s7136_s3 + $0x218] sm:$0xff] %vm661_vm1, %v3321_v54 }
 0x462   :  { %v3242_v39 = vpop.permute.xlu1 %3241 }
 0x463   :  { %v3392_v17 = vadd.f32 %v3242_v39, %v6374_v53  ;;  %v3393_v13 = vadd.f32 %v3242_v39, %v6377_v5 }
 0x465   :  { %3536 = vst [vmem:[%s7136_s3 + $0x450] sm:$0xff] %v3392_v17  ;;  %3537 = vst.msk [vmem:[%s7136_s3 + $0x458] sm:$0xff] %vm661_vm1, %v3393_v13 }
 0x470   :  { %v3072_v29 = vpop.permute.xlu1 %3071 }
 0x471   :  { %v3324_v30 = vadd.f32 %v3072_v29, %v6452_v50  ;;  %v3325_v37 = vadd.f32 %v3072_v29, %v6455_v35 }
 0x473   :  { %3468 = vst [vmem:[%s7136_s3 + $0x230] sm:$0xff] %v3324_v30  ;;  %3469 = vst.msk [vmem:[%s7136_s3 + $0x238] sm:$0xff] %vm661_vm1, %v3325_v37 }
 0x474   :  { %v3252_v53 = vpop.permute.xlu1 %3251 }
 0x475   :  { %v3396_v5 = vadd.f32 %v3252_v53, %v6459_v62  ;;  %v3397_v32 = vadd.f32 %v3252_v53, %v6462_v9 }
 0x477   :  { %3540 = vst [vmem:[%s7136_s3 + $0x470] sm:$0xff] %v3396_v5  ;;  %3541 = vst.msk [vmem:[%s7136_s3 + $0x478] sm:$0xff] %vm661_vm1, %v3397_v32 }

</bundles_post_ra>
